<compile_context>
chip_gen: v7x
topology: tpu7x:2x2x1
jax: 0.10.0
libtpu: 0.0.40
codegen_flags: <defaults>
</compile_context>

<pallas_src>
import math
import functools

import jax
import jax.numpy as jnp
from jax import lax
from jax.experimental import pallas as pl
from jax.experimental.pallas import tpu as pltpu


def _default_vmem_limit():
    try:
        cap = getattr(pltpu.get_tpu_info(), "vmem_capacity_bytes", None)
        if cap:
            return min((int(cap) * 3) // 4, 100 * 1024 * 1024)
    except Exception:
        pass
    return 64 * 1024 * 1024


_VMEM_LIMIT = _default_vmem_limit()


# ----------------------------- in-kernel helpers -----------------------------

def _layernorm(x, gamma, beta, eps=1e-5):
    mu = jnp.mean(x, axis=-1, keepdims=True)
    var = jnp.mean((x - mu) ** 2, axis=-1, keepdims=True)
    return (x - mu) * jax.lax.rsqrt(var + eps) * gamma + beta


def _gelu_tanh(x):
    c = math.sqrt(2.0 / math.pi)
    return 0.5 * x * (1.0 + jnp.tanh(c * (x + 0.044715 * x * x * x)))


def _pick_tile(n, prefer=(256, 128, 64, 32, 16, 8)):
    for c in prefer:
        if n >= c and n % c == 0:
            return c
    return n


# -------------- kernel 1: ln_1 + fused QKV proj -> (B, H, T, hd) --------------

def qkv_kernel(x_ref, g_ref, b_ref, w_ref, bias_ref, q_ref, k_ref, v_ref,
               *, n_head):
    h = _layernorm(x_ref[0], g_ref[...], b_ref[...])                 # f32
    qkv = jnp.dot(h.astype(jnp.bfloat16), w_ref[...],
                  preferred_element_type=jnp.float32) + bias_ref[...]
    qkv = qkv.astype(q_ref.dtype)                                    # bf16
    C3 = qkv.shape[-1]
    C = C3 // 3
    hd = C // n_head
    # static per-head lane slices -> head-major layout, no wrapper split/transpose
    for hh in range(n_head):
        q_ref[0, hh] = qkv[:, hh * hd:(hh + 1) * hd]
        k_ref[0, hh] = qkv[:, C + hh * hd:C + (hh + 1) * hd]
        v_ref[0, hh] = qkv[:, 2 * C + hh * hd:2 * C + (hh + 1) * hd]


def run_qkv(x, ln_g, ln_b, w_qkv_bf16, b_qkv, *, n_head, tq):
    B, T, C = x.shape
    hd = C // n_head
    nq = T // tq
    kern = functools.partial(qkv_kernel, n_head=n_head)
    head_shape = jax.ShapeDtypeStruct((B, n_head, T, hd), jnp.bfloat16)
    head_spec = pl.BlockSpec((1, n_head, tq, hd), lambda b_, i: (b_, 0, i, 0))
    return pl.pallas_call(
        kern,
        out_shape=(head_shape, head_shape, head_shape),
        grid=(B, nq),
        in_specs=[
            pl.BlockSpec((1, tq, C), lambda b_, i: (b_, i, 0)),
            pl.BlockSpec(ln_g.shape, lambda b_, i: (0, 0)),
            pl.BlockSpec(ln_b.shape, lambda b_, i: (0, 0)),
            pl.BlockSpec(w_qkv_bf16.shape, lambda b_, i: (0, 0)),
            pl.BlockSpec(b_qkv.shape, lambda b_, i: (0, 0)),
        ],
        out_specs=(head_spec, head_spec, head_spec),
        compiler_params=pltpu.CompilerParams(
            dimension_semantics=("parallel", "parallel"),
            vmem_limit_bytes=_VMEM_LIMIT),
    )(x, ln_g, ln_b, w_qkv_bf16, b_qkv)


# ---------------------- kernel 2: flash causal attention ---------------------
# grid = (B, T//tq, T//tk); heads batched via einsum, online softmax in f32
# scratch; causal tile skipping + clamped KV DMA; lane-dense (B, T, C) output.

def flash_attn_kernel(q_ref, k_ref, v_ref, o_ref, m_ref, l_ref, acc_ref,
                      *, scale, tq, tk):
    qi = pl.program_id(1)
    ki = pl.program_id(2)
    nk = pl.num_programs(2)

    @pl.when(ki == 0)
    def _():
        m_ref[...] = jnp.full_like(m_ref, -jnp.inf)
        l_ref[...] = jnp.zeros_like(l_ref)
        acc_ref[...] = jnp.zeros_like(acc_ref)

    def update(masked):
        q = q_ref[0]                                   # (H, tq, hd) bf16
        k = k_ref[0]                                   # (H, tk, hd) bf16
        v = v_ref[0]                                   # (H, tk, hd) bf16
        s = jnp.einsum('hqd,hkd->hqk', q, k,
                       preferred_element_type=jnp.float32) * scale
        if masked:
            # diagonal tile (qi == ki, tq == tk): local row >= col is exact
            row = lax.broadcasted_iota(jnp.int32, (tq, tk), 0)
            col = lax.broadcasted_iota(jnp.int32, (tq, tk), 1)
            s = jnp.where((row >= col)[None], s, -1e30)   # finite, NaN-safe

        m_prev = m_ref[...]
        m_new = jnp.maximum(m_prev, jnp.max(s, axis=-1, keepdims=True))
        alpha = jnp.exp(m_prev - m_new)
        p = jnp.exp(s - m_new)
        l_ref[...] = alpha * l_ref[...] + jnp.sum(p, axis=-1, keepdims=True)
        acc_ref[...] = alpha * acc_ref[...] + jnp.einsum(
            'hqk,hkd->hqd', p.astype(v.dtype), v,
            preferred_element_type=jnp.float32)
        m_ref[...] = m_new

    @pl.when(ki < qi)          # fully below the diagonal: no mask needed
    def _():
        update(masked=False)

    @pl.when(ki == qi)         # diagonal tile: apply the causal mask
    def _():
        update(masked=True)

    # tiles with ki > qi are skipped entirely (and never DMA'd, see index_map)

    @pl.when(ki == nk - 1)
    def _():
        inv = pl.reciprocal(l_ref[...], approx=True)   # EUP, not VPU divide
        y = acc_ref[...] * inv                         # (H, tq, hd) f32
        H, _, hd = y.shape
        # merge heads into a lane-dense (tq, C) output block
        for hh in range(H):
            o_ref[0, :, hh * hd:(hh + 1) * hd] = y[hh].astype(o_ref.dtype)


def run_flash(q, k, v, *, tq, tk):
    B, H, T, hd = q.shape
    C = H * hd
    nq, nk = T // tq, T // tk
    scale = 1.0 / math.sqrt(hd)
    kern = functools.partial(flash_attn_kernel, scale=scale, tq=tq, tk=tk)
    kv_spec = pl.BlockSpec((1, H, tk, hd),
                           lambda b_, i, j: (b_, 0, jnp.minimum(i, j), 0))
    return pl.pallas_call(
        kern,
        out_shape=jax.ShapeDtypeStruct((B, T, C), jnp.bfloat16),
        grid=(B, nq, nk),
        in_specs=[
            pl.BlockSpec((1, H, tq, hd), lambda b_, i, j: (b_, 0, i, 0)),
            kv_spec,   # k: clamped -> skipped causal tiles issue no new DMA
            kv_spec,   # v
        ],
        out_specs=pl.BlockSpec((1, tq, C), lambda b_, i, j: (b_, i, 0)),
        scratch_shapes=[
            pltpu.VMEM((H, tq, 1), jnp.float32),    # running max
            pltpu.VMEM((H, tq, 1), jnp.float32),    # running denom
            pltpu.VMEM((H, tq, hd), jnp.float32),   # accumulator
        ],
        compiler_params=pltpu.CompilerParams(
            dimension_semantics=("parallel", "parallel", "arbitrary"),
            vmem_limit_bytes=_VMEM_LIMIT),
    )(q, k, v)


# --------------- kernel 3: out-proj + residual + ln_2 + MLP -------------------

def proj_mlp_kernel(x_ref, y_ref,
                    w_ap_ref, b_ap_ref,
                    g2_ref, b2_ref,
                    w_fc_ref, b_fc_ref,
                    w_mp_ref, b_mp_ref,
                    o_ref):
    x = x_ref[0]                                        # (tq, C) f32 residual
    y = y_ref[0]                                        # (tq, C) bf16 attn out
    x = x + (jnp.dot(y, w_ap_ref[...],
                     preferred_element_type=jnp.float32) + b_ap_ref[...])
    h = _layernorm(x, g2_ref[...], b2_ref[...])         # f32 stats
    f = jnp.dot(h.astype(jnp.bfloat16), w_fc_ref[...],
                preferred_element_type=jnp.float32) + b_fc_ref[...]
    f = _gelu_tanh(f)                                   # f32 elementwise
    m = jnp.dot(f.astype(jnp.bfloat16), w_mp_ref[...],
                preferred_element_type=jnp.float32) + b_mp_ref[...]
    o_ref[0] = x + m


def run_proj_mlp(x, y, w_ap, b_ap, g2, b2, w_fc, b_fc, w_mp, b_mp, *, tq):
    B, T, C = x.shape
    nq = T // tq

    def full(a):
        return pl.BlockSpec(a.shape, lambda b_, i, _nd=a.ndim: (0,) * _nd)

    return pl.pallas_call(
        proj_mlp_kernel,
        out_shape=jax.ShapeDtypeStruct((B, T, C), jnp.float32),
        grid=(B, nq),
        in_specs=[pl.BlockSpec((1, tq, C), lambda b_, i: (b_, i, 0)),
                  pl.BlockSpec((1, tq, C), lambda b_, i: (b_, i, 0)),
                  full(w_ap), full(b_ap), full(g2), full(b2),
                  full(w_fc), full(b_fc), full(w_mp), full(b_mp)],
        out_specs=pl.BlockSpec((1, tq, C), lambda b_, i: (b_, i, 0)),
        compiler_params=pltpu.CompilerParams(
            dimension_semantics=("parallel", "parallel"),
            vmem_limit_bytes=_VMEM_LIMIT),
    )(x, y, w_ap, b_ap, g2, b2, w_fc, b_fc, w_mp, b_mp)


# ----------------------- final ln_f + tiled lm_head ---------------------------
# ln_f is computed once per (b, i) tile (vocab axis "arbitrary") and cached in
# a VMEM scratch that is reused across all vocab tiles.

def head_kernel(x_ref, g_ref, b_ref, w_ref, o_ref, h_scratch):
    @pl.when(pl.program_id(2) == 0)
    def _():
        h = _layernorm(x_ref[0], g_ref[...], b_ref[...])
        h_scratch[...] = h.astype(jnp.bfloat16)
    o_ref[0] = jnp.dot(h_scratch[...], w_ref[...],
                       preferred_element_type=jnp.float32)


def run_head(x, ln_g, ln_b, w_pad_bf16, *, tq, tv):
    B, T, C = x.shape
    Vp = w_pad_bf16.shape[1]
    nq, nv = T // tq, Vp // tv
    return pl.pallas_call(
        head_kernel,
        out_shape=jax.ShapeDtypeStruct((B, T, Vp), jnp.float32),
        grid=(B, nq, nv),
        in_specs=[pl.BlockSpec((1, tq, C), lambda b_, i, j: (b_, i, 0)),
                  pl.BlockSpec(ln_g.shape, lambda b_, i, j: (0, 0)),
                  pl.BlockSpec(ln_b.shape, lambda b_, i, j: (0, 0)),
                  pl.BlockSpec((C, tv), lambda b_, i, j: (0, j))],
        out_specs=pl.BlockSpec((1, tq, tv), lambda b_, i, j: (b_, i, j)),
        scratch_shapes=[pltpu.VMEM((tq, C), jnp.bfloat16)],
        compiler_params=pltpu.CompilerParams(
            dimension_semantics=("parallel", "parallel", "arbitrary"),
            vmem_limit_bytes=_VMEM_LIMIT),
    )(x, ln_g, ln_b, w_pad_bf16)


# ------------------------------ parameter init --------------------------------

def init_params(key, vocab_size, block_size, n_layer, n_head, n_embd):
    keys = jax.random.split(key, 4 + 6 * n_layer)
    ki = iter(keys)
    std = 0.02
    params = {
        'wte': jax.random.normal(next(ki), (vocab_size, n_embd), jnp.float32) * std,
        'wpe': jax.random.normal(next(ki), (block_size, n_embd), jnp.float32) * std,
        'lnf_g': jnp.ones((1, n_embd), jnp.float32),
        'lnf_b': jnp.zeros((1, n_embd), jnp.float32),
        'w_head': jax.random.normal(next(ki), (n_embd, vocab_size), jnp.float32) * std,
        'blocks': [],
    }
    for _ in range(n_layer):
        blk = {
            'ln1_g': jnp.ones((1, n_embd), jnp.float32),
            'ln1_b': jnp.zeros((1, n_embd), jnp.float32),
            'w_attn': jax.random.normal(next(ki), (n_embd, 3 * n_embd), jnp.float32) * std,
            'b_attn': jnp.zeros((1, 3 * n_embd), jnp.float32),
            'w_aproj': jax.random.normal(next(ki), (n_embd, n_embd), jnp.float32) * std,
            'b_aproj': jnp.zeros((1, n_embd), jnp.float32),
            'ln2_g': jnp.ones((1, n_embd), jnp.float32),
            'ln2_b': jnp.zeros((1, n_embd), jnp.float32),
            'w_fc': jax.random.normal(next(ki), (n_embd, 4 * n_embd), jnp.float32) * std,
            'b_fc': jnp.zeros((1, 4 * n_embd), jnp.float32),
            'w_mproj': jax.random.normal(next(ki), (4 * n_embd, n_embd), jnp.float32) * std,
            'b_mproj': jnp.zeros((1, n_embd), jnp.float32),
        }
        params['blocks'].append(blk)
    return params


def prepare_params(params):
    """One-time (outside jit) weight prep: bf16 casts and lm_head padding."""
    bf16 = jnp.bfloat16
    V = params['w_head'].shape[1]
    Vp = ((V + 127) // 128) * 128
    prep = {
        'wte': params['wte'],
        'wpe': params['wpe'],
        'lnf_g': params['lnf_g'],
        'lnf_b': params['lnf_b'],
        'w_head': jnp.pad(params['w_head'], ((0, 0), (0, Vp - V))).astype(bf16),
        'blocks': [],
    }
    for p in params['blocks']:
        prep['blocks'].append({
            'ln1_g': p['ln1_g'], 'ln1_b': p['ln1_b'],
            'w_attn': p['w_attn'].astype(bf16), 'b_attn': p['b_attn'],
            'w_aproj': p['w_aproj'].astype(bf16), 'b_aproj': p['b_aproj'],
            'ln2_g': p['ln2_g'], 'ln2_b': p['ln2_b'],
            'w_fc': p['w_fc'].astype(bf16), 'b_fc': p['b_fc'],
            'w_mproj': p['w_mproj'].astype(bf16), 'b_mproj': p['b_mproj'],
        })
    return prep


# ------------------------------- GPT forward ----------------------------------

def gpt_forward(prepared, idx, *, n_head, vocab_size):
    B, T = idx.shape
    C = prepared['wte'].shape[1]
    tq = _pick_tile(T)
    tk = tq

    # token / positional embedding gather: plain-JAX glue
    x = jnp.take(prepared['wte'], idx, axis=0) + prepared['wpe'][:T][None, :, :]

    for blk in prepared['blocks']:
        q, k, v = run_qkv(x, blk['ln1_g'], blk['ln1_b'],
                          blk['w_attn'], blk['b_attn'], n_head=n_head, tq=tq)
        y = run_flash(q, k, v, tq=tq, tk=tk)             # (B, T, C) bf16
        x = run_proj_mlp(x, y,
                         blk['w_aproj'], blk['b_aproj'],
                         blk['ln2_g'], blk['ln2_b'],
                         blk['w_fc'], blk['b_fc'],
                         blk['w_mproj'], blk['b_mproj'], tq=tq)

    Vp = prepared['w_head'].shape[1]
    tv = _pick_tile(Vp, prefer=(2048, 1024, 512, 256, 128))
    logits = run_head(x, prepared['lnf_g'], prepared['lnf_b'],
                      prepared['w_head'], tq=tq, tv=tv)
    return logits[..., :vocab_size]
    # TODO(synk): cross-entropy loss branch (target is not None) not implemented;
    # the reference forward returns (logits, None) when target is None.


# --------------------------- pure-JAX reference check --------------------------
# Mirrors the kernel numerics (bf16 matmul operands, f32 accumulation/stats).

def _ref_forward(params, idx, n_head):
    bf16 = jnp.bfloat16
    B, T = idx.shape
    x = jnp.take(params['wte'], idx, axis=0) + params['wpe'][:T][None]
    C = x.shape[-1]
    hd = C // n_head
    scale = 1.0 / math.sqrt(hd)
    causal = jnp.tril(jnp.ones((T, T), bool))
    for p in params['blocks']:
        h = _layernorm(x, p['ln1_g'], p['ln1_b'])
        qkv = jnp.dot(h.astype(bf16), p['w_attn'].astype(bf16),
                      preferred_element_type=jnp.float32) + p['b_attn']
        qkv = qkv.astype(bf16)
        q, k, v = jnp.split(qkv, 3, axis=-1)
        q = q.reshape(B, T, n_head, hd).transpose(0, 2, 1, 3)
        k = k.reshape(B, T, n_head, hd).transpose(0, 2, 1, 3)
        v = v.reshape(B, T, n_head, hd).transpose(0, 2, 1, 3)
        att = jnp.einsum('bhqd,bhkd->bhqk', q, k,
                         preferred_element_type=jnp.float32) * scale
        att = jnp.where(causal, att, -1e30)
        att = jax.nn.softmax(att, axis=-1)
        y = jnp.einsum('bhqk,bhkd->bhqd', att.astype(bf16), v,
                       preferred_element_type=jnp.float32)
        y = y.transpose(0, 2, 1, 3).reshape(B, T, C).astype(bf16)
        x = x + (jnp.dot(y, p['w_aproj'].astype(bf16),
                         preferred_element_type=jnp.float32) + p['b_aproj'])
        h2 = _layernorm(x, p['ln2_g'], p['ln2_b'])
        f = _gelu_tanh(jnp.dot(h2.astype(bf16), p['w_fc'].astype(bf16),
                               preferred_element_type=jnp.float32) + p['b_fc'])
        x = x + (jnp.dot(f.astype(bf16), p['w_mproj'].astype(bf16),
                         preferred_element_type=jnp.float32) + p['b_mproj'])
    xf = _layernorm(x, params['lnf_g'], params['lnf_b'])
    return jnp.dot(xf.astype(bf16), params['w_head'].astype(bf16),
                   preferred_element_type=jnp.float32)


# ------------------------------------ main -------------------------------------

if __name__ == "__main__":
    # small GPT config
    vocab_size = 64
    block_size = 16
    n_layer = 2
    n_head = 4
    n_embd = 32

    B, T = 2, 8

    key = jax.random.PRNGKey(0)
    pkey, ikey = jax.random.split(key)
    params = init_params(pkey, vocab_size, block_size, n_layer, n_head, n_embd)
    idx = jax.random.randint(ikey, (B, T), 0, vocab_size, dtype=jnp.int32)

    # one-time weight prep (bf16 casts, lm_head pad) outside jit
    prepared = prepare_params(params)

    fwd = jax.jit(functools.partial(gpt_forward, n_head=n_head,
                                    vocab_size=vocab_size))
    logits = fwd(prepared, idx)
    logits = jax.block_until_ready(logits)

    assert logits.shape == (B, T, vocab_size), logits.shape

    ref = _ref_forward(params, idx, n_head)
    max_err = float(jnp.max(jnp.abs(logits - ref)))
    assert jnp.allclose(logits, ref, atol=1e-2, rtol=1e-2), max_err

    print("KERNEL_OK")
</pallas_src>

<mosaic_0001>
module attributes {stable_mosaic.version = 11 : i64} {
  func.func @qkv_kernel(%arg0: i32, %arg1: i32, %arg2: memref<1x8x32xf32, #tpu.memory_space<vmem>>, %arg3: memref<1x32xf32, #tpu.memory_space<vmem>>, %arg4: memref<1x32xf32, #tpu.memory_space<vmem>>, %arg5: memref<32x96xbf16, #tpu.memory_space<vmem>>, %arg6: memref<1x96xf32, #tpu.memory_space<vmem>>, %arg7: memref<1x4x8x8xbf16, #tpu.memory_space<vmem>>, %arg8: memref<1x4x8x8xbf16, #tpu.memory_space<vmem>>, %arg9: memref<1x4x8x8xbf16, #tpu.memory_space<vmem>>) attributes {dimension_semantics = [#tpu.dimension_semantics<parallel>, #tpu.dimension_semantics<parallel>], iteration_bounds = array<i64: 2, 1>, scalar_prefetch = 0 : i64, scratch_operands = 0 : i64, tpu.core_type = #tpu.core_type<tc>, window_params = [{transform_indices = @transform_0, window_bounds = array<i64: 1, 8, 32>}, {pipeline_mode = #tpu.pipeline_mode<synchronous>, transform_indices = @transform_1, window_bounds = array<i64: 1, 32>}, {pipeline_mode = #tpu.pipeline_mode<synchronous>, transform_indices = @transform_2, window_bounds = array<i64: 1, 32>}, {pipeline_mode = #tpu.pipeline_mode<synchronous>, transform_indices = @transform_3, window_bounds = array<i64: 32, 96>}, {pipeline_mode = #tpu.pipeline_mode<synchronous>, transform_indices = @transform_4, window_bounds = array<i64: 1, 96>}, {transform_indices = @transform_5, window_bounds = array<i64: 1, 4, 8, 8>}, {transform_indices = @transform_6, window_bounds = array<i64: 1, 4, 8, 8>}, {transform_indices = @transform_7, window_bounds = array<i64: 1, 4, 8, 8>}]} {
    %c0 = arith.constant 0 : index
    %c0_0 = arith.constant 0 : index
    %c0_1 = arith.constant 0 : index
    %0 = vector.load %arg2[%c0, %c0_0, %c0_1] : memref<1x8x32xf32, #tpu.memory_space<vmem>>, vector<1x8x32xf32>
    %1 = vector.shape_cast %0 : vector<1x8x32xf32> to vector<8x32xf32>
    %c0_2 = arith.constant 0 : index
    %c0_3 = arith.constant 0 : index
    %2 = vector.load %arg3[%c0_2, %c0_3] : memref<1x32xf32, #tpu.memory_space<vmem>>, vector<1x32xf32>
    %c0_4 = arith.constant 0 : index
    %c0_5 = arith.constant 0 : index
    %3 = vector.load %arg4[%c0_4, %c0_5] : memref<1x32xf32, #tpu.memory_space<vmem>>, vector<1x32xf32>
    %cst = arith.constant dense<0.000000e+00> : vector<8xf32>
    %4 = vector.multi_reduction <add>, %1, %cst [1] : vector<8x32xf32> to vector<8xf32>
    %5 = vector.shape_cast %4 : vector<8xf32> to vector<8x1xf32>
    %cst_6 = arith.constant 3.200000e+01 : f32
    %6 = vector.broadcast %cst_6 : f32 to vector<8x1xf32>
    %7 = arith.divf %5, %6 : vector<8x1xf32>
    %8 = vector.broadcast %7 : vector<8x1xf32> to vector<8x32xf32>
    %9 = arith.subf %1, %8 : vector<8x32xf32>
    %10 = arith.mulf %9, %9 : vector<8x32xf32>
    %cst_7 = arith.constant dense<0.000000e+00> : vector<8xf32>
    %11 = vector.multi_reduction <add>, %10, %cst_7 [1] : vector<8x32xf32> to vector<8xf32>
    %12 = vector.shape_cast %11 : vector<8xf32> to vector<8x1xf32>
    %cst_8 = arith.constant 3.200000e+01 : f32
    %13 = vector.broadcast %cst_8 : f32 to vector<8x1xf32>
    %14 = arith.divf %12, %13 : vector<8x1xf32>
    %15 = vector.broadcast %7 : vector<8x1xf32> to vector<8x32xf32>
    %16 = arith.subf %1, %15 : vector<8x32xf32>
    %cst_9 = arith.constant 9.99999974E-6 : f32
    %17 = vector.broadcast %cst_9 : f32 to vector<8x1xf32>
    %18 = arith.addf %14, %17 : vector<8x1xf32>
    %19 = math.rsqrt %18 : vector<8x1xf32>
    %20 = vector.broadcast %19 : vector<8x1xf32> to vector<8x32xf32>
    %21 = arith.mulf %16, %20 : vector<8x32xf32>
    %22 = vector.broadcast %2 : vector<1x32xf32> to vector<8x32xf32>
    %23 = arith.mulf %21, %22 : vector<8x32xf32>
    %24 = vector.broadcast %3 : vector<1x32xf32> to vector<8x32xf32>
    %25 = arith.addf %23, %24 : vector<8x32xf32>
    %26 = arith.truncf %25 : vector<8x32xf32> to vector<8x32xbf16>
    %c0_10 = arith.constant 0 : index
    %c0_11 = arith.constant 0 : index
    %27 = vector.load %arg5[%c0_10, %c0_11] : memref<32x96xbf16, #tpu.memory_space<vmem>>, vector<32x96xbf16>
    %cst_12 = arith.constant dense<0.000000e+00> : vector<8x96xf32>
    %28 = tpu.matmul %26, %27, %cst_12 {dimension_numbers = #tpu.dot_dimension_numbers<[1], [0], [0], [1], [0, 0, 1, 1], [], []>} : vector<8x32xbf16>, vector<32x96xbf16>, vector<8x96xf32> -> vector<8x96xf32>
    %c0_13 = arith.constant 0 : index
    %c0_14 = arith.constant 0 : index
    %29 = vector.load %arg6[%c0_13, %c0_14] : memref<1x96xf32, #tpu.memory_space<vmem>>, vector<1x96xf32>
    %30 = vector.broadcast %29 : vector<1x96xf32> to vector<8x96xf32>
    %31 = arith.addf %28, %30 : vector<8x96xf32>
    %32 = arith.truncf %31 : vector<8x96xf32> to vector<8x96xbf16>
    %33 = vector.extract_strided_slice %32 {offsets = [0, 0], sizes = [8, 8], strides = [1, 1]} : vector<8x96xbf16> to vector<8x8xbf16>
    %c0_15 = arith.constant 0 : index
    %c0_16 = arith.constant 0 : index
    %c0_17 = arith.constant 0 : index
    %c0_18 = arith.constant 0 : index
    %34 = vector.load %arg7[%c0_15, %c0_16, %c0_17, %c0_18] : memref<1x4x8x8xbf16, #tpu.memory_space<vmem>>, vector<1x1x8x8xbf16>
    %35 = vector.shape_cast %34 : vector<1x1x8x8xbf16> to vector<8x8xbf16>
    %36 = vector.shape_cast %33 : vector<8x8xbf16> to vector<1x1x8x8xbf16>
    tpu.vector_store %arg7[%c0_15, %c0_16, %c0_17, %c0_18], %36 {strides = array<i32>} : memref<1x4x8x8xbf16, #tpu.memory_space<vmem>>, vector<1x1x8x8xbf16>,
    %37 = vector.extract_strided_slice %32 {offsets = [0, 32], sizes = [8, 8], strides = [1, 1]} : vector<8x96xbf16> to vector<8x8xbf16>
    %c0_19 = arith.constant 0 : index
    %c0_20 = arith.constant 0 : index
    %c0_21 = arith.constant 0 : index
    %c0_22 = arith.constant 0 : index
    %38 = vector.load %arg8[%c0_19, %c0_20, %c0_21, %c0_22] : memref<1x4x8x8xbf16, #tpu.memory_space<vmem>>, vector<1x1x8x8xbf16>
    %39 = vector.shape_cast %38 : vector<1x1x8x8xbf16> to vector<8x8xbf16>
    %40 = vector.shape_cast %37 : vector<8x8xbf16> to vector<1x1x8x8xbf16>
    tpu.vector_store %arg8[%c0_19, %c0_20, %c0_21, %c0_22], %40 {strides = array<i32>} : memref<1x4x8x8xbf16, #tpu.memory_space<vmem>>, vector<1x1x8x8xbf16>,
    %41 = vector.extract_strided_slice %32 {offsets = [0, 64], sizes = [8, 8], strides = [1, 1]} : vector<8x96xbf16> to vector<8x8xbf16>
    %c0_23 = arith.constant 0 : index
    %c0_24 = arith.constant 0 : index
    %c0_25 = arith.constant 0 : index
    %c0_26 = arith.constant 0 : index
    %42 = vector.load %arg9[%c0_23, %c0_24, %c0_25, %c0_26] : memref<1x4x8x8xbf16, #tpu.memory_space<vmem>>, vector<1x1x8x8xbf16>
    %43 = vector.shape_cast %42 : vector<1x1x8x8xbf16> to vector<8x8xbf16>
    %44 = vector.shape_cast %41 : vector<8x8xbf16> to vector<1x1x8x8xbf16>
    tpu.vector_store %arg9[%c0_23, %c0_24, %c0_25, %c0_26], %44 {strides = array<i32>} : memref<1x4x8x8xbf16, #tpu.memory_space<vmem>>, vector<1x1x8x8xbf16>,
    %45 = vector.extract_strided_slice %32 {offsets = [0, 8], sizes = [8, 8], strides = [1, 1]} : vector<8x96xbf16> to vector<8x8xbf16>
    %c0_27 = arith.constant 0 : index
    %c1 = arith.constant 1 : index
    %c0_28 = arith.constant 0 : index
    %c0_29 = arith.constant 0 : index
    %46 = vector.load %arg7[%c0_27, %c1, %c0_28, %c0_29] : memref<1x4x8x8xbf16, #tpu.memory_space<vmem>>, vector<1x1x8x8xbf16>
    %47 = vector.shape_cast %46 : vector<1x1x8x8xbf16> to vector<8x8xbf16>
    %48 = vector.shape_cast %45 : vector<8x8xbf16> to vector<1x1x8x8xbf16>
    tpu.vector_store %arg7[%c0_27, %c1, %c0_28, %c0_29], %48 {strides = array<i32>} : memref<1x4x8x8xbf16, #tpu.memory_space<vmem>>, vector<1x1x8x8xbf16>,
    %49 = vector.extract_strided_slice %32 {offsets = [0, 40], sizes = [8, 8], strides = [1, 1]} : vector<8x96xbf16> to vector<8x8xbf16>
    %c0_30 = arith.constant 0 : index
    %c1_31 = arith.constant 1 : index
    %c0_32 = arith.constant 0 : index
    %c0_33 = arith.constant 0 : index
    %50 = vector.load %arg8[%c0_30, %c1_31, %c0_32, %c0_33] : memref<1x4x8x8xbf16, #tpu.memory_space<vmem>>, vector<1x1x8x8xbf16>
    %51 = vector.shape_cast %50 : vector<1x1x8x8xbf16> to vector<8x8xbf16>
    %52 = vector.shape_cast %49 : vector<8x8xbf16> to vector<1x1x8x8xbf16>
    tpu.vector_store %arg8[%c0_30, %c1_31, %c0_32, %c0_33], %52 {strides = array<i32>} : memref<1x4x8x8xbf16, #tpu.memory_space<vmem>>, vector<1x1x8x8xbf16>,
    %53 = vector.extract_strided_slice %32 {offsets = [0, 72], sizes = [8, 8], strides = [1, 1]} : vector<8x96xbf16> to vector<8x8xbf16>
    %c0_34 = arith.constant 0 : index
    %c1_35 = arith.constant 1 : index
    %c0_36 = arith.constant 0 : index
    %c0_37 = arith.constant 0 : index
    %54 = vector.load %arg9[%c0_34, %c1_35, %c0_36, %c0_37] : memref<1x4x8x8xbf16, #tpu.memory_space<vmem>>, vector<1x1x8x8xbf16>
    %55 = vector.shape_cast %54 : vector<1x1x8x8xbf16> to vector<8x8xbf16>
    %56 = vector.shape_cast %53 : vector<8x8xbf16> to vector<1x1x8x8xbf16>
    tpu.vector_store %arg9[%c0_34, %c1_35, %c0_36, %c0_37], %56 {strides = array<i32>} : memref<1x4x8x8xbf16, #tpu.memory_space<vmem>>, vector<1x1x8x8xbf16>,
    %57 = vector.extract_strided_slice %32 {offsets = [0, 16], sizes = [8, 8], strides = [1, 1]} : vector<8x96xbf16> to vector<8x8xbf16>
    %c0_38 = arith.constant 0 : index
    %c2 = arith.constant 2 : index
    %c0_39 = arith.constant 0 : index
    %c0_40 = arith.constant 0 : index
    %58 = vector.load %arg7[%c0_38, %c2, %c0_39, %c0_40] : memref<1x4x8x8xbf16, #tpu.memory_space<vmem>>, vector<1x1x8x8xbf16>
    %59 = vector.shape_cast %58 : vector<1x1x8x8xbf16> to vector<8x8xbf16>
    %60 = vector.shape_cast %57 : vector<8x8xbf16> to vector<1x1x8x8xbf16>
    tpu.vector_store %arg7[%c0_38, %c2, %c0_39, %c0_40], %60 {strides = array<i32>} : memref<1x4x8x8xbf16, #tpu.memory_space<vmem>>, vector<1x1x8x8xbf16>,
    %61 = vector.extract_strided_slice %32 {offsets = [0, 48], sizes = [8, 8], strides = [1, 1]} : vector<8x96xbf16> to vector<8x8xbf16>
    %c0_41 = arith.constant 0 : index
    %c2_42 = arith.constant 2 : index
    %c0_43 = arith.constant 0 : index
    %c0_44 = arith.constant 0 : index
    %62 = vector.load %arg8[%c0_41, %c2_42, %c0_43, %c0_44] : memref<1x4x8x8xbf16, #tpu.memory_space<vmem>>, vector<1x1x8x8xbf16>
    %63 = vector.shape_cast %62 : vector<1x1x8x8xbf16> to vector<8x8xbf16>
    %64 = vector.shape_cast %61 : vector<8x8xbf16> to vector<1x1x8x8xbf16>
    tpu.vector_store %arg8[%c0_41, %c2_42, %c0_43, %c0_44], %64 {strides = array<i32>} : memref<1x4x8x8xbf16, #tpu.memory_space<vmem>>, vector<1x1x8x8xbf16>,
    %65 = vector.extract_strided_slice %32 {offsets = [0, 80], sizes = [8, 8], strides = [1, 1]} : vector<8x96xbf16> to vector<8x8xbf16>
    %c0_45 = arith.constant 0 : index
    %c2_46 = arith.constant 2 : index
    %c0_47 = arith.constant 0 : index
    %c0_48 = arith.constant 0 : index
    %66 = vector.load %arg9[%c0_45, %c2_46, %c0_47, %c0_48] : memref<1x4x8x8xbf16, #tpu.memory_space<vmem>>, vector<1x1x8x8xbf16>
    %67 = vector.shape_cast %66 : vector<1x1x8x8xbf16> to vector<8x8xbf16>
    %68 = vector.shape_cast %65 : vector<8x8xbf16> to vector<1x1x8x8xbf16>
    tpu.vector_store %arg9[%c0_45, %c2_46, %c0_47, %c0_48], %68 {strides = array<i32>} : memref<1x4x8x8xbf16, #tpu.memory_space<vmem>>, vector<1x1x8x8xbf16>,
    %69 = vector.extract_strided_slice %32 {offsets = [0, 24], sizes = [8, 8], strides = [1, 1]} : vector<8x96xbf16> to vector<8x8xbf16>
    %c0_49 = arith.constant 0 : index
    %c3 = arith.constant 3 : index
    %c0_50 = arith.constant 0 : index
    %c0_51 = arith.constant 0 : index
    %70 = vector.load %arg7[%c0_49, %c3, %c0_50, %c0_51] : memref<1x4x8x8xbf16, #tpu.memory_space<vmem>>, vector<1x1x8x8xbf16>
    %71 = vector.shape_cast %70 : vector<1x1x8x8xbf16> to vector<8x8xbf16>
    %72 = vector.shape_cast %69 : vector<8x8xbf16> to vector<1x1x8x8xbf16>
    tpu.vector_store %arg7[%c0_49, %c3, %c0_50, %c0_51], %72 {strides = array<i32>} : memref<1x4x8x8xbf16, #tpu.memory_space<vmem>>, vector<1x1x8x8xbf16>,
    %73 = vector.extract_strided_slice %32 {offsets = [0, 56], sizes = [8, 8], strides = [1, 1]} : vector<8x96xbf16> to vector<8x8xbf16>
    %c0_52 = arith.constant 0 : index
    %c3_53 = arith.constant 3 : index
    %c0_54 = arith.constant 0 : index
    %c0_55 = arith.constant 0 : index
    %74 = vector.load %arg8[%c0_52, %c3_53, %c0_54, %c0_55] : memref<1x4x8x8xbf16, #tpu.memory_space<vmem>>, vector<1x1x8x8xbf16>
    %75 = vector.shape_cast %74 : vector<1x1x8x8xbf16> to vector<8x8xbf16>
    %76 = vector.shape_cast %73 : vector<8x8xbf16> to vector<1x1x8x8xbf16>
    tpu.vector_store %arg8[%c0_52, %c3_53, %c0_54, %c0_55], %76 {strides = array<i32>} : memref<1x4x8x8xbf16, #tpu.memory_space<vmem>>, vector<1x1x8x8xbf16>,
    %77 = vector.extract_strided_slice %32 {offsets = [0, 88], sizes = [8, 8], strides = [1, 1]} : vector<8x96xbf16> to vector<8x8xbf16>
    %c0_56 = arith.constant 0 : index
    %c3_57 = arith.constant 3 : index
    %c0_58 = arith.constant 0 : index
    %c0_59 = arith.constant 0 : index
    %78 = vector.load %arg9[%c0_56, %c3_57, %c0_58, %c0_59] : memref<1x4x8x8xbf16, #tpu.memory_space<vmem>>, vector<1x1x8x8xbf16>
    %79 = vector.shape_cast %78 : vector<1x1x8x8xbf16> to vector<8x8xbf16>
    %80 = vector.shape_cast %77 : vector<8x8xbf16> to vector<1x1x8x8xbf16>
    tpu.vector_store %arg9[%c0_56, %c3_57, %c0_58, %c0_59], %80 {strides = array<i32>} : memref<1x4x8x8xbf16, #tpu.memory_space<vmem>>, vector<1x1x8x8xbf16>,
    return
  }
  func.func @transform_0(%arg0: i32, %arg1: i32) -> (i32, i32, i32) {
    %c0_i32 = arith.constant 0 : i32
    %c0_i32_0 = arith.constant 0 : i32
    return %arg0, %arg1, %c0_i32 : i32, i32, i32
  }
  func.func @transform_1(%arg0: i32, %arg1: i32) -> (i32, i32) {
    %c0_i32 = arith.constant 0 : i32
    %c0_i32_0 = arith.constant 0 : i32
    %c0_i32_1 = arith.constant 0 : i32
    return %c0_i32, %c0_i32_0 : i32, i32
  }
  func.func @transform_2(%arg0: i32, %arg1: i32) -> (i32, i32) {
    %c0_i32 = arith.constant 0 : i32
    %c0_i32_0 = arith.constant 0 : i32
    %c0_i32_1 = arith.constant 0 : i32
    return %c0_i32, %c0_i32_0 : i32, i32
  }
  func.func @transform_3(%arg0: i32, %arg1: i32) -> (i32, i32) {
    %c0_i32 = arith.constant 0 : i32
    %c0_i32_0 = arith.constant 0 : i32
    %c0_i32_1 = arith.constant 0 : i32
    return %c0_i32, %c0_i32_0 : i32, i32
  }
  func.func @transform_4(%arg0: i32, %arg1: i32) -> (i32, i32) {
    %c0_i32 = arith.constant 0 : i32
    %c0_i32_0 = arith.constant 0 : i32
    %c0_i32_1 = arith.constant 0 : i32
    return %c0_i32, %c0_i32_0 : i32, i32
  }
  func.func @transform_5(%arg0: i32, %arg1: i32) -> (i32, i32, i32, i32) {
    %c0_i32 = arith.constant 0 : i32
    %c0_i32_0 = arith.constant 0 : i32
    %c0_i32_1 = arith.constant 0 : i32
    return %arg0, %c0_i32, %arg1, %c0_i32_0 : i32, i32, i32, i32
  }
  func.func @transform_6(%arg0: i32, %arg1: i32) -> (i32, i32, i32, i32) {
    %c0_i32 = arith.constant 0 : i32
    %c0_i32_0 = arith.constant 0 : i32
    %c0_i32_1 = arith.constant 0 : i32
    return %arg0, %c0_i32, %arg1, %c0_i32_0 : i32, i32, i32, i32
  }
  func.func @transform_7(%arg0: i32, %arg1: i32) -> (i32, i32, i32, i32) {
    %c0_i32 = arith.constant 0 : i32
    %c0_i32_0 = arith.constant 0 : i32
    %c0_i32_1 = arith.constant 0 : i32
    return %arg0, %c0_i32, %arg1, %c0_i32_0 : i32, i32, i32, i32
  }
}

module attributes {stable_mosaic.version = 11 : i64} {
  func.func @flash_attn_kernel(%arg0: i32, %arg1: i32, %arg2: i32, %arg3: memref<1x4x8x8xbf16, #tpu.memory_space<vmem>>, %arg4: memref<1x4x8x8xbf16, #tpu.memory_space<vmem>>, %arg5: memref<1x4x8x8xbf16, #tpu.memory_space<vmem>>, %arg6: memref<1x8x32xbf16, #tpu.memory_space<vmem>>, %arg7: memref<4x8x1xf32, #tpu.memory_space<vmem>>, %arg8: memref<4x8x1xf32, #tpu.memory_space<vmem>>, %arg9: memref<4x8x8xf32, #tpu.memory_space<vmem>>) attributes {dimension_semantics = [#tpu.dimension_semantics<parallel>, #tpu.dimension_semantics<parallel>, #tpu.dimension_semantics<arbitrary>], iteration_bounds = array<i64: 2, 1, 1>, scalar_prefetch = 0 : i64, scratch_operands = 3 : i64, tpu.core_type = #tpu.core_type<tc>, window_params = [{transform_indices = @transform_0, window_bounds = array<i64: 1, 4, 8, 8>}, {transform_indices = @transform_1, window_bounds = array<i64: 1, 4, 8, 8>}, {transform_indices = @transform_2, window_bounds = array<i64: 1, 4, 8, 8>}, {transform_indices = @transform_3, window_bounds = array<i64: 1, 8, 32>}]} {
    %c0_i32 = arith.constant 0 : i32
    %0 = arith.cmpi eq, %arg2, %c0_i32 : i32
    %1 = arith.extui %0 : i1 to i32
    %c0_i32_0 = arith.constant 0 : i32
    %2 = arith.cmpi ne, %1, %c0_i32_0 : i32
    scf.if %2 {
      %cst = arith.constant 0xFF800000 : f32
      %12 = vector.broadcast %cst : f32 to vector<4x8x1xf32>
      %c0 = arith.constant 0 : index
      %c0_5 = arith.constant 0 : index
      %c0_6 = arith.constant 0 : index
      %13 = vector.load %arg7[%c0, %c0_5, %c0_6] : memref<4x8x1xf32, #tpu.memory_space<vmem>>, vector<4x8x1xf32>
      tpu.vector_store %arg7[%c0, %c0_5, %c0_6], %12 {strides = array<i32>} : memref<4x8x1xf32, #tpu.memory_space<vmem>>, vector<4x8x1xf32>,
      %cst_7 = arith.constant 0.000000e+00 : f32
      %14 = vector.broadcast %cst_7 : f32 to vector<4x8x1xf32>
      %c0_8 = arith.constant 0 : index
      %c0_9 = arith.constant 0 : index
      %c0_10 = arith.constant 0 : index
      %15 = vector.load %arg8[%c0_8, %c0_9, %c0_10] : memref<4x8x1xf32, #tpu.memory_space<vmem>>, vector<4x8x1xf32>
      tpu.vector_store %arg8[%c0_8, %c0_9, %c0_10], %14 {strides = array<i32>} : memref<4x8x1xf32, #tpu.memory_space<vmem>>, vector<4x8x1xf32>,
      %cst_11 = arith.constant 0.000000e+00 : f32
      %16 = vector.broadcast %cst_11 : f32 to vector<4x8x8xf32>
      %c0_12 = arith.constant 0 : index
      %c0_13 = arith.constant 0 : index
      %c0_14 = arith.constant 0 : index
      %17 = vector.load %arg9[%c0_12, %c0_13, %c0_14] : memref<4x8x8xf32, #tpu.memory_space<vmem>>, vector<4x8x8xf32>
      tpu.vector_store %arg9[%c0_12, %c0_13, %c0_14], %16 {strides = array<i32>} : memref<4x8x8xf32, #tpu.memory_space<vmem>>, vector<4x8x8xf32>,
    } else {
    }
    %3 = arith.cmpi slt, %arg2, %arg1 : i32
    %4 = arith.extui %3 : i1 to i32
    %c0_i32_1 = arith.constant 0 : i32
    %5 = arith.cmpi ne, %4, %c0_i32_1 : i32
    scf.if %5 {
      %c0 = arith.constant 0 : index
      %c0_5 = arith.constant 0 : index
      %c0_6 = arith.constant 0 : index
      %c0_7 = arith.constant 0 : index
      %12 = vector.load %arg3[%c0, %c0_5, %c0_6, %c0_7] : memref<1x4x8x8xbf16, #tpu.memory_space<vmem>>, vector<1x4x8x8xbf16>
      %13 = vector.shape_cast %12 : vector<1x4x8x8xbf16> to vector<4x8x8xbf16>
      %c0_8 = arith.constant 0 : index
      %c0_9 = arith.constant 0 : index
      %c0_10 = arith.constant 0 : index
      %c0_11 = arith.constant 0 : index
      %14 = vector.load %arg4[%c0_8, %c0_9, %c0_10, %c0_11] : memref<1x4x8x8xbf16, #tpu.memory_space<vmem>>, vector<1x4x8x8xbf16>
      %15 = vector.shape_cast %14 : vector<1x4x8x8xbf16> to vector<4x8x8xbf16>
      %c0_12 = arith.constant 0 : index
      %c0_13 = arith.constant 0 : index
      %c0_14 = arith.constant 0 : index
      %c0_15 = arith.constant 0 : index
      %16 = vector.load %arg5[%c0_12, %c0_13, %c0_14, %c0_15] : memref<1x4x8x8xbf16, #tpu.memory_space<vmem>>, vector<1x4x8x8xbf16>
      %17 = vector.shape_cast %16 : vector<1x4x8x8xbf16> to vector<4x8x8xbf16>
      "tpu.trace_start"() <{level = 10 : i32, message = "hqd,hkd->hqk"}> : () -> ()
      %cst = arith.constant dense<0.000000e+00> : vector<4x8x8xf32>
      %18 = tpu.matmul %13, %15, %cst {dimension_numbers = #tpu.dot_dimension_numbers<[2], [2], [1], [1], [0, 0, 0, 1, 1, 1], [0], [0]>} : vector<4x8x8xbf16>, vector<4x8x8xbf16>, vector<4x8x8xf32> -> vector<4x8x8xf32>
      "tpu.trace_stop"() : () -> ()
      %cst_16 = arith.constant 0.353553385 : f32
      %19 = vector.broadcast %cst_16 : f32 to vector<4x8x8xf32>
      %20 = arith.mulf %18, %19 : vector<4x8x8xf32>
      %c0_17 = arith.constant 0 : index
      %c0_18 = arith.constant 0 : index
      %c0_19 = arith.constant 0 : index
      %21 = vector.load %arg7[%c0_17, %c0_18, %c0_19] : memref<4x8x1xf32, #tpu.memory_space<vmem>>, vector<4x8x1xf32>
      %cst_20 = arith.constant dense<0xFF800000> : vector<4x8xf32>
      %22 = vector.multi_reduction <maximumf>, %20, %cst_20 [2] : vector<4x8x8xf32> to vector<4x8xf32>
      %23 = vector.shape_cast %22 : vector<4x8xf32> to vector<4x8x1xf32>
      %24 = arith.maximumf %21, %23 : vector<4x8x1xf32>
      %25 = arith.subf %21, %24 : vector<4x8x1xf32>
      %26 = math.exp %25 : vector<4x8x1xf32>
      %27 = vector.broadcast %24 : vector<4x8x1xf32> to vector<4x8x8xf32>
      %28 = arith.subf %20, %27 : vector<4x8x8xf32>
      %29 = math.exp %28 : vector<4x8x8xf32>
      %c0_21 = arith.constant 0 : index
      %c0_22 = arith.constant 0 : index
      %c0_23 = arith.constant 0 : index
      %30 = vector.load %arg8[%c0_21, %c0_22, %c0_23] : memref<4x8x1xf32, #tpu.memory_space<vmem>>, vector<4x8x1xf32>
      %31 = arith.mulf %26, %30 : vector<4x8x1xf32>
      %cst_24 = arith.constant dense<0.000000e+00> : vector<4x8xf32>
      %32 = vector.multi_reduction <add>, %29, %cst_24 [2] : vector<4x8x8xf32> to vector<4x8xf32>
      %33 = vector.shape_cast %32 : vector<4x8xf32> to vector<4x8x1xf32>
      %34 = arith.addf %31, %33 : vector<4x8x1xf32>
      %c0_25 = arith.constant 0 : index
      %c0_26 = arith.constant 0 : index
      %c0_27 = arith.constant 0 : index
      %35 = vector.load %arg8[%c0_25, %c0_26, %c0_27] : memref<4x8x1xf32, #tpu.memory_space<vmem>>, vector<4x8x1xf32>
      tpu.vector_store %arg8[%c0_25, %c0_26, %c0_27], %34 {strides = array<i32>} : memref<4x8x1xf32, #tpu.memory_space<vmem>>, vector<4x8x1xf32>,
      %c0_28 = arith.constant 0 : index
      %c0_29 = arith.constant 0 : index
      %c0_30 = arith.constant 0 : index
      %36 = vector.load %arg9[%c0_28, %c0_29, %c0_30] : memref<4x8x8xf32, #tpu.memory_space<vmem>>, vector<4x8x8xf32>
      %37 = vector.broadcast %26 : vector<4x8x1xf32> to vector<4x8x8xf32>
      %38 = arith.mulf %37, %36 : vector<4x8x8xf32>
      %39 = arith.truncf %29 : vector<4x8x8xf32> to vector<4x8x8xbf16>
      "tpu.trace_start"() <{level = 10 : i32, message = "hqk,hkd->hqd"}> : () -> ()
      %cst_31 = arith.constant dense<0.000000e+00> : vector<4x8x8xf32>
      %40 = tpu.matmul %39, %17, %cst_31 {dimension_numbers = #tpu.dot_dimension_numbers<[2], [1], [1], [2], [0, 0, 0, 1, 1, 2], [0], [0]>} : vector<4x8x8xbf16>, vector<4x8x8xbf16>, vector<4x8x8xf32> -> vector<4x8x8xf32>
      "tpu.trace_stop"() : () -> ()
      %41 = arith.addf %38, %40 : vector<4x8x8xf32>
      %c0_32 = arith.constant 0 : index
      %c0_33 = arith.constant 0 : index
      %c0_34 = arith.constant 0 : index
      %42 = vector.load %arg9[%c0_32, %c0_33, %c0_34] : memref<4x8x8xf32, #tpu.memory_space<vmem>>, vector<4x8x8xf32>
      tpu.vector_store %arg9[%c0_32, %c0_33, %c0_34], %41 {strides = array<i32>} : memref<4x8x8xf32, #tpu.memory_space<vmem>>, vector<4x8x8xf32>,
      %c0_35 = arith.constant 0 : index
      %c0_36 = arith.constant 0 : index
      %c0_37 = arith.constant 0 : index
      %43 = vector.load %arg7[%c0_35, %c0_36, %c0_37] : memref<4x8x1xf32, #tpu.memory_space<vmem>>, vector<4x8x1xf32>
      tpu.vector_store %arg7[%c0_35, %c0_36, %c0_37], %24 {strides = array<i32>} : memref<4x8x1xf32, #tpu.memory_space<vmem>>, vector<4x8x1xf32>,
    } else {
    }
    %6 = arith.cmpi eq, %arg2, %arg1 : i32
    %7 = arith.extui %6 : i1 to i32
    %c0_i32_2 = arith.constant 0 : i32
    %8 = arith.cmpi ne, %7, %c0_i32_2 : i32
    scf.if %8 {
      %c0 = arith.constant 0 : index
      %c0_5 = arith.constant 0 : index
      %c0_6 = arith.constant 0 : index
      %c0_7 = arith.constant 0 : index
      %12 = vector.load %arg3[%c0, %c0_5, %c0_6, %c0_7] : memref<1x4x8x8xbf16, #tpu.memory_space<vmem>>, vector<1x4x8x8xbf16>
      %13 = vector.shape_cast %12 : vector<1x4x8x8xbf16> to vector<4x8x8xbf16>
      %c0_8 = arith.constant 0 : index
      %c0_9 = arith.constant 0 : index
      %c0_10 = arith.constant 0 : index
      %c0_11 = arith.constant 0 : index
      %14 = vector.load %arg4[%c0_8, %c0_9, %c0_10, %c0_11] : memref<1x4x8x8xbf16, #tpu.memory_space<vmem>>, vector<1x4x8x8xbf16>
      %15 = vector.shape_cast %14 : vector<1x4x8x8xbf16> to vector<4x8x8xbf16>
      %c0_12 = arith.constant 0 : index
      %c0_13 = arith.constant 0 : index
      %c0_14 = arith.constant 0 : index
      %c0_15 = arith.constant 0 : index
      %16 = vector.load %arg5[%c0_12, %c0_13, %c0_14, %c0_15] : memref<1x4x8x8xbf16, #tpu.memory_space<vmem>>, vector<1x4x8x8xbf16>
      %17 = vector.shape_cast %16 : vector<1x4x8x8xbf16> to vector<4x8x8xbf16>
      "tpu.trace_start"() <{level = 10 : i32, message = "hqd,hkd->hqk"}> : () -> ()
      %cst = arith.constant dense<0.000000e+00> : vector<4x8x8xf32>
      %18 = tpu.matmul %13, %15, %cst {dimension_numbers = #tpu.dot_dimension_numbers<[2], [2], [1], [1], [0, 0, 0, 1, 1, 1], [0], [0]>} : vector<4x8x8xbf16>, vector<4x8x8xbf16>, vector<4x8x8xf32> -> vector<4x8x8xf32>
      "tpu.trace_stop"() : () -> ()
      %cst_16 = arith.constant 0.353553385 : f32
      %19 = vector.broadcast %cst_16 : f32 to vector<4x8x8xf32>
      %20 = arith.mulf %18, %19 : vector<4x8x8xf32>
      %21 = tpu.iota {dimensions = array<i32: 0>} : vector<8x8xi32>
      %22 = tpu.iota {dimensions = array<i32: 1>} : vector<8x8xi32>
      %23 = arith.cmpi sge, %21, %22 : vector<8x8xi32>
      %24 = vector.shape_cast %23 : vector<8x8xi1> to vector<1x8x8xi1>
      %cst_17 = arith.constant -1.000000e+30 : f32
      %25 = vector.shape_cast %24 : vector<1x8x8xi1> to vector<1x8x8xi1>
      %26 = vector.broadcast %25 : vector<1x8x8xi1> to vector<4x8x8xi1>
      %27 = vector.broadcast %cst_17 : f32 to vector<4x8x8xf32>
      %28 = arith.select %26, %20, %27 : vector<4x8x8xi1>, vector<4x8x8xf32>
      %c0_18 = arith.constant 0 : index
      %c0_19 = arith.constant 0 : index
      %c0_20 = arith.constant 0 : index
      %29 = vector.load %arg7[%c0_18, %c0_19, %c0_20] : memref<4x8x1xf32, #tpu.memory_space<vmem>>, vector<4x8x1xf32>
      %cst_21 = arith.constant dense<0xFF800000> : vector<4x8xf32>
      %30 = vector.multi_reduction <maximumf>, %28, %cst_21 [2] : vector<4x8x8xf32> to vector<4x8xf32>
      %31 = vector.shape_cast %30 : vector<4x8xf32> to vector<4x8x1xf32>
      %32 = arith.maximumf %29, %31 : vector<4x8x1xf32>
      %33 = arith.subf %29, %32 : vector<4x8x1xf32>
      %34 = math.exp %33 : vector<4x8x1xf32>
      %35 = vector.broadcast %32 : vector<4x8x1xf32> to vector<4x8x8xf32>
      %36 = arith.subf %28, %35 : vector<4x8x8xf32>
      %37 = math.exp %36 : vector<4x8x8xf32>
      %c0_22 = arith.constant 0 : index
      %c0_23 = arith.constant 0 : index
      %c0_24 = arith.constant 0 : index
      %38 = vector.load %arg8[%c0_22, %c0_23, %c0_24] : memref<4x8x1xf32, #tpu.memory_space<vmem>>, vector<4x8x1xf32>
      %39 = arith.mulf %34, %38 : vector<4x8x1xf32>
      %cst_25 = arith.constant dense<0.000000e+00> : vector<4x8xf32>
      %40 = vector.multi_reduction <add>, %37, %cst_25 [2] : vector<4x8x8xf32> to vector<4x8xf32>
      %41 = vector.shape_cast %40 : vector<4x8xf32> to vector<4x8x1xf32>
      %42 = arith.addf %39, %41 : vector<4x8x1xf32>
      %c0_26 = arith.constant 0 : index
      %c0_27 = arith.constant 0 : index
      %c0_28 = arith.constant 0 : index
      %43 = vector.load %arg8[%c0_26, %c0_27, %c0_28] : memref<4x8x1xf32, #tpu.memory_space<vmem>>, vector<4x8x1xf32>
      tpu.vector_store %arg8[%c0_26, %c0_27, %c0_28], %42 {strides = array<i32>} : memref<4x8x1xf32, #tpu.memory_space<vmem>>, vector<4x8x1xf32>,
      %c0_29 = arith.constant 0 : index
      %c0_30 = arith.constant 0 : index
      %c0_31 = arith.constant 0 : index
      %44 = vector.load %arg9[%c0_29, %c0_30, %c0_31] : memref<4x8x8xf32, #tpu.memory_space<vmem>>, vector<4x8x8xf32>
      %45 = vector.broadcast %34 : vector<4x8x1xf32> to vector<4x8x8xf32>
      %46 = arith.mulf %45, %44 : vector<4x8x8xf32>
      %47 = arith.truncf %37 : vector<4x8x8xf32> to vector<4x8x8xbf16>
      "tpu.trace_start"() <{level = 10 : i32, message = "hqk,hkd->hqd"}> : () -> ()
      %cst_32 = arith.constant dense<0.000000e+00> : vector<4x8x8xf32>
      %48 = tpu.matmul %47, %17, %cst_32 {dimension_numbers = #tpu.dot_dimension_numbers<[2], [1], [1], [2], [0, 0, 0, 1, 1, 2], [0], [0]>} : vector<4x8x8xbf16>, vector<4x8x8xbf16>, vector<4x8x8xf32> -> vector<4x8x8xf32>
      "tpu.trace_stop"() : () -> ()
      %49 = arith.addf %46, %48 : vector<4x8x8xf32>
      %c0_33 = arith.constant 0 : index
      %c0_34 = arith.constant 0 : index
      %c0_35 = arith.constant 0 : index
      %50 = vector.load %arg9[%c0_33, %c0_34, %c0_35] : memref<4x8x8xf32, #tpu.memory_space<vmem>>, vector<4x8x8xf32>
      tpu.vector_store %arg9[%c0_33, %c0_34, %c0_35], %49 {strides = array<i32>} : memref<4x8x8xf32, #tpu.memory_space<vmem>>, vector<4x8x8xf32>,
      %c0_36 = arith.constant 0 : index
      %c0_37 = arith.constant 0 : index
      %c0_38 = arith.constant 0 : index
      %51 = vector.load %arg7[%c0_36, %c0_37, %c0_38] : memref<4x8x1xf32, #tpu.memory_space<vmem>>, vector<4x8x1xf32>
      tpu.vector_store %arg7[%c0_36, %c0_37, %c0_38], %32 {strides = array<i32>} : memref<4x8x1xf32, #tpu.memory_space<vmem>>, vector<4x8x1xf32>,
    } else {
    }
    %c0_i32_3 = arith.constant 0 : i32
    %9 = arith.cmpi eq, %arg2, %c0_i32_3 : i32
    %10 = arith.extui %9 : i1 to i32
    %c0_i32_4 = arith.constant 0 : i32
    %11 = arith.cmpi ne, %10, %c0_i32_4 : i32
    scf.if %11 {
      %c0 = arith.constant 0 : index
      %c0_5 = arith.constant 0 : index
      %c0_6 = arith.constant 0 : index
      %12 = vector.load %arg8[%c0, %c0_5, %c0_6] : memref<4x8x1xf32, #tpu.memory_space<vmem>>, vector<4x8x1xf32>
      %13 = tpu.reciprocal %12 {approx = true} : vector<4x8x1xf32> -> vector<4x8x1xf32>
      %c0_7 = arith.constant 0 : index
      %c0_8 = arith.constant 0 : index
      %c0_9 = arith.constant 0 : index
      %14 = vector.load %arg9[%c0_7, %c0_8, %c0_9] : memref<4x8x8xf32, #tpu.memory_space<vmem>>, vector<4x8x8xf32>
      %15 = vector.broadcast %13 : vector<4x8x1xf32> to vector<4x8x8xf32>
      %16 = arith.mulf %14, %15 : vector<4x8x8xf32>
      %17 = vector.extract_strided_slice %16 {offsets = [0, 0, 0], sizes = [1, 8, 8], strides = [1, 1, 1]} : vector<4x8x8xf32> to vector<1x8x8xf32>
      %18 = vector.shape_cast %17 : vector<1x8x8xf32> to vector<8x8xf32>
      %19 = arith.truncf %18 : vector<8x8xf32> to vector<8x8xbf16>
      %c0_10 = arith.constant 0 : index
      %c0_11 = arith.constant 0 : index
      %c0_12 = arith.constant 0 : index
      %20 = vector.load %arg6[%c0_10, %c0_11, %c0_12] : memref<1x8x32xbf16, #tpu.memory_space<vmem>>, vector<1x8x8xbf16>
      %21 = vector.shape_cast %20 : vector<1x8x8xbf16> to vector<8x8xbf16>
      %22 = vector.shape_cast %19 : vector<8x8xbf16> to vector<1x8x8xbf16>
      tpu.vector_store %arg6[%c0_10, %c0_11, %c0_12], %22 {strides = array<i32>} : memref<1x8x32xbf16, #tpu.memory_space<vmem>>, vector<1x8x8xbf16>,
      %23 = vector.extract_strided_slice %16 {offsets = [1, 0, 0], sizes = [1, 8, 8], strides = [1, 1, 1]} : vector<4x8x8xf32> to vector<1x8x8xf32>
      %24 = vector.shape_cast %23 : vector<1x8x8xf32> to vector<8x8xf32>
      %25 = arith.truncf %24 : vector<8x8xf32> to vector<8x8xbf16>
      %c0_13 = arith.constant 0 : index
      %c0_14 = arith.constant 0 : index
      %c8 = arith.constant 8 : index
      %26 = vector.load %arg6[%c0_13, %c0_14, %c8] : memref<1x8x32xbf16, #tpu.memory_space<vmem>>, vector<1x8x8xbf16>
      %27 = vector.shape_cast %26 : vector<1x8x8xbf16> to vector<8x8xbf16>
      %28 = vector.shape_cast %25 : vector<8x8xbf16> to vector<1x8x8xbf16>
      tpu.vector_store %arg6[%c0_13, %c0_14, %c8], %28 {strides = array<i32>} : memref<1x8x32xbf16, #tpu.memory_space<vmem>>, vector<1x8x8xbf16>,
      %29 = vector.extract_strided_slice %16 {offsets = [2, 0, 0], sizes = [1, 8, 8], strides = [1, 1, 1]} : vector<4x8x8xf32> to vector<1x8x8xf32>
      %30 = vector.shape_cast %29 : vector<1x8x8xf32> to vector<8x8xf32>
      %31 = arith.truncf %30 : vector<8x8xf32> to vector<8x8xbf16>
      %c0_15 = arith.constant 0 : index
      %c0_16 = arith.constant 0 : index
      %c16 = arith.constant 16 : index
      %32 = vector.load %arg6[%c0_15, %c0_16, %c16] : memref<1x8x32xbf16, #tpu.memory_space<vmem>>, vector<1x8x8xbf16>
      %33 = vector.shape_cast %32 : vector<1x8x8xbf16> to vector<8x8xbf16>
      %34 = vector.shape_cast %31 : vector<8x8xbf16> to vector<1x8x8xbf16>
      tpu.vector_store %arg6[%c0_15, %c0_16, %c16], %34 {strides = array<i32>} : memref<1x8x32xbf16, #tpu.memory_space<vmem>>, vector<1x8x8xbf16>,
      %35 = vector.extract_strided_slice %16 {offsets = [3, 0, 0], sizes = [1, 8, 8], strides = [1, 1, 1]} : vector<4x8x8xf32> to vector<1x8x8xf32>
      %36 = vector.shape_cast %35 : vector<1x8x8xf32> to vector<8x8xf32>
      %37 = arith.truncf %36 : vector<8x8xf32> to vector<8x8xbf16>
      %c0_17 = arith.constant 0 : index
      %c0_18 = arith.constant 0 : index
      %c24 = arith.constant 24 : index
      %38 = vector.load %arg6[%c0_17, %c0_18, %c24] : memref<1x8x32xbf16, #tpu.memory_space<vmem>>, vector<1x8x8xbf16>
      %39 = vector.shape_cast %38 : vector<1x8x8xbf16> to vector<8x8xbf16>
      %40 = vector.shape_cast %37 : vector<8x8xbf16> to vector<1x8x8xbf16>
      tpu.vector_store %arg6[%c0_17, %c0_18, %c24], %40 {strides = array<i32>} : memref<1x8x32xbf16, #tpu.memory_space<vmem>>, vector<1x8x8xbf16>,
    } else {
    }
    return
  }
  func.func @transform_0(%arg0: i32, %arg1: i32, %arg2: i32) -> (i32, i32, i32, i32) {
    %c0_i32 = arith.constant 0 : i32
    %c0_i32_0 = arith.constant 0 : i32
    %c0_i32_1 = arith.constant 0 : i32
    return %arg0, %c0_i32, %arg1, %c0_i32_0 : i32, i32, i32, i32
  }
  func.func @transform_1(%arg0: i32, %arg1: i32, %arg2: i32) -> (i32, i32, i32, i32) {
    %0 = arith.minsi %arg1, %arg2 : i32
    %c0_i32 = arith.constant 0 : i32
    %c0_i32_0 = arith.constant 0 : i32
    %c0_i32_1 = arith.constant 0 : i32
    return %arg0, %c0_i32, %0, %c0_i32_0 : i32, i32, i32, i32
  }
  func.func @transform_2(%arg0: i32, %arg1: i32, %arg2: i32) -> (i32, i32, i32, i32) {
    %0 = arith.minsi %arg1, %arg2 : i32
    %c0_i32 = arith.constant 0 : i32
    %c0_i32_0 = arith.constant 0 : i32
    %c0_i32_1 = arith.constant 0 : i32
    return %arg0, %c0_i32, %0, %c0_i32_0 : i32, i32, i32, i32
  }
  func.func @transform_3(%arg0: i32, %arg1: i32, %arg2: i32) -> (i32, i32, i32) {
    %c0_i32 = arith.constant 0 : i32
    %c0_i32_0 = arith.constant 0 : i32
    return %arg0, %arg1, %c0_i32 : i32, i32, i32
  }
}

module attributes {stable_mosaic.version = 11 : i64} {
  func.func @head_kernel(%arg0: i32, %arg1: i32, %arg2: i32, %arg3: memref<1x8x32xf32, #tpu.memory_space<vmem>>, %arg4: memref<1x32xf32, #tpu.memory_space<vmem>>, %arg5: memref<1x32xf32, #tpu.memory_space<vmem>>, %arg6: memref<32x128xbf16, #tpu.memory_space<vmem>>, %arg7: memref<1x8x128xf32, #tpu.memory_space<vmem>>, %arg8: memref<8x32xbf16, #tpu.memory_space<vmem>>) attributes {dimension_semantics = [#tpu.dimension_semantics<parallel>, #tpu.dimension_semantics<parallel>, #tpu.dimension_semantics<arbitrary>], iteration_bounds = array<i64: 2, 1, 1>, scalar_prefetch = 0 : i64, scratch_operands = 1 : i64, tpu.core_type = #tpu.core_type<tc>, window_params = [{transform_indices = @transform_0, window_bounds = array<i64: 1, 8, 32>}, {pipeline_mode = #tpu.pipeline_mode<synchronous>, transform_indices = @transform_1, window_bounds = array<i64: 1, 32>}, {pipeline_mode = #tpu.pipeline_mode<synchronous>, transform_indices = @transform_2, window_bounds = array<i64: 1, 32>}, {transform_indices = @transform_3, window_bounds = array<i64: 32, 128>}, {transform_indices = @transform_4, window_bounds = array<i64: 1, 8, 128>}]} {
    %c0_i32 = arith.constant 0 : i32
    %0 = arith.cmpi eq, %arg2, %c0_i32 : i32
    %1 = arith.extui %0 : i1 to i32
    %c0_i32_0 = arith.constant 0 : i32
    %2 = arith.cmpi ne, %1, %c0_i32_0 : i32
    scf.if %2 {
      %c0_7 = arith.constant 0 : index
      %c0_8 = arith.constant 0 : index
      %c0_9 = arith.constant 0 : index
      %9 = vector.load %arg3[%c0_7, %c0_8, %c0_9] : memref<1x8x32xf32, #tpu.memory_space<vmem>>, vector<1x8x32xf32>
      %10 = vector.shape_cast %9 : vector<1x8x32xf32> to vector<8x32xf32>
      %c0_10 = arith.constant 0 : index
      %c0_11 = arith.constant 0 : index
      %11 = vector.load %arg4[%c0_10, %c0_11] : memref<1x32xf32, #tpu.memory_space<vmem>>, vector<1x32xf32>
      %c0_12 = arith.constant 0 : index
      %c0_13 = arith.constant 0 : index
      %12 = vector.load %arg5[%c0_12, %c0_13] : memref<1x32xf32, #tpu.memory_space<vmem>>, vector<1x32xf32>
      %cst_14 = arith.constant dense<0.000000e+00> : vector<8xf32>
      %13 = vector.multi_reduction <add>, %10, %cst_14 [1] : vector<8x32xf32> to vector<8xf32>
      %14 = vector.shape_cast %13 : vector<8xf32> to vector<8x1xf32>
      %cst_15 = arith.constant 3.200000e+01 : f32
      %15 = vector.broadcast %cst_15 : f32 to vector<8x1xf32>
      %16 = arith.divf %14, %15 : vector<8x1xf32>
      %17 = vector.broadcast %16 : vector<8x1xf32> to vector<8x32xf32>
      %18 = arith.subf %10, %17 : vector<8x32xf32>
      %19 = arith.mulf %18, %18 : vector<8x32xf32>
      %cst_16 = arith.constant dense<0.000000e+00> : vector<8xf32>
      %20 = vector.multi_reduction <add>, %19, %cst_16 [1] : vector<8x32xf32> to vector<8xf32>
      %21 = vector.shape_cast %20 : vector<8xf32> to vector<8x1xf32>
      %cst_17 = arith.constant 3.200000e+01 : f32
      %22 = vector.broadcast %cst_17 : f32 to vector<8x1xf32>
      %23 = arith.divf %21, %22 : vector<8x1xf32>
      %24 = vector.broadcast %16 : vector<8x1xf32> to vector<8x32xf32>
      %25 = arith.subf %10, %24 : vector<8x32xf32>
      %cst_18 = arith.constant 9.99999974E-6 : f32
      %26 = vector.broadcast %cst_18 : f32 to vector<8x1xf32>
      %27 = arith.addf %23, %26 : vector<8x1xf32>
      %28 = math.rsqrt %27 : vector<8x1xf32>
      %29 = vector.broadcast %28 : vector<8x1xf32> to vector<8x32xf32>
      %30 = arith.mulf %25, %29 : vector<8x32xf32>
      %31 = vector.broadcast %11 : vector<1x32xf32> to vector<8x32xf32>
      %32 = arith.mulf %30, %31 : vector<8x32xf32>
      %33 = vector.broadcast %12 : vector<1x32xf32> to vector<8x32xf32>
      %34 = arith.addf %32, %33 : vector<8x32xf32>
      %35 = arith.truncf %34 : vector<8x32xf32> to vector<8x32xbf16>
      %c0_19 = arith.constant 0 : index
      %c0_20 = arith.constant 0 : index
      %36 = vector.load %arg8[%c0_19, %c0_20] : memref<8x32xbf16, #tpu.memory_space<vmem>>, vector<8x32xbf16>
      tpu.vector_store %arg8[%c0_19, %c0_20], %35 {strides = array<i32>} : memref<8x32xbf16, #tpu.memory_space<vmem>>, vector<8x32xbf16>,
    } else {
    }
    %c0 = arith.constant 0 : index
    %c0_1 = arith.constant 0 : index
    %3 = vector.load %arg8[%c0, %c0_1] : memref<8x32xbf16, #tpu.memory_space<vmem>>, vector<8x32xbf16>
    %c0_2 = arith.constant 0 : index
    %c0_3 = arith.constant 0 : index
    %4 = vector.load %arg6[%c0_2, %c0_3] : memref<32x128xbf16, #tpu.memory_space<vmem>>, vector<32x128xbf16>
    %cst = arith.constant dense<0.000000e+00> : vector<8x128xf32>
    %5 = tpu.matmul %3, %4, %cst {dimension_numbers = #tpu.dot_dimension_numbers<[1], [0], [0], [1], [0, 0, 1, 1], [], []>} : vector<8x32xbf16>, vector<32x128xbf16>, vector<8x128xf32> -> vector<8x128xf32>
    %c0_4 = arith.constant 0 : index
    %c0_5 = arith.constant 0 : index
    %c0_6 = arith.constant 0 : index
    %6 = vector.load %arg7[%c0_4, %c0_5, %c0_6] : memref<1x8x128xf32, #tpu.memory_space<vmem>>, vector<1x8x128xf32>
    %7 = vector.shape_cast %6 : vector<1x8x128xf32> to vector<8x128xf32>
    %8 = vector.shape_cast %5 : vector<8x128xf32> to vector<1x8x128xf32>
    tpu.vector_store %arg7[%c0_4, %c0_5, %c0_6], %8 {strides = array<i32>} : memref<1x8x128xf32, #tpu.memory_space<vmem>>, vector<1x8x128xf32>,
    return
  }
  func.func @transform_0(%arg0: i32, %arg1: i32, %arg2: i32) -> (i32, i32, i32) {
    %c0_i32 = arith.constant 0 : i32
    %c0_i32_0 = arith.constant 0 : i32
    return %arg0, %arg1, %c0_i32 : i32, i32, i32
  }
  func.func @transform_1(%arg0: i32, %arg1: i32, %arg2: i32) -> (i32, i32) {
    %c0_i32 = arith.constant 0 : i32
    %c0_i32_0 = arith.constant 0 : i32
    %c0_i32_1 = arith.constant 0 : i32
    return %c0_i32, %c0_i32_0 : i32, i32
  }
  func.func @transform_2(%arg0: i32, %arg1: i32, %arg2: i32) -> (i32, i32) {
    %c0_i32 = arith.constant 0 : i32
    %c0_i32_0 = arith.constant 0 : i32
    %c0_i32_1 = arith.constant 0 : i32
    return %c0_i32, %c0_i32_0 : i32, i32
  }
  func.func @transform_3(%arg0: i32, %arg1: i32, %arg2: i32) -> (i32, i32) {
    %c0_i32 = arith.constant 0 : i32
    %c0_i32_0 = arith.constant 0 : i32
    return %c0_i32, %arg2 : i32, i32
  }
  func.func @transform_4(%arg0: i32, %arg1: i32, %arg2: i32) -> (i32, i32, i32) {
    %c0_i32 = arith.constant 0 : i32
    return %arg0, %arg1, %arg2 : i32, i32, i32
  }
}

module attributes {stable_mosaic.version = 11 : i64} {
  func.func @proj_mlp_kernel(%arg0: i32, %arg1: i32, %arg2: memref<1x8x32xf32, #tpu.memory_space<vmem>>, %arg3: memref<1x8x32xbf16, #tpu.memory_space<vmem>>, %arg4: memref<32x32xbf16, #tpu.memory_space<vmem>>, %arg5: memref<1x32xf32, #tpu.memory_space<vmem>>, %arg6: memref<1x32xf32, #tpu.memory_space<vmem>>, %arg7: memref<1x32xf32, #tpu.memory_space<vmem>>, %arg8: memref<32x128xbf16, #tpu.memory_space<vmem>>, %arg9: memref<1x128xf32, #tpu.memory_space<vmem>>, %arg10: memref<128x32xbf16, #tpu.memory_space<vmem>>, %arg11: memref<1x32xf32, #tpu.memory_space<vmem>>, %arg12: memref<1x8x32xf32, #tpu.memory_space<vmem>>) attributes {dimension_semantics = [#tpu.dimension_semantics<parallel>, #tpu.dimension_semantics<parallel>], iteration_bounds = array<i64: 2, 1>, scalar_prefetch = 0 : i64, scratch_operands = 0 : i64, tpu.core_type = #tpu.core_type<tc>, window_params = [{transform_indices = @transform_0, window_bounds = array<i64: 1, 8, 32>}, {transform_indices = @transform_1, window_bounds = array<i64: 1, 8, 32>}, {pipeline_mode = #tpu.pipeline_mode<synchronous>, transform_indices = @transform_2, window_bounds = array<i64: 32, 32>}, {pipeline_mode = #tpu.pipeline_mode<synchronous>, transform_indices = @transform_3, window_bounds = array<i64: 1, 32>}, {pipeline_mode = #tpu.pipeline_mode<synchronous>, transform_indices = @transform_4, window_bounds = array<i64: 1, 32>}, {pipeline_mode = #tpu.pipeline_mode<synchronous>, transform_indices = @transform_5, window_bounds = array<i64: 1, 32>}, {pipeline_mode = #tpu.pipeline_mode<synchronous>, transform_indices = @transform_6, window_bounds = array<i64: 32, 128>}, {pipeline_mode = #tpu.pipeline_mode<synchronous>, transform_indices = @transform_7, window_bounds = array<i64: 1, 128>}, {pipeline_mode = #tpu.pipeline_mode<synchronous>, transform_indices = @transform_8, window_bounds = array<i64: 128, 32>}, {pipeline_mode = #tpu.pipeline_mode<synchronous>, transform_indices = @transform_9, window_bounds = array<i64: 1, 32>}, {transform_indices = @transform_10, window_bounds = array<i64: 1, 8, 32>}]} {
    %c0 = arith.constant 0 : index
    %c0_0 = arith.constant 0 : index
    %c0_1 = arith.constant 0 : index
    %0 = vector.load %arg2[%c0, %c0_0, %c0_1] : memref<1x8x32xf32, #tpu.memory_space<vmem>>, vector<1x8x32xf32>
    %1 = vector.shape_cast %0 : vector<1x8x32xf32> to vector<8x32xf32>
    %c0_2 = arith.constant 0 : index
    %c0_3 = arith.constant 0 : index
    %c0_4 = arith.constant 0 : index
    %2 = vector.load %arg3[%c0_2, %c0_3, %c0_4] : memref<1x8x32xbf16, #tpu.memory_space<vmem>>, vector<1x8x32xbf16>
    %3 = vector.shape_cast %2 : vector<1x8x32xbf16> to vector<8x32xbf16>
    %c0_5 = arith.constant 0 : index
    %c0_6 = arith.constant 0 : index
    %4 = vector.load %arg4[%c0_5, %c0_6] : memref<32x32xbf16, #tpu.memory_space<vmem>>, vector<32x32xbf16>
    %cst = arith.constant dense<0.000000e+00> : vector<8x32xf32>
    %5 = tpu.matmul %3, %4, %cst {dimension_numbers = #tpu.dot_dimension_numbers<[1], [0], [0], [1], [0, 0, 1, 1], [], []>} : vector<8x32xbf16>, vector<32x32xbf16>, vector<8x32xf32> -> vector<8x32xf32>
    %c0_7 = arith.constant 0 : index
    %c0_8 = arith.constant 0 : index
    %6 = vector.load %arg5[%c0_7, %c0_8] : memref<1x32xf32, #tpu.memory_space<vmem>>, vector<1x32xf32>
    %7 = vector.broadcast %6 : vector<1x32xf32> to vector<8x32xf32>
    %8 = arith.addf %5, %7 : vector<8x32xf32>
    %9 = arith.addf %1, %8 : vector<8x32xf32>
    %c0_9 = arith.constant 0 : index
    %c0_10 = arith.constant 0 : index
    %10 = vector.load %arg6[%c0_9, %c0_10] : memref<1x32xf32, #tpu.memory_space<vmem>>, vector<1x32xf32>
    %c0_11 = arith.constant 0 : index
    %c0_12 = arith.constant 0 : index
    %11 = vector.load %arg7[%c0_11, %c0_12] : memref<1x32xf32, #tpu.memory_space<vmem>>, vector<1x32xf32>
    %cst_13 = arith.constant dense<0.000000e+00> : vector<8xf32>
    %12 = vector.multi_reduction <add>, %9, %cst_13 [1] : vector<8x32xf32> to vector<8xf32>
    %13 = vector.shape_cast %12 : vector<8xf32> to vector<8x1xf32>
    %cst_14 = arith.constant 3.200000e+01 : f32
    %14 = vector.broadcast %cst_14 : f32 to vector<8x1xf32>
    %15 = arith.divf %13, %14 : vector<8x1xf32>
    %16 = vector.broadcast %15 : vector<8x1xf32> to vector<8x32xf32>
    %17 = arith.subf %9, %16 : vector<8x32xf32>
    %18 = arith.mulf %17, %17 : vector<8x32xf32>
    %cst_15 = arith.constant dense<0.000000e+00> : vector<8xf32>
    %19 = vector.multi_reduction <add>, %18, %cst_15 [1] : vector<8x32xf32> to vector<8xf32>
    %20 = vector.shape_cast %19 : vector<8xf32> to vector<8x1xf32>
    %cst_16 = arith.constant 3.200000e+01 : f32
    %21 = vector.broadcast %cst_16 : f32 to vector<8x1xf32>
    %22 = arith.divf %20, %21 : vector<8x1xf32>
    %23 = vector.broadcast %15 : vector<8x1xf32> to vector<8x32xf32>
    %24 = arith.subf %9, %23 : vector<8x32xf32>
    %cst_17 = arith.constant 9.99999974E-6 : f32
    %25 = vector.broadcast %cst_17 : f32 to vector<8x1xf32>
    %26 = arith.addf %22, %25 : vector<8x1xf32>
    %27 = math.rsqrt %26 : vector<8x1xf32>
    %28 = vector.broadcast %27 : vector<8x1xf32> to vector<8x32xf32>
    %29 = arith.mulf %24, %28 : vector<8x32xf32>
    %30 = vector.broadcast %10 : vector<1x32xf32> to vector<8x32xf32>
    %31 = arith.mulf %29, %30 : vector<8x32xf32>
    %32 = vector.broadcast %11 : vector<1x32xf32> to vector<8x32xf32>
    %33 = arith.addf %31, %32 : vector<8x32xf32>
    %34 = arith.truncf %33 : vector<8x32xf32> to vector<8x32xbf16>
    %c0_18 = arith.constant 0 : index
    %c0_19 = arith.constant 0 : index
    %35 = vector.load %arg8[%c0_18, %c0_19] : memref<32x128xbf16, #tpu.memory_space<vmem>>, vector<32x128xbf16>
    %cst_20 = arith.constant dense<0.000000e+00> : vector<8x128xf32>
    %36 = tpu.matmul %34, %35, %cst_20 {dimension_numbers = #tpu.dot_dimension_numbers<[1], [0], [0], [1], [0, 0, 1, 1], [], []>} : vector<8x32xbf16>, vector<32x128xbf16>, vector<8x128xf32> -> vector<8x128xf32>
    %c0_21 = arith.constant 0 : index
    %c0_22 = arith.constant 0 : index
    %37 = vector.load %arg9[%c0_21, %c0_22] : memref<1x128xf32, #tpu.memory_space<vmem>>, vector<1x128xf32>
    %38 = vector.broadcast %37 : vector<1x128xf32> to vector<8x128xf32>
    %39 = arith.addf %36, %38 : vector<8x128xf32>
    %cst_23 = arith.constant 5.000000e-01 : f32
    %40 = vector.broadcast %cst_23 : f32 to vector<8x128xf32>
    %41 = arith.mulf %40, %39 : vector<8x128xf32>
    %cst_24 = arith.constant 4.471500e-02 : f32
    %42 = vector.broadcast %cst_24 : f32 to vector<8x128xf32>
    %43 = arith.mulf %42, %39 : vector<8x128xf32>
    %44 = arith.mulf %43, %39 : vector<8x128xf32>
    %45 = arith.mulf %44, %39 : vector<8x128xf32>
    %46 = arith.addf %39, %45 : vector<8x128xf32>
    %cst_25 = arith.constant 0.797884583 : f32
    %47 = vector.broadcast %cst_25 : f32 to vector<8x128xf32>
    %48 = arith.mulf %47, %46 : vector<8x128xf32>
    %49 = math.tanh %48 : vector<8x128xf32>
    %cst_26 = arith.constant 1.000000e+00 : f32
    %50 = vector.broadcast %cst_26 : f32 to vector<8x128xf32>
    %51 = arith.addf %50, %49 : vector<8x128xf32>
    %52 = arith.mulf %41, %51 : vector<8x128xf32>
    %53 = arith.truncf %52 : vector<8x128xf32> to vector<8x128xbf16>
    %c0_27 = arith.constant 0 : index
    %c0_28 = arith.constant 0 : index
    %54 = vector.load %arg10[%c0_27, %c0_28] : memref<128x32xbf16, #tpu.memory_space<vmem>>, vector<128x32xbf16>
    %cst_29 = arith.constant dense<0.000000e+00> : vector<8x32xf32>
    %55 = tpu.matmul %53, %54, %cst_29 {dimension_numbers = #tpu.dot_dimension_numbers<[1], [0], [0], [1], [0, 0, 1, 1], [], []>} : vector<8x128xbf16>, vector<128x32xbf16>, vector<8x32xf32> -> vector<8x32xf32>
    %c0_30 = arith.constant 0 : index
    %c0_31 = arith.constant 0 : index
    %56 = vector.load %arg11[%c0_30, %c0_31] : memref<1x32xf32, #tpu.memory_space<vmem>>, vector<1x32xf32>
    %57 = vector.broadcast %56 : vector<1x32xf32> to vector<8x32xf32>
    %58 = arith.addf %55, %57 : vector<8x32xf32>
    %59 = arith.addf %9, %58 : vector<8x32xf32>
    %c0_32 = arith.constant 0 : index
    %c0_33 = arith.constant 0 : index
    %c0_34 = arith.constant 0 : index
    %60 = vector.load %arg12[%c0_32, %c0_33, %c0_34] : memref<1x8x32xf32, #tpu.memory_space<vmem>>, vector<1x8x32xf32>
    %61 = vector.shape_cast %60 : vector<1x8x32xf32> to vector<8x32xf32>
    %62 = vector.shape_cast %59 : vector<8x32xf32> to vector<1x8x32xf32>
    tpu.vector_store %arg12[%c0_32, %c0_33, %c0_34], %62 {strides = array<i32>} : memref<1x8x32xf32, #tpu.memory_space<vmem>>, vector<1x8x32xf32>,
    return
  }
  func.func @transform_0(%arg0: i32, %arg1: i32) -> (i32, i32, i32) {
    %c0_i32 = arith.constant 0 : i32
    %c0_i32_0 = arith.constant 0 : i32
    return %arg0, %arg1, %c0_i32 : i32, i32, i32
  }
  func.func @transform_1(%arg0: i32, %arg1: i32) -> (i32, i32, i32) {
    %c0_i32 = arith.constant 0 : i32
    %c0_i32_0 = arith.constant 0 : i32
    return %arg0, %arg1, %c0_i32 : i32, i32, i32
  }
  func.func @transform_2(%arg0: i32, %arg1: i32) -> (i32, i32) {
    %c0_i32 = arith.constant 0 : i32
    %c0_i32_0 = arith.constant 0 : i32
    %c0_i32_1 = arith.constant 0 : i32
    return %c0_i32, %c0_i32_0 : i32, i32
  }
  func.func @transform_3(%arg0: i32, %arg1: i32) -> (i32, i32) {
    %c0_i32 = arith.constant 0 : i32
    %c0_i32_0 = arith.constant 0 : i32
    %c0_i32_1 = arith.constant 0 : i32
    return %c0_i32, %c0_i32_0 : i32, i32
  }
  func.func @transform_4(%arg0: i32, %arg1: i32) -> (i32, i32) {
    %c0_i32 = arith.constant 0 : i32
    %c0_i32_0 = arith.constant 0 : i32
    %c0_i32_1 = arith.constant 0 : i32
    return %c0_i32, %c0_i32_0 : i32, i32
  }
  func.func @transform_5(%arg0: i32, %arg1: i32) -> (i32, i32) {
    %c0_i32 = arith.constant 0 : i32
    %c0_i32_0 = arith.constant 0 : i32
    %c0_i32_1 = arith.constant 0 : i32
    return %c0_i32, %c0_i32_0 : i32, i32
  }
  func.func @transform_6(%arg0: i32, %arg1: i32) -> (i32, i32) {
    %c0_i32 = arith.constant 0 : i32
    %c0_i32_0 = arith.constant 0 : i32
    %c0_i32_1 = arith.constant 0 : i32
    return %c0_i32, %c0_i32_0 : i32, i32
  }
  func.func @transform_7(%arg0: i32, %arg1: i32) -> (i32, i32) {
    %c0_i32 = arith.constant 0 : i32
    %c0_i32_0 = arith.constant 0 : i32
    %c0_i32_1 = arith.constant 0 : i32
    return %c0_i32, %c0_i32_0 : i32, i32
  }
  func.func @transform_8(%arg0: i32, %arg1: i32) -> (i32, i32) {
    %c0_i32 = arith.constant 0 : i32
    %c0_i32_0 = arith.constant 0 : i32
    %c0_i32_1 = arith.constant 0 : i32
    return %c0_i32, %c0_i32_0 : i32, i32
  }
  func.func @transform_9(%arg0: i32, %arg1: i32) -> (i32, i32) {
    %c0_i32 = arith.constant 0 : i32
    %c0_i32_0 = arith.constant 0 : i32
    %c0_i32_1 = arith.constant 0 : i32
    return %c0_i32, %c0_i32_0 : i32, i32
  }
  func.func @transform_10(%arg0: i32, %arg1: i32) -> (i32, i32, i32) {
    %c0_i32 = arith.constant 0 : i32
    %c0_i32_0 = arith.constant 0 : i32
    return %arg0, %arg1, %c0_i32 : i32, i32, i32
  }
}

</mosaic_0001>

<bundles_post_ra>
// kernel: gpt_forward.13
= control target key start
LH: loop header
LB: loop body
LE: loop exit
PB: predicated region body
PF: predicated region fallthrough
CT: control target
= control target key end

     0   :  { %9 = vsyncpa [#allocation4], 0  ;;  %s1175_s0 = inlined_call_operand.hbm [shape: f32[2,8,32], index: 0, kind: input, shape index: {}]   ;;  %s1176_s1 = inlined_call_operand.hbm [shape: f32[1,32], index: 1, kind: input, shape index: {}]   ;;  %s1177_s2 = inlined_call_operand.hbm [shape: f32[1,32], index: 2, kind: input, shape index: {}]   ;;  %s1178_s3 = inlined_call_operand.hbm [shape: bf16[32,128], index: 3, kind: input, shape index: {}]   ;;  %s1179_s4 = inlined_call_operand.hbm [shape: f32[2,8,128], index: 4, kind: output, shape index: {}]  }
   0x1   :  { %11 = vsyncpa [#allocation4 + $0x1], 0 }
   0x2   :  { %12 = vsyncpa [#allocation7], 0 }
   0x3   :  { %13 = vsyncpa [#allocation10], 0 }
   0x4   :  { %14 = vsyncpa [#allocation5], 0 }
   0x5   :  { %16 = vsyncpa [#allocation5 + $0x1], 0  ;;  %s895_s15 = smov 0   ;;  %s897_s16 = smov 0  }
   0x6   :  { %s899_s17 = smov 0   ;;  %s901_s18 = smov 0  }
   0x7   :  { %s903_s19 = smov 0   ;;  %s905_s20 = smov 0  }
   0x8 LB: > { %s519_s21 = sadd.s32 4294967295, %s859_s20   ;;  %s520_s22 = sadd.s32 4294967294, %s859_s20   ;;  %s859_s20 = sphi %s905_s20, %s22_s20   ;;  %s855_s19 = sphi %s903_s19, %s1203_s19   ;;  %s851_s18 = sphi %s901_s18, %s1202_s18   ;;  %s847_s17 = sphi %s899_s17, %s1201_s17   ;;  %s843_s16 = sphi %s897_s16, %s1200_s16   ;;  %s839_s15 = sphi %s895_s15, %s1199_s15  }
   0x9   : > { %p63_p0 = scmp.ne.s32.totalorder %s843_s16, %s839_s15  ;;  %p929_p1 = scmp.eq.s32.totalorder %s519_s21, 0 }
   0xa   : > { %p933_p2 = scmp.eq.s32.totalorder %s519_s21, 1  ;;  %p165_p3 = scmp.eq.s32.totalorder %s520_s22, 1 }
   0xb   : > { %s1184_s23 = scalar_select %p929_p1, 1, 0 }
   0xc   : > { %s1185_s24 = scalar_select %p933_p2, 1, 0 }
   0xd   : > { %p939_p4 = por %p929_p1, %p63_p0  ;;  %p521_p5 = scmp.ge.s32.totalorder %s859_s20, 1 }
   0xe   : > { %p944_p6 = por %p165_p3, %p63_p0  ;;  %p172_p7 = scmp.lt.s32.totalorder %s859_s20, 3 }
   0xf   : > { %s1186_s25 = scalar_select %p939_p4, 1, 0 }
  0x10   : > { %s1187_s26 = scalar_select %p944_p6, 1, 0 }
  0x11   : > { %p949_p8 = pnand %p521_p5, %p172_p7  ;;  %s861_s28 = smov [#allocation6]  }
  0x12   : > { %s185_s29 = sshll.u32 %s861_s28, 4  ;;  %s862_s30 = smov [#allocation8]   ;;  %s186_s29 = int_to_ptr.vmem [resolvable:$true] %s185_s29 }
  0x13   : > { %s1188_s27 = scalar_select %p949_p8, 1, 0 }
  0x14   : > { %p570_p10 = pneg %p949_p8  ;;  %s196_s5 = sshll.u32 %s862_s30, 4  ;;  %s962_s5 = int_to_ptr.vmem [resolvable:$true] %s196_s5 }
  0x15   : > { %s863_s7 = smov [#allocation9]   ;;  %s655_s11 = scalar_lea.hbm %s1176_s1, 16 }
  0x16   : > { %p958_p11 = pnand %p570_p10, %p929_p1  ;;  %s208_s8 = sshll.u32 %s863_s7, 4  ;;  %s964_s8 = int_to_ptr.vmem [resolvable:$true] %s208_s8 }
  0x17   : > { %p656_p12 = scmp.ne.s32.totalorder %s1176_s1, %s655_s11  ;;  %p662_p5 = scmp.lt.u32.totalorder %s655_s11, %s1176_s1 }
  0x18   : > { %p974_p13 = pneg %p958_p11 }
  0x1a   : > { %p658_p0 = pnand %p974_p13, %p656_p12 }
  0x1c   : > { %p659_p3 = pneg %p658_p0 }
  0x1e   : > { %p664_p7 = pnand %p662_p5, %p659_p3 }
  0x20   : > { %667 = shalt.err (!%p664_p7)
}
  0x21   : > { %s668_s28 = scalar_lea.vmem %s186_s29, 16  ;;  %s675_s30 = scalar_lea.vmem %s186_s29, 32 }
  0x22   : > { %p669_p10 = scmp.ne.s32.totalorder %s186_s29, %s668_s28  ;;  %p676_p1 = scmp.lt.s32.totalorder %s186_s29, %s186_s29 }
  0x23   : > { %p677_p4 = scmp.lt.s32.totalorder %s675_s30, %s668_s28 }
  0x24   : > { %p671_p9 = pnand %p669_p10, %p974_p13 }
  0x25   : > { %p678_p8 = por %p677_p4, %p676_p1 }
  0x26   : > { %p672_p6 = pneg %p671_p9 }
  0x28   : > { %p679_p2 = pnand %p678_p8, %p672_p6 }
  0x2a   : > { %682 = shalt.err (!%p679_p2)
}
  0x2b   : > { %573 = dma.hbm_to_vmem [thread:$0]  (!%p958_p11), %s1176_s1, 16, %s186_s29, [#allocation7]  }
  0x2c   : > { %s683_s12 = scalar_lea.hbm %s1177_s2, 16 }
  0x2d   : > { %p684_p9 = scmp.ne.s32.totalorder %s1177_s2, %s683_s12  ;;  %p690_p2 = scmp.lt.u32.totalorder %s683_s12, %s1177_s2 }
  0x2f   : > { %p686_p12 = pnand %p684_p9, %p974_p13 }
  0x31   : > { %p687_p1 = pneg %p686_p12 }
  0x33   : > { %p692_p4 = pnand %p690_p2, %p687_p1 }
  0x35   : > { %695 = shalt.err (!%p692_p4)
}
  0x36   : > { %s696_s29 = scalar_lea.vmem %s962_s5, 16  ;;  %s703_s30 = scalar_lea.vmem %s962_s5, 32 }
  0x37   : > { %p697_p6 = scmp.ne.s32.totalorder %s962_s5, %s696_s29  ;;  %p704_p3 = scmp.lt.s32.totalorder %s962_s5, %s962_s5 }
  0x38   : > { %p705_p5 = scmp.lt.s32.totalorder %s703_s30, %s696_s29 }
  0x39   : > { %p699_p8 = pnand %p697_p6, %p974_p13 }
  0x3a   : > { %p706_p7 = por %p705_p5, %p704_p3 }
  0x3b   : > { %p700_p0 = pneg %p699_p8 }
  0x3d   : > { %p707_p10 = pnand %p706_p7, %p700_p0 }
  0x3f   : > { %710 = shalt.err (!%p707_p10)
}
  0x40   : > { %576 = dma.hbm_to_vmem [thread:$0]  (!%p958_p11), %s1177_s2, 16, %s962_s5, [#allocation7]  }
  0x41   : > { %s711_s12 = scalar_lea.hbm %s1178_s3, 256 }
  0x42   : > { %p712_p9 = scmp.ne.s32.totalorder %s1178_s3, %s711_s12  ;;  %p718_p2 = scmp.lt.u32.totalorder %s711_s12, %s1178_s3 }
  0x44   : > { %p714_p12 = pnand %p712_p9, %p974_p13 }
  0x46   : > { %p715_p1 = pneg %p714_p12 }
  0x48   : > { %p720_p4 = pnand %p718_p2, %p715_p1 }
  0x4a   : > { %723 = shalt.err (!%p720_p4)
}
  0x4b   : > { %s724_s5 = scalar_lea.vmem %s964_s8, 256  ;;  %p732_p3 = scmp.lt.s32.totalorder %s964_s8, %s964_s8 }
  0x4c   : > { %p725_p6 = scmp.ne.s32.totalorder %s964_s8, %s724_s5  ;;  %p733_p5 = scmp.lt.s32.totalorder %s724_s5, %s724_s5 }
  0x4e   : > { %p727_p8 = pnand %p725_p6, %p974_p13  ;;  %p734_p7 = por %p733_p5, %p732_p3 }
  0x50   : > { %p728_p0 = pneg %p727_p8 }
  0x52   : > { %p735_p10 = pnand %p734_p7, %p728_p0 }
  0x54   : > { %738 = shalt.err (!%p735_p10)
}
  0x55   : > { %s864_s29 = smov 64   ;;  %s865_s14 = smov 4  }
  0x56   : > { %579 = dma.hbm_to_vmem [thread:$0]  (!%p958_p11), %s1178_s3, 256, %s964_s8, [#allocation10], %s864_s29, %s864_s29, %s865_s14  }
  0x57   : > { %s50_s9 = sadd.s32 1, %s847_s17  ;;  %s41_s10 = sadd.s32 1, %s855_s19 }
  0x58   : > { %p57_p13 = scmp.ne.s32.totalorder %s847_s17, %s843_s16  ;;  %p43_p9 = scmp.ge.s32.totalorder %s41_s10, 2 }
  0x59   : > { %p58_p12 = scmp.eq.s32.totalorder %s859_s20, 0  ;;  %p1191_p1 = scmp.ne.s32.totalorder %s1185_s24, 0 }
  0x5a   : > { %p591_p4 = scmp.lt.s32.totalorder %s859_s20, 2  ;;  %s1205_s10 = smov (%p43_p9, %s41_s10), 0 }
  0x5b   : > { %p1044_p2 = por %p1191_p1, %p57_p13  ;;  %p59_p6 = por %p58_p12, %p57_p13 }
  0x5c   : > { %s222_s6 = sand.u32 1, %s847_s17   ;;  %s45_s12 = ssub.s32 %s855_s19, %s1205_s10 }
  0x5d   : > { %p48_p8 = scmp.eq.s32.totalorder %s45_s12, 0  ;;  %s526_s8 = sshll.u32 %s222_s6, 3 }
  0x5e   : > { %s527_s13 = sshll.u32 %s855_s19, 7  ;;  %s226_s5 = scalar_lea.vmem [#allocation3], %s526_s8 }
  0x5f   : > { %s1056_s21 = scalar_select %p48_p8, %s847_s17, %s50_s9  }
  0x60   : > { %s1061_s24 = scalar_lea.hbm %s1175_s0, %s527_s13  ;;  %s234_s29 = sshll.u32 %s226_s5, 4  ;;  %s1063_s29 = int_to_ptr.vmem [resolvable:$true] %s234_s29 }
  0x61   : > { %p1067_p11 = pnand %p591_p4, %p59_p6  ;;  %s223_s30 = scalar_lea.sflag [#allocation4], %s222_s6 }
  0x62   : > { %s739_s7 = scalar_lea.hbm %s1061_s24, 128  ;;  %s744_s8 = scalar_lea.hbm %s1175_s0, 256 }
  0x63   : > { %p740_p0 = scmp.ne.s32.totalorder %s1061_s24, %s739_s7  ;;  %p741_p3 = pneg %p1067_p11 }
  0x64   : > { %p745_p10 = scmp.lt.u32.totalorder %s1061_s24, %s1175_s0  ;;  %p746_p13 = scmp.lt.u32.totalorder %s744_s8, %s739_s7 }
  0x65   : > { %p742_p5 = pnand %p741_p3, %p740_p0  ;;  %p748_p12 = scmp.lt.u32.totalorder %s739_s7, %s1061_s24 }
  0x66   : > { %p747_p9 = por %p746_p13, %p745_p10 }
  0x67   : > { %p743_p7 = pneg %p742_p5 }
  0x68   : > { %p749_p1 = por %p748_p12, %p747_p9 }
  0x6a   : > { %p750_p4 = pnand %p749_p1, %p743_p7 }
  0x6c   : > { %753 = shalt.err (!%p750_p4)
}
  0x6d   : > { %s754_s6 = scalar_lea.vmem %s1063_s29, 128  ;;  %s866_s28 = smov [#allocation3]  }
  0x6e   : > { %p755_p6 = scmp.ne.s32.totalorder %s1063_s29, %s754_s6  ;;  %s759_s5 = sshll.u32 %s866_s28, 4  ;;  %s760_s5 = int_to_ptr.vmem [resolvable:$false] %s759_s5 }
  0x6f   : > { %s761_s9 = scalar_lea.vmem %s760_s5, 256  ;;  %p762_p5 = scmp.lt.s32.totalorder %s1063_s29, %s760_s5 }
  0x70   : > { %p757_p8 = pnand %p755_p6, %p741_p3  ;;  %p763_p10 = scmp.lt.s32.totalorder %s761_s9, %s754_s6 }
  0x72   : > { %p758_p0 = pneg %p757_p8  ;;  %p764_p13 = por %p763_p10, %p762_p5 }
  0x74   : > { %p765_p9 = pnand %p764_p13, %p758_p0 }
  0x76   : > { %768 = shalt.err (!%p765_p9)
}
  0x77   : > { %583 = dma.hbm_to_vmem [thread:$0]  (!%p1067_p11), %s1061_s24, 128, %s1063_s29, %s223_s30  }
  0x78   : > { %p1194_p7 = scmp.ne.s32.totalorder %s1188_s27, 0 }
  0x79   : > { %s1099_s7 = sand.u32 (!%p1194_p7), 1, %s843_s16   ;;  %p1195_p3 = scmp.ne.s32.totalorder (!%p1194_p7), %s1186_s25, 0 }
  0x7a   : > { %243 = sbr.rel (%p1194_p7) target bundleno = 686 (0x2ae), region = 36  ;;  %s529_s12 = sshll.u32 (!%p1194_p7), %s1099_s7, 3 }
  0x7b   : > { %s246_s8 = scalar_lea.sflag (!%p1194_p7), [#allocation4], %s1099_s7  ;;  %s249_s13 = scalar_lea.vmem (!%p1194_p7), [#allocation3], %s529_s12 }
  0x81   : > { %822 = dma.done.wait (%p1195_p3), %s246_s8, 128  }
  0x82   : > { %824 = vsyncadd (%p1195_p3), %s246_s8, 4294967168  ;;  %p1196_p11 = scmp.ne.s32.totalorder %s1184_s23, 0 }
  0x84   : > { %826 = dma.done.wait (%p1196_p11), [#allocation7], 32  }
  0x85   : > { %828 = vsyncadd (%p1196_p11), [#allocation7], 4294967264 }
  0x86   : > { %830 = dma.done.wait (%p1196_p11), [#allocation10], 256  }
  0x87   : > { %832 = vsyncadd (%p1196_p11), [#allocation10], 4294967040  ;;  %vm294_vm0 = vcmask 261120   ;;  %v291_v0 = vld [vmem:[%s249_s13] sm:$0xff]  ;;  %v651_v7 = vld [vmem:[#allocation9] sm:$0xff]   ;;  %v867_v8 = vmov 0.0  }
  0x88   : > { %v295_v1 = vsel %vm294_vm0, %v291_v0, 0.0  ;;  %546 = vmatprep.subr.bf16.mxu0 %v867_v8  ;;  %v652_v9 = vld [vmem:[#allocation9 + $0x8] sm:$0xff]   ;;  %vm868_vm1 = vmmov 0   ;;  %v534_v14 = vld [vmem:[#allocation6] ss:$0 sm:$0xff]  ;;  %vm324_vm2 = vcmask 257024  }
  0x89   : > { %296 = vadd.xlane.f32.xlu0 %v295_v1  ;;  %547 = vmatpush3.bf16.msra.mxu0 %v651_v7  ;;  %v535_v16 = vld [vmem:[#allocation8] ss:$0 sm:$0xff]  ;;  %s285_s23 = scalar_lea.vmem [#allocation11], %s529_s12  ;;  %s540_s27 = sshll.u32 %s851_s18, 7 }
  0x8a   : > { %550 = vmatprep.mubr.msk.bf16.mxu0 %vm868_vm1, %v867_v8  ;;  %548 = vmatprep.subr.bf16.mxu0 %v867_v8  ;;  %s404_s25 = sshll.u32 %s285_s23, 4  ;;  %s1128_s14 = scalar_lea.hbm %s1179_s4, %s540_s27  ;;  %s1123_s25 = int_to_ptr.vmem [resolvable:$true] %s404_s25 }
  0x8b   : > { %s389_s30 = scalar_lea.sflag [#allocation5], %s1099_s7  ;;  %s769_s22 = scalar_lea.vmem %s1123_s25, 128 }
  0x8c   : > { %p770_p12 = scmp.ne.s32.totalorder %s1123_s25, %s769_s22  ;;  %s869_s18 = smov [#allocation11]  }
  0x8d   : > { %549 = vmatpush3.bf16.msra.mxu0 %v652_v9  ;;  %s773_s6 = sshll.u32 %s869_s18, 4  ;;  %s774_s6 = int_to_ptr.vmem [resolvable:$false] %s773_s6 }
  0x8e   : > { %p771_p1 = pnand %p770_p12, %p1044_p2  ;;  %s775_s28 = scalar_lea.vmem %s774_s6, 256 }
  0x8f   : > { %p776_p6 = scmp.lt.s32.totalorder %s1123_s25, %s774_s6  ;;  %p777_p8 = scmp.lt.s32.totalorder %s775_s28, %s769_s22 }
  0x90   : > { %p772_p4 = pneg %p771_p1 }
  0x91   : > { %p778_p0 = por %p777_p8, %p776_p6 }
  0x93   : > { %p779_p5 = pnand %p778_p0, %p772_p4 }
 0x116   : > { %v297_v2 = vpop.xlane.xlu0 %296 }
 0x117   : > { %v299_v3 = vmul.f32 0.03125, %v297_v2 }
 0x119   : > { %v300_v4 = vsub.f32 %v291_v0, %v299_v3 }
 0x11b   : > { %v301_v5 = vmul.f32 %v300_v4, %v300_v4 }
 0x11d   : > { %v302_v6 = vsel %vm294_vm0, %v301_v5, 0.0 }
 0x11e   : > { %303 = vadd.xlane.f32.xlu0 %v302_v6 }
 0x1ab   : > { %v304_v10 = vpop.xlane.xlu0 %303 }
 0x1ac   : > { %v305_v11 = vmul.f32 0.03125, %v304_v10 }
 0x1ae   : > { %v306_v12 = vadd.f32 1e-05, %v305_v11 }
 0x1b0   : > { %653 = vrsqrt.f32 %v306_v12 }
 0x1ba   : > { %v654_v13 = vpop.eup %653 }
 0x1bb   : > { %v308_v15 = vmul.f32 %v654_v13, %v300_v4 }
 0x1bd   : > { %v315_v17 = vmul.f32 %v534_v14, %v308_v15 }
 0x1bf   : > { %v322_v18 = vadd.f32 %v535_v16, %v315_v17 }
 0x1c1   : > { %v323_v19 = vpack.c.bf16 %v322_v18, %v322_v18 }
 0x1c3   : > { %325 = vst.msk [vmem:[#allocation2] sm:$0xf] %vm324_vm2, %v323_v19 }
 0x1ca   : > { %v326_v20 = vld [vmem:[#allocation2] sm:$0xf] }
 0x1cb   : > { %551 = vmatmul.mubr.msk.bf16.vlgmr.msra.gmra.mrb[0].mxu0 %vm294_vm0, %v326_v20 }
 0x29e   : > { %v381_v21 = vpop.f32.mrb[0].mxu0 }
 0x29f   : > { %387 = vst [vmem:[%s285_s23] sm:$0xff] %v381_v21  ;;  %v552_v22 = vpop.f32.mrb[1].mxu0 }
 0x2a0   : > { %v384_v23 = vpop.f32.mrb[2].mxu0 }
 0x2a1   : > { %782 = shalt.err (!%p779_p5)
}
 0x2a2   : > { %s783_s5 = scalar_lea.hbm %s1128_s14, 128  ;;  %s787_s12 = scalar_lea.hbm %s1179_s4, 256 }
 0x2a3   : > { %p784_p10 = scmp.ne.s32.totalorder %s1128_s14, %s783_s5  ;;  %p788_p7 = scmp.lt.u32.totalorder %s1128_s14, %s1179_s4 }
 0x2a4   : > { %p789_p3 = scmp.lt.u32.totalorder %s787_s12, %s783_s5  ;;  %p791_p12 = scmp.lt.u32.totalorder %s783_s5, %s1128_s14 }
 0x2a5   : > { %p785_p13 = pnand %p784_p10, %p1044_p2 }
 0x2a6   : > { %p790_p11 = por %p789_p3, %p788_p7 }
 0x2a7   : > { %p786_p9 = pneg %p785_p13 }
 0x2a8   : > { %p792_p1 = por %p791_p12, %p790_p11 }
 0x2aa   : > { %p793_p4 = pnand %p792_p1, %p786_p9 }
 0x2ac   : > { %796 = shalt.err (!%p793_p4)
}
 0x2ad   : > { %568 = dma.vmem_to_hbm [thread:$0]  (%p1044_p2), %s1123_s25, 128, %s1128_s14, %s389_s30   ;;  %v553_v24 = vpop.f32.mrb[3].mxu0 }
 0x2ae PF: > { %s416_s23 = sand.u32 1, %s839_s15   ;;  %p1197_p6 = scmp.ne.s32.totalorder %s1187_s26, 0 }
 0x2af   : > { %p1198_p8 = scmp.ge.s32.totalorder %s859_s20, 2  ;;  %s417_s27 = scalar_lea.sflag [#allocation5], %s416_s23 }
 0x2b1   : > { %p585_p0 = pnand %p1198_p8, %p1197_p6 }
 0x2b3   : > { %834 = dma.done.wait (!%p585_p0), %s417_s27, 128  }
 0x2b4   : > { %836 = vsyncadd (!%p585_p0), %s417_s27, 4294967168  ;;  %s22_s20 = sadd.s32 1, %s859_s20   ;;  %s1199_s15 = smov %s843_s16 }
 0x2b5   : > { %p19_p5 = scmp.ge.s32.totalorder %s22_s20, 4   ;;  %s1200_s16 = smov %s847_s17 }
 0x2b6   : > { %s1201_s17 = smov %s1056_s21  ;;  %s1202_s18 = smov %s855_s19 }
 0x2b7   : > { %s1203_s19 = smov %s1205_s10  ;;  %21 = sbr.rel (!%p19_p5) target bundleno = 8 (0x8), region = 98 }
 0x2be   :  { %422 = vsyncpa [#allocation4], 1 }
 0x2bf   :  { %424 = vsyncpa [#allocation4 + $0x1], 1 }
 0x2c0   :  { %425 = vsyncpa [#allocation7], 1 }
 0x2c1   :  { %426 = vsyncpa [#allocation10], 1 }
 0x2c2   :  { %427 = vsyncpa [#allocation5], 1 }
 0x2c3   :  { %429 = vsyncpa [#allocation5 + $0x1], 1 }

// kernel: gpt_forward.7
= control target key start
LH: loop header
LB: loop body
LE: loop exit
PB: predicated region body
PF: predicated region fallthrough
CT: control target
= control target key end

     0   :  { %s1743_s0 = inlined_call_operand.hbm [shape: f32[2,8,32], index: 0, kind: input, shape index: {}]   ;;  %s1744_s1 = inlined_call_operand.hbm [shape: f32[1,32], index: 1, kind: input, shape index: {}]   ;;  %s1745_s2 = inlined_call_operand.hbm [shape: f32[1,32], index: 2, kind: input, shape index: {}]   ;;  %s1746_s3 = inlined_call_operand.hbm [shape: bf16[32,96], index: 3, kind: input, shape index: {}]   ;;  %s1747_s4 = inlined_call_operand.hbm [shape: f32[1,96], index: 4, kind: input, shape index: {}]   ;;  %s1748_s5 = inlined_call_operand.hbm [shape: bf16[2,4,8,8], index: 5, kind: output, shape index: {0}]   ;;  %s1749_s6 = inlined_call_operand.hbm [shape: bf16[2,4,8,8], index: 6, kind: output, shape index: {1}]   ;;  %s1750_s7 = inlined_call_operand.hbm [shape: bf16[2,4,8,8], index: 7, kind: output, shape index: {2}]  }
   0x1   :  { %1755 = sst [smem:[#allocation20_spill]] %s1744_s1 }
   0x2   :  { %1756 = sst [smem:[#allocation21_spill]] %s1745_s2 }
   0x3   :  { %13 = vsyncpa [#allocation3], 0 }
   0x4   :  { %15 = vsyncpa [#allocation3 + $0x1], 0 }
   0x5   :  { %16 = vsyncpa [#allocation6], 0 }
   0x6   :  { %17 = vsyncpa [#allocation9], 0 }
   0x7   :  { %18 = vsyncpa [#allocation4], 0 }
   0x8   :  { %20 = vsyncpa [#allocation4 + $0x1], 0 }
   0x9   :  { %21 = vsyncpa [#allocation13], 0 }
   0xa   :  { %23 = vsyncpa [#allocation13 + $0x1], 0  ;;  %s1342_s24 = smov 0   ;;  %s1344_s25 = smov 0  }
   0xb   :  { %s1346_s26 = smov 0   ;;  %s1348_s27 = smov 0  }
   0xc   :  { %s1350_s28 = smov 0   ;;  %s1352_s29 = smov 0  }
   0xd LB: > { %s1373_s30 = sadd.s32 4294967295, %s1276_s29   ;;  %p792_p0 = scmp.ge.s32.totalorder %s1276_s29, 1  ;;  %s1276_s29 = sphi %s1352_s29, %s29_s29   ;;  %s1272_s28 = sphi %s1350_s28, %s1782_s28   ;;  %s1268_s27 = sphi %s1348_s27, %s1781_s27   ;;  %s1264_s26 = sphi %s1346_s26, %s1780_s26   ;;  %s1260_s25 = sphi %s1344_s25, %s1779_s25   ;;  %s1256_s24 = sphi %s1342_s24, %s1778_s24  }
   0xe   : > { %p1751_p1 = scmp.eq.s32.totalorder %s1373_s30, 0  ;;  %p242_p2 = scmp.lt.s32.totalorder %s1276_s29, 3 }
   0xf   : > { %s1278_s9 = smov [#allocation5]   ;;  %s1279_s11 = smov [#allocation8]  }
  0x10   : > { %p1378_p3 = pnand %p792_p0, %p242_p2  ;;  %s255_s10 = sshll.u32 %s1278_s9, 4  ;;  %s256_s10 = int_to_ptr.vmem [resolvable:$true] %s255_s10 }
  0x11   : > { %s276_s12 = sshll.u32 %s1279_s11, 4  ;;  %s1280_s14 = smov [#allocation7]   ;;  %s1391_s12 = int_to_ptr.vmem [resolvable:$true] %s276_s12 }
  0x12   : > { %s1757_s8 = scalar_select %p1378_p3, 1, 0 }
  0x13   : > { %p875_p5 = pneg %p1378_p3  ;;  %s1393_s15 = sshll.u32 %s1280_s14, 4  ;;  %s267_s15 = int_to_ptr.vmem [resolvable:$true] %s1393_s15 }
  0x14   : > { %s1759_s1 = sld [smem:[#allocation20_spill]] }
  0x15   : > { %p1387_p6 = pnand %p875_p5, %p1751_p1 }
  0x17   : > { %p1403_p8 = pneg %p1387_p6 }
  0x1a   : > { %s984_s18 = scalar_lea.hbm %s1759_s1, 16 }
  0x1b   : > { %p985_p7 = scmp.ne.s32.totalorder %s1759_s1, %s984_s18  ;;  %p991_p11 = scmp.lt.u32.totalorder %s984_s18, %s1759_s1 }
  0x1d   : > { %p987_p9 = pnand %p1403_p8, %p985_p7 }
  0x1f   : > { %p988_p10 = pneg %p987_p9 }
  0x21   : > { %p993_p12 = pnand %p991_p11, %p988_p10 }
  0x23   : > { %996 = shalt.err (!%p993_p12)
}
  0x24   : > { %s997_s9 = scalar_lea.vmem %s256_s10, 16  ;;  %s1004_s11 = scalar_lea.vmem %s256_s10, 32 }
  0x25   : > { %p998_p13 = scmp.ne.s32.totalorder %s256_s10, %s997_s9  ;;  %p1005_p5 = scmp.lt.s32.totalorder %s256_s10, %s256_s10 }
  0x26   : > { %p1006_p4 = scmp.lt.s32.totalorder %s1004_s11, %s997_s9 }
  0x27   : > { %p1000_p0 = pnand %p998_p13, %p1403_p8 }
  0x28   : > { %p1007_p1 = por %p1006_p4, %p1005_p5 }
  0x29   : > { %p1001_p2 = pneg %p1000_p0 }
  0x2b   : > { %p1008_p3 = pnand %p1007_p1, %p1001_p2 }
  0x2d   : > { %1011 = shalt.err (!%p1008_p3)
}
  0x2e   : > { %878 = dma.hbm_to_vmem [thread:$0]  (!%p1387_p6), %s1759_s1, 16, %s256_s10, [#allocation6]  }
  0x2f   : > { %s1012_s19 = scalar_lea.hbm %s1746_s3, 256 }
  0x30   : > { %p1013_p7 = scmp.ne.s32.totalorder %s1746_s3, %s1012_s19  ;;  %p1019_p1 = scmp.lt.u32.totalorder %s1012_s19, %s1746_s3 }
  0x32   : > { %p1015_p9 = pnand %p1013_p7, %p1403_p8 }
  0x34   : > { %p1016_p4 = pneg %p1015_p9 }
  0x36   : > { %p1021_p3 = pnand %p1019_p1, %p1016_p4 }
  0x38   : > { %1024 = shalt.err (!%p1021_p3)
}
  0x39   : > { %s1025_s10 = scalar_lea.vmem %s1391_s12, 256  ;;  %p1033_p13 = scmp.lt.s32.totalorder %s1391_s12, %s1391_s12 }
  0x3a   : > { %p1026_p10 = scmp.ne.s32.totalorder %s1391_s12, %s1025_s10  ;;  %p1034_p0 = scmp.lt.s32.totalorder %s1025_s10, %s1025_s10 }
  0x3c   : > { %p1028_p11 = pnand %p1026_p10, %p1403_p8  ;;  %p1035_p2 = por %p1034_p0, %p1033_p13 }
  0x3e   : > { %p1029_p12 = pneg %p1028_p11 }
  0x40   : > { %p1036_p5 = pnand %p1035_p2, %p1029_p12 }
  0x42   : > { %1039 = shalt.err (!%p1036_p5)
}
  0x43   : > { %s1281_s11 = smov 64   ;;  %s1282_s14 = smov 4  }
  0x44   : > { %884 = dma.hbm_to_vmem [thread:$0]  (!%p1387_p6), %s1746_s3, 256, %s1391_s12, [#allocation9], %s1281_s11, %s1281_s11, %s1282_s14  }
  0x45   : > { %s1761_s2 = sld [smem:[#allocation21_spill]] }
  0x4b   : > { %s1040_s20 = scalar_lea.hbm %s1761_s2, 16 }
  0x4c   : > { %p1041_p7 = scmp.ne.s32.totalorder %s1761_s2, %s1040_s20  ;;  %p1047_p1 = scmp.lt.u32.totalorder %s1040_s20, %s1761_s2 }
  0x4e   : > { %p1043_p9 = pnand %p1041_p7, %p1403_p8 }
  0x50   : > { %p1044_p4 = pneg %p1043_p9 }
  0x52   : > { %p1049_p3 = pnand %p1047_p1, %p1044_p4 }
  0x54   : > { %1052 = shalt.err (!%p1049_p3)
}
  0x55   : > { %s1053_s16 = scalar_lea.vmem %s267_s15, 16  ;;  %s1060_s12 = scalar_lea.vmem %s267_s15, 32 }
  0x56   : > { %p1054_p10 = scmp.ne.s32.totalorder %s267_s15, %s1053_s16  ;;  %p1061_p13 = scmp.lt.s32.totalorder %s267_s15, %s267_s15 }
  0x57   : > { %p1062_p0 = scmp.lt.s32.totalorder %s1060_s12, %s1053_s16 }
  0x58   : > { %p1056_p11 = pnand %p1054_p10, %p1403_p8 }
  0x59   : > { %p1063_p2 = por %p1062_p0, %p1061_p13 }
  0x5a   : > { %p1057_p12 = pneg %p1056_p11 }
  0x5c   : > { %p1064_p5 = pnand %p1063_p2, %p1057_p12 }
  0x5e   : > { %1067 = shalt.err (!%p1064_p5)
}
  0x5f   : > { %881 = dma.hbm_to_vmem [thread:$0]  (!%p1387_p6), %s1761_s2, 16, %s267_s15, [#allocation6]  }
  0x60   : > { %s1283_s17 = smov [#allocation10]   ;;  %s1068_s22 = scalar_lea.hbm %s1747_s4, 16 }
  0x61   : > { %s290_s18 = sshll.u32 %s1283_s17, 4  ;;  %p1069_p7 = scmp.ne.s32.totalorder %s1747_s4, %s1068_s22  ;;  %s291_s18 = int_to_ptr.vmem [resolvable:$true] %s290_s18 }
  0x62   : > { %p1075_p1 = scmp.lt.u32.totalorder %s1068_s22, %s1747_s4 }
  0x63   : > { %p1071_p9 = pnand %p1069_p7, %p1403_p8 }
  0x65   : > { %p1072_p4 = pneg %p1071_p9 }
  0x67   : > { %p1077_p3 = pnand %p1075_p1, %p1072_p4 }
  0x69   : > { %1080 = shalt.err (!%p1077_p3)
}
  0x6a   : > { %s1081_s15 = scalar_lea.vmem %s291_s18, 16  ;;  %s1088_s12 = scalar_lea.vmem %s291_s18, 32 }
  0x6b   : > { %p1082_p10 = scmp.ne.s32.totalorder %s291_s18, %s1081_s15  ;;  %p1089_p13 = scmp.lt.s32.totalorder %s291_s18, %s291_s18 }
  0x6c   : > { %p1090_p0 = scmp.lt.s32.totalorder %s1088_s12, %s1081_s15 }
  0x6d   : > { %p1084_p11 = pnand %p1082_p10, %p1403_p8 }
  0x6e   : > { %p1091_p2 = por %p1090_p0, %p1089_p13 }
  0x6f   : > { %p1085_p12 = pneg %p1084_p11 }
  0x71   : > { %p1092_p5 = pnand %p1091_p2, %p1085_p12 }
  0x73   : > { %1095 = shalt.err (!%p1092_p5)
}
  0x74   : > { %887 = dma.hbm_to_vmem [thread:$0]  (!%p1387_p6), %s1747_s4, 16, %s291_s18, [#allocation9]  }
  0x75   : > { %s1753_s21 = sadd.s32 4294967294, %s1276_s29   ;;  %s41_s17 = sadd.s32 1, %s1272_s28 }
  0x76   : > { %p43_p8 = scmp.ge.s32.totalorder %s41_s17, 2  ;;  %s50_s13 = sadd.s32 1, %s1264_s26 }
  0x77   : > { %p57_p7 = scmp.ne.s32.totalorder %s1264_s26, %s1260_s25  ;;  %p58_p9 = scmp.eq.s32.totalorder %s1276_s29, 0 }
  0x78   : > { %s1784_s17 = smov (%p43_p8, %s41_s17), 0  ;;  %p63_p1 = scmp.ne.s32.totalorder %s1260_s25, %s1256_s24 }
  0x79   : > { %p1487_p4 = por %p58_p9, %p57_p7  ;;  %s45_s18 = ssub.s32 %s1272_s28, %s1784_s17 }
  0x7a   : > { %p173_p6 = scmp.eq.s32.totalorder %s1373_s30, 1  ;;  %p48_p3 = scmp.eq.s32.totalorder %s45_s18, 0 }
  0x7b   : > { %p1763_p10 = scmp.eq.s32.totalorder %s1373_s30, 0  ;;  %p179_p13 = scmp.eq.s32.totalorder %s1753_s21, 1 }
  0x7c   : > { %p1502_p12 = por %p173_p6, %p57_p7  ;;  %p906_p2 = scmp.lt.s32.totalorder %s1276_s29, 2 }
  0x7d   : > { %p1498_p11 = por %p1763_p10, %p63_p1  ;;  %p1511_p0 = por %p179_p13, %p63_p1 }
  0x7e   : > { %s1765_s22 = scalar_select %p1502_p12, 1, 0 }
  0x7f   : > { %s1509_s23 = scalar_select %p48_p3, %s1264_s26, %s50_s13  }
  0x80   : > { %s1766_s9 = scalar_select %p1511_p0, 1, 0 }
  0x81   : > { %s301_s10 = sand.u32 1, %s1264_s26   ;;  %s799_s16 = sshll.u32 %s1272_s28, 7 }
  0x82   : > { %s798_s15 = sshll.u32 %s301_s10, 3  ;;  %s1521_s14 = scalar_lea.hbm %s1743_s0, %s799_s16 }
  0x83   : > { %s305_s18 = scalar_lea.vmem [#allocation2], %s798_s15  ;;  %p1525_p5 = pnand %p906_p2, %p1487_p4 }
  0x84   : > { %s313_s13 = sshll.u32 %s305_s18, 4  ;;  %s302_s1 = scalar_lea.sflag [#allocation3], %s301_s10  ;;  %s1529_s13 = int_to_ptr.vmem [resolvable:$true] %s313_s13 }
  0x85   : > { %s1096_s2 = scalar_lea.hbm %s1521_s14, 128  ;;  %p1098_p7 = pneg %p1525_p5 }
  0x86   : > { %p1097_p8 = scmp.ne.s32.totalorder %s1521_s14, %s1096_s2  ;;  %s1101_s19 = scalar_lea.hbm %s1743_s0, 256 }
  0x87   : > { %p1102_p4 = scmp.lt.u32.totalorder %s1521_s14, %s1743_s0  ;;  %p1103_p6 = scmp.lt.u32.totalorder %s1101_s19, %s1096_s2 }
  0x88   : > { %p1099_p9 = pnand %p1098_p7, %p1097_p8  ;;  %p1105_p10 = scmp.lt.u32.totalorder %s1096_s2, %s1521_s14 }
  0x89   : > { %p1104_p3 = por %p1103_p6, %p1102_p4 }
  0x8a   : > { %p1100_p1 = pneg %p1099_p9 }
  0x8b   : > { %p1106_p13 = por %p1105_p10, %p1104_p3 }
  0x8d   : > { %p1107_p2 = pnand %p1106_p13, %p1100_p1 }
  0x8f   : > { %1110 = shalt.err (!%p1107_p2)
}
  0x90   : > { %s1111_s10 = scalar_lea.vmem %s1529_s13, 128  ;;  %s1284_s18 = smov [#allocation2]  }
  0x91   : > { %p1112_p8 = scmp.ne.s32.totalorder %s1529_s13, %s1111_s10  ;;  %s1116_s16 = sshll.u32 %s1284_s18, 4  ;;  %s1117_s16 = int_to_ptr.vmem [resolvable:$false] %s1116_s16 }
  0x92   : > { %s1118_s15 = scalar_lea.vmem %s1117_s16, 256  ;;  %p1119_p12 = scmp.lt.s32.totalorder %s1529_s13, %s1117_s16 }
  0x93   : > { %p1114_p9 = pnand %p1112_p8, %p1098_p7  ;;  %p1120_p4 = scmp.lt.s32.totalorder %s1118_s15, %s1111_s10 }
  0x95   : > { %p1115_p0 = pneg %p1114_p9  ;;  %p1121_p6 = por %p1120_p4, %p1119_p12 }
  0x97   : > { %p1122_p3 = pnand %p1121_p6, %p1115_p0 }
  0x99   : > { %1125 = shalt.err (!%p1122_p3)
}
  0x9a   : > { %891 = dma.hbm_to_vmem [thread:$0]  (!%p1525_p5), %s1521_s14, 128, %s1529_s13, %s302_s1  }
  0x9b   : > { %p1768_p1 = scmp.ne.s32.totalorder %s1757_s8, 0 }
  0x9c   : > { %s1559_s2 = sand.u32 (!%p1768_p1), 1, %s1260_s25  }
  0x9d   : > { %322 = sbr.rel (%p1768_p1) target bundleno = 891 (0x37b), region = 40  ;;  %s801_s19 = sshll.u32 (!%p1768_p1), %s1559_s2, 3 }
  0x9e   : > { %s325_s12 = scalar_lea.sflag (!%p1768_p1), [#allocation3], %s1559_s2  ;;  %s328_s11 = scalar_lea.vmem (!%p1768_p1), [#allocation2], %s801_s19 }
  0xa4   : > { %1235 = dma.done.wait (%p1498_p11), %s325_s12, 128  }
  0xa5   : > { %1237 = vsyncadd (%p1498_p11), %s325_s12, 4294967168  ;;  %p1769_p12 = scmp.eq.s32.totalorder %s1373_s30, 0 }
  0xa7   : > { %1239 = dma.done.wait (%p1769_p12), [#allocation6], 32   ;;  %p1770_p0 = pmov %p1769_p12 }
  0xa9   : > { %1241 = vsyncadd (%p1770_p0), [#allocation6], 4294967264  ;;  %p1771_p5 = pmov %p1770_p0 }
  0xaa   : > { %p1772_p7 = pmov %p1770_p0 }
  0xab   : > { %1243 = dma.done.wait (%p1771_p5), [#allocation9], 272  }
  0xac   : > { %1245 = vsyncadd (%p1772_p7), [#allocation9], 4294967024  ;;  %vm389_vm0 = vcmask 261120   ;;  %v386_v0 = vld [vmem:[%s328_s11] sm:$0xff]  ;;  %v980_v7 = vld [vmem:[#allocation8] sm:$0xff]   ;;  %v1285_v8 = vmov 0.0  }
  0xad   : > { %v390_v1 = vsel %vm389_vm0, %v386_v0, 0.0  ;;  %843 = vmatprep.subr.bf16.mxu0 %v1285_v8  ;;  %vm1286_vm1 = vmmov 0   ;;  %v981_v9 = vld [vmem:[#allocation8 + $0x8] sm:$0xff]   ;;  %v809_v14 = vld [vmem:[#allocation5] ss:$0 sm:$0xff]  ;;  %s1579_s1 = sshll.u32 %s1559_s2, 4 }
  0xae   : > { %391 = vadd.xlane.f32.xlu0 %v390_v1  ;;  %847 = vmatprep.mubr.msk.bf16.mxu0 %vm1286_vm1, %v1285_v8  ;;  %v810_v16 = vld [vmem:[#allocation7] ss:$0 sm:$0xff]  ;;  %v811_v20 = vld [vmem:[#allocation10] ss:$0 sm:$0xff]  ;;  %vm486_vm2 = vcmask 60416   ;;  %s1287_s8 = smov 80  }
  0xaf   : > { %844 = vmatpush3.bf16.msra.mxu0 %v980_v7  ;;  %s1288_s21 = smov 96   ;;  %s1582_s20 = scalar_lea.vmem [#allocation11], %s1579_s1 }
  0xb0   : > { %845 = vmatprep.subr.bf16.mxu0 %v1285_v8  ;;  %s1289_s14 = smov 104   ;;  %s1290_s13 = smov 88  }
  0xb1   : > { %s1291_s10 = smov 72   ;;  %s1292_s18 = smov 64  }
  0xb2   : > { %s1293_s16 = smov 120   ;;  %s1294_s15 = smov 56  }
  0xb3   : > { %846 = vmatpush3.bf16.msra.mxu0 %v981_v9  ;;  %s1295_s19 = smov 112   ;;  %s1296_s12 = smov 48  }
  0xb4   : > { %s1297_s11 = smov 40   ;;  %p1773_p10 = scmp.ne.s32.totalorder %s1765_s22, 0 }
 0x13b   : > { %v392_v2 = vpop.xlane.xlu0 %391 }
 0x13c   : > { %v394_v3 = vmul.f32 0.03125, %v392_v2 }
 0x13e   : > { %v395_v4 = vsub.f32 %v386_v0, %v394_v3 }
 0x140   : > { %v396_v5 = vmul.f32 %v395_v4, %v395_v4 }
 0x142   : > { %v397_v6 = vsel %vm389_vm0, %v396_v5, 0.0 }
 0x143   : > { %398 = vadd.xlane.f32.xlu0 %v397_v6 }
 0x1d0   : > { %v399_v10 = vpop.xlane.xlu0 %398 }
 0x1d1   : > { %v400_v11 = vmul.f32 0.03125, %v399_v10 }
 0x1d3   : > { %v401_v12 = vadd.f32 1e-05, %v400_v11 }
 0x1d5   : > { %982 = vrsqrt.f32 %v401_v12 }
 0x1df   : > { %v983_v13 = vpop.eup %982 }
 0x1e0   : > { %v403_v15 = vmul.f32 %v983_v13, %v395_v4 }
 0x1e2   : > { %v410_v17 = vmul.f32 %v809_v14, %v403_v15 }
 0x1e4   : > { %v417_v18 = vadd.f32 %v810_v16, %v410_v17 }
 0x1e6   : > { %v418_v19 = vpack.c.bf16 %v417_v18, %v417_v18 }
 0x1e8   : > { %848 = vmatmul.mubr.msk.bf16.vlgmr.msra.gmra.mrb[0].mxu0 %vm389_vm0, %v418_v19 }
 0x2bb   : > { %v479_v21 = vpop.f32.mrb[0].mxu0 }
 0x2bc   : > { %v480_v22 = vadd.f32 %v811_v20, %v479_v21  ;;  %v849_v23 = vpop.f32.mrb[1].mxu0 }
 0x2bd   : > { %v482_v24 = vpop.f32.mrb[2].mxu0 }
 0x2be   : > { %v485_v25 = vpack.c.bf16 %v480_v22, %v480_v22  ;;  %v850_v26 = vpop.f32.mrb[3].mxu0 }
 0x2c0   : > { %519 = vrot.lane.b32.xlu0 %v485_v25, %s1287_s8  ;;  %491 = vrot.lane.b32.xlu1 %v485_v25, %s1288_s21  ;;  %487 = vst.msk [vmem:[%s1582_s20] sm:$0xf] %vm486_vm2, %v485_v25  ;;  %s377_s8 = scalar_lea.vmem [#allocation12], %s1579_s1 }
 0x2c1   : > { %s586_s21 = sshll.u32 %s377_s8, 4  ;;  %s1597_s21 = int_to_ptr.vmem [resolvable:$true] %s586_s21 }
 0x2c4   : > { %529 = vrot.lane.b32.xlu0 %v485_v25, %s1289_s14  ;;  %504 = vrot.lane.b32.xlu1 %v485_v25, %s1290_s13  ;;  %s549_s14 = sand.u32 1, %s1373_s30   ;;  %s1592_s13 = sshll.u32 %s1268_s27, 8 }
 0x2c5   : > { %s1606_s27 = scalar_lea.sflag [#allocation13], %s549_s14  ;;  %s1126_s30 = scalar_lea.vmem %s1597_s21, 256 }
 0x2c6   : > { %p1127_p11 = scmp.ne.s32.totalorder %s1597_s21, %s1126_s30 }
 0x2c8   : > { %534 = vrot.lane.b32.xlu1 %v485_v25, %s1291_s10  ;;  %p1128_p13 = pnand %p1127_p11, %p1773_p10 }
 0x2ca   : > { %p1129_p2 = pneg %p1128_p13 }
 0x2cc   : > { %495 = vrot.lane.b32.xlu1 %v485_v25, %s1292_s18 }
 0x2d0   : > { %499 = vrot.lane.b32.xlu1 %v485_v25, %s1293_s16 }
 0x2d4   : > { %509 = vrot.lane.b32.xlu1 %v485_v25, %s1294_s15  ;;  %s1603_s15 = scalar_lea.hbm %s1749_s6, %s1592_s13 }
 0x2d8   : > { %514 = vrot.lane.b32.xlu1 %v485_v25, %s1295_s19  ;;  %s1298_s19 = smov [#allocation12]  }
 0x2dc   : > { %524 = vrot.lane.b32.xlu1 %v485_v25, %s1296_s12  ;;  %s1130_s12 = sshll.u32 %s1298_s19, 4  ;;  %s1131_s12 = int_to_ptr.vmem [resolvable:$false] %s1130_s12 }
 0x2dd   : > { %p1133_p8 = scmp.lt.s32.totalorder %s1597_s21, %s1131_s12 }
 0x2e0   : > { %539 = vrot.lane.b32.xlu1 %v485_v25, %s1297_s11  ;;  %s1132_s11 = scalar_lea.vmem %s1131_s12, 512 }
 0x2e1   : > { %p1134_p9 = scmp.lt.s32.totalorder %s1132_s11, %s1126_s30 }
 0x2e3   : > { %p1135_p4 = por %p1134_p9, %p1133_p8 }
 0x2e5   : > { %p1136_p6 = pnand %p1135_p4, %p1129_p2 }
 0x332   : > { %v520_v27 = vpop.permute.xlu0 %519  ;;  %v492_v28 = vpop.permute.xlu1 %491 }
 0x333   : > { %820 = vst.msk [vmem:[%s377_s8 + $0x8] sm:$0xf] %vm486_vm2, %v520_v27  ;;  %494 = vst.msk [vmem:[%s377_s8] sm:$0xf] %vm486_vm2, %v492_v28 }
 0x336   : > { %v530_v29 = vpop.permute.xlu0 %529  ;;  %v505_v30 = vpop.permute.xlu1 %504 }
 0x337   : > { %822 = vst.msk [vmem:[%s1582_s20 + $0xc] sm:$0xf] %vm486_vm2, %v530_v29  ;;  %817 = vst.msk [vmem:[%s377_s8 + $0x4] sm:$0xf] %vm486_vm2, %v505_v30 }
 0x33a   : > { %v535_v31 = vpop.permute.xlu1 %534 }
 0x33b   : > { %823 = vst.msk [vmem:[%s377_s8 + $0xc] sm:$0xf] %vm486_vm2, %v535_v31 }
 0x33c   : > { %1139 = shalt.err (!%p1136_p6)
}
 0x33d   : > { %s1140_s8 = scalar_lea.hbm %s1603_s15, 256  ;;  %s1144_s16 = scalar_lea.hbm %s1749_s6, 512 }
 0x33e   : > { %p1141_p3 = scmp.ne.s32.totalorder %s1603_s15, %s1140_s8  ;;  %p1145_p0 = scmp.lt.u32.totalorder %s1603_s15, %s1749_s6 }
 0x33f   : > { %p1146_p5 = scmp.lt.u32.totalorder %s1144_s16, %s1140_s8  ;;  %p1148_p11 = scmp.lt.u32.totalorder %s1140_s8, %s1603_s15 }
 0x340   : > { %p1142_p1 = pnand %p1141_p3, %p1773_p10 }
 0x341   : > { %p1147_p7 = por %p1146_p5, %p1145_p0 }
 0x342   : > { %p1143_p12 = pneg %p1142_p1 }
 0x343   : > { %p1149_p13 = por %p1148_p11, %p1147_p7 }
 0x345   : > { %p1150_p2 = pnand %p1149_p13, %p1143_p12 }
 0x347   : > { %1153 = shalt.err (!%p1150_p2)
}
 0x348   : > { %s1299_s30 = smov 4   ;;  %v496_v32 = vpop.permute.xlu1 %495  ;;  %s1634_s11 = scalar_lea.vmem [#allocation14], %s1579_s1 }
 0x349   : > { %870 = dma.vmem_to_hbm [thread:$0]  (%p1773_p10), %s1597_s21, 256, %s1603_s15, %s1606_s27, %s1292_s18, %s1292_s18, %s1299_s30  }
 0x34a   : > { %498 = vst.msk [vmem:[%s1634_s11] sm:$0xf] %vm486_vm2, %v496_v32  ;;  %s569_s8 = sshll.u32 %s1582_s20, 4  ;;  %s1649_s1 = scalar_lea.hbm %s1748_s5, %s1592_s13  ;;  %s1643_s8 = int_to_ptr.vmem [resolvable:$true] %s569_s8 }
 0x34b   : > { %s1154_s15 = scalar_lea.vmem %s1643_s8, 256  ;;  %s1300_s16 = smov [#allocation11]  }
 0x34c   : > { %v500_v33 = vpop.permute.xlu1 %499  ;;  %p1155_p8 = scmp.ne.s32.totalorder %s1643_s8, %s1154_s15  ;;  %s1158_s19 = sshll.u32 %s1300_s16, 4  ;;  %s1159_s19 = int_to_ptr.vmem [resolvable:$false] %s1158_s19 }
 0x34d   : > { %816 = vst.msk [vmem:[%s1582_s20 + $0x4] sm:$0xf] %vm486_vm2, %v500_v33  ;;  %s1160_s12 = scalar_lea.vmem %s1159_s19, 512  ;;  %p1161_p6 = scmp.lt.s32.totalorder %s1643_s8, %s1159_s19 }
 0x34e   : > { %p1156_p9 = pnand %p1155_p8, %p1773_p10  ;;  %p1162_p3 = scmp.lt.s32.totalorder %s1160_s12, %s1154_s15 }
 0x350   : > { %v510_v34 = vpop.permute.xlu1 %509  ;;  %p1157_p4 = pneg %p1156_p9  ;;  %p1163_p1 = por %p1162_p3, %p1161_p6 }
 0x351   : > { %818 = vst.msk [vmem:[%s1634_s11 + $0x4] sm:$0xf] %vm486_vm2, %v510_v34 }
 0x352   : > { %p1164_p12 = pnand %p1163_p1, %p1157_p4 }
 0x354   : > { %v515_v35 = vpop.permute.xlu1 %514 }
 0x355   : > { %819 = vst.msk [vmem:[%s1582_s20 + $0x8] sm:$0xf] %vm486_vm2, %v515_v35 }
 0x356   : > { %1167 = shalt.err (!%p1164_p12)
}
 0x357   : > { %s1168_s20 = scalar_lea.hbm %s1649_s1, 256  ;;  %s1172_s16 = scalar_lea.hbm %s1748_s5, 512 }
 0x358   : > { %p1169_p0 = scmp.ne.s32.totalorder %s1649_s1, %s1168_s20  ;;  %p1173_p11 = scmp.lt.u32.totalorder %s1649_s1, %s1748_s5 }
 0x359   : > { %p1174_p13 = scmp.lt.u32.totalorder %s1172_s16, %s1168_s20  ;;  %p1176_p8 = scmp.lt.u32.totalorder %s1168_s20, %s1649_s1 }
 0x35a   : > { %p1170_p5 = pnand %p1169_p0, %p1773_p10 }
 0x35b   : > { %p1175_p2 = por %p1174_p13, %p1173_p11 }
 0x35c   : > { %p1171_p7 = pneg %p1170_p5 }
 0x35d   : > { %p1177_p9 = por %p1176_p8, %p1175_p2 }
 0x35f   : > { %p1178_p4 = pnand %p1177_p9, %p1171_p7 }
 0x361   : > { %1181 = shalt.err (!%p1178_p4)
}
 0x362   : > { %s1774_s15 = scalar_lea.sflag [#allocation4], %s1559_s2  ;;  %s603_s21 = sshll.u32 %s1634_s11, 4  ;;  %v525_v36 = vpop.permute.xlu1 %524  ;;  %s1683_s21 = int_to_ptr.vmem [resolvable:$true] %s603_s21 }
 0x363   : > { %869 = dma.vmem_to_hbm [thread:$0]  (%p1773_p10), %s1643_s8, 256, %s1649_s1, %s1774_s15, %s1292_s18, %s1292_s18, %s1299_s30  }
 0x364   : > { %821 = vst.msk [vmem:[%s1634_s11 + $0x8] sm:$0xf] %vm486_vm2, %v525_v36  ;;  %s1689_s2 = scalar_lea.hbm %s1750_s7, %s1592_s13  ;;  %s1182_s14 = scalar_lea.vmem %s1683_s21, 256 }
 0x365   : > { %p1183_p6 = scmp.ne.s32.totalorder %s1683_s21, %s1182_s14  ;;  %s1301_s8 = smov [#allocation14]  }
 0x366   : > { %v540_v37 = vpop.permute.xlu1 %539  ;;  %s1186_s1 = sshll.u32 %s1301_s8, 4  ;;  %s1187_s1 = int_to_ptr.vmem [resolvable:$false] %s1186_s1 }
 0x367   : > { %824 = vst.msk [vmem:[%s1634_s11 + $0xc] sm:$0xf] %vm486_vm2, %v540_v37  ;;  %p1184_p3 = pnand %p1183_p6, %p1773_p10  ;;  %s1188_s10 = scalar_lea.vmem %s1187_s1, 512 }
 0x368   : > { %p1189_p12 = scmp.lt.s32.totalorder %s1683_s21, %s1187_s1  ;;  %p1190_p0 = scmp.lt.s32.totalorder %s1188_s10, %s1182_s14 }
 0x369   : > { %p1185_p1 = pneg %p1184_p3 }
 0x36a   : > { %p1191_p5 = por %p1190_p0, %p1189_p12 }
 0x36c   : > { %p1192_p7 = pnand %p1191_p5, %p1185_p1 }
 0x36e   : > { %1195 = shalt.err (!%p1192_p7)
}
 0x36f   : > { %s1196_s13 = scalar_lea.hbm %s1689_s2, 256  ;;  %s1200_s19 = scalar_lea.hbm %s1750_s7, 512 }
 0x370   : > { %p1197_p11 = scmp.ne.s32.totalorder %s1689_s2, %s1196_s13  ;;  %p1201_p8 = scmp.lt.u32.totalorder %s1689_s2, %s1750_s7 }
 0x371   : > { %p1202_p9 = scmp.lt.u32.totalorder %s1200_s19, %s1196_s13  ;;  %p1204_p6 = scmp.lt.u32.totalorder %s1196_s13, %s1689_s2 }
 0x372   : > { %p1198_p13 = pnand %p1197_p11, %p1773_p10 }
 0x373   : > { %p1203_p4 = por %p1202_p9, %p1201_p8 }
 0x374   : > { %p1199_p2 = pneg %p1198_p13 }
 0x375   : > { %p1205_p3 = por %p1204_p6, %p1203_p4 }
 0x377   : > { %p1206_p1 = pnand %p1205_p3, %p1199_p2 }
 0x379   : > { %1209 = shalt.err (!%p1206_p1)
}
 0x37a   : > { %871 = dma.vmem_to_hbm [thread:$0]  (%p1773_p10), %s1683_s21, 256, %s1689_s2, %s1606_s27, %s1292_s18, %s1292_s18, %s1299_s30  }
 0x37b PF: > { %s618_s20 = sand.u32 1, %s1256_s24   ;;  %p1775_p12 = scmp.ne.s32.totalorder %s1766_s9, 0 }
 0x37c   : > { %p1776_p0 = scmp.ge.s32.totalorder %s1276_s29, 2  ;;  %s619_s14 = scalar_lea.sflag [#allocation4], %s618_s20 }
 0x37e   : > { %p893_p5 = pnand %p1776_p0, %p1775_p12 }
 0x380   : > { %1247 = dma.done.wait (!%p893_p5), %s619_s14, 256  }
 0x381   : > { %1249 = vsyncadd (!%p893_p5), %s619_s14, 4294967040  ;;  %s1777_s22 = sadd.s32 4294967294, %s1276_s29  }
 0x382   : > { %s627_s8 = sand.u32 1, %s1777_s22  }
 0x383   : > { %s628_s1 = scalar_lea.sflag [#allocation13], %s627_s8 }
 0x384   : > { %1251 = dma.done.wait (!%p893_p5), %s628_s1, 512  }
 0x385   : > { %1253 = vsyncadd (!%p893_p5), %s628_s1, 4294966784  ;;  %s29_s29 = sadd.s32 1, %s1276_s29   ;;  %s1778_s24 = smov %s1260_s25 }
 0x386   : > { %p26_p10 = scmp.ge.s32.totalorder %s29_s29, 4   ;;  %s1779_s25 = smov %s1264_s26 }
 0x387   : > { %s1780_s26 = smov %s1509_s23  ;;  %s1781_s27 = smov %s1272_s28 }
 0x388   : > { %s1782_s28 = smov %s1784_s17  ;;  %28 = sbr.rel (!%p26_p10) target bundleno = 13 (0xd), region = 142 }
 0x38f   :  { %642 = vsyncpa [#allocation3], 1 }
 0x390   :  { %644 = vsyncpa [#allocation3 + $0x1], 1 }
 0x391   :  { %645 = vsyncpa [#allocation6], 1 }
 0x392   :  { %646 = vsyncpa [#allocation9], 1 }
 0x393   :  { %647 = vsyncpa [#allocation4], 1 }
 0x394   :  { %649 = vsyncpa [#allocation4 + $0x1], 1 }
 0x395   :  { %650 = vsyncpa [#allocation13], 1 }
 0x396   :  { %652 = vsyncpa [#allocation13 + $0x1], 1 }

// kernel: gpt_forward.9
= control target key start
LH: loop header
LB: loop body
LE: loop exit
PB: predicated region body
PF: predicated region fallthrough
CT: control target
= control target key end

     0   :  { %s2212_s0 = inlined_call_operand.hbm [shape: f32[2,8,32], index: 0, kind: input, shape index: {}]   ;;  %s2213_s1 = inlined_call_operand.hbm [shape: bf16[2,8,32], index: 1, kind: input, shape index: {}]   ;;  %s2214_s2 = inlined_call_operand.hbm [shape: bf16[32,32], index: 2, kind: input, shape index: {}]   ;;  %s2215_s3 = inlined_call_operand.hbm [shape: f32[1,32], index: 3, kind: input, shape index: {}]   ;;  %s2216_s4 = inlined_call_operand.hbm [shape: f32[1,32], index: 4, kind: input, shape index: {}]   ;;  %s2217_s5 = inlined_call_operand.hbm [shape: f32[1,32], index: 5, kind: input, shape index: {}]   ;;  %s2218_s6 = inlined_call_operand.hbm [shape: bf16[32,128], index: 6, kind: input, shape index: {}]   ;;  %s2219_s7 = inlined_call_operand.hbm [shape: f32[1,128], index: 7, kind: input, shape index: {}]   ;;  %s2220_s8 = inlined_call_operand.hbm [shape: bf16[128,32], index: 8, kind: input, shape index: {}]   ;;  %s2221_s9 = inlined_call_operand.hbm [shape: f32[1,32], index: 9, kind: input, shape index: {}]   ;;  %s2222_s10 = inlined_call_operand.hbm [shape: f32[2,8,32], index: 10, kind: output, shape index: {}]  }
   0x1   :  { %2232 = sst [smem:[#allocation30_spill]] %s2212_s0 }
   0x2   :  { %2233 = sst [smem:[#allocation31_spill]] %s2213_s1 }
   0x3   :  { %2234 = sst [smem:[#allocation32_spill]] %s2214_s2 }
   0x4   :  { %2235 = sst [smem:[#allocation33_spill]] %s2215_s3 }
   0x5   :  { %2236 = sst [smem:[#allocation34_spill]] %s2216_s4 }
   0x6   :  { %2237 = sst [smem:[#allocation35_spill]] %s2217_s5 }
   0x7   :  { %2238 = sst [smem:[#allocation36_spill]] %s2222_s10 }
   0x8   :  { %15 = vsyncpa [#allocation3], 0 }
   0x9   :  { %17 = vsyncpa [#allocation3 + $0x1], 0 }
   0xa   :  { %18 = vsyncpa [#allocation6], 0 }
   0xb   :  { %20 = vsyncpa [#allocation6 + $0x1], 0 }
   0xc   :  { %21 = vsyncpa [#allocation9], 0 }
   0xd   :  { %22 = vsyncpa [#allocation12], 0 }
   0xe   :  { %23 = vsyncpa [#allocation15], 0 }
   0xf   :  { %24 = vsyncpa [#allocation18], 0 }
  0x10   :  { %25 = vsyncpa [#allocation4], 0 }
  0x11   :  { %27 = vsyncpa [#allocation4 + $0x1], 0  ;;  %s1756_s13 = smov 0   ;;  %s1758_s14 = smov 0  }
  0x12   :  { %s1760_s15 = smov 0   ;;  %s1762_s16 = smov 0  }
  0x13   :  { %s1764_s17 = smov 0   ;;  %s1766_s18 = smov 0  }
  0x14 LB: > { %2239 = sst [smem:[#allocation28_spill]] %s1676_s16  ;;  %s1787_s19 = sadd.s32 4294967295, %s1684_s18   ;;  %s1684_s18 = sphi %s1766_s18, %s33_s18   ;;  %s1680_s17 = sphi %s1764_s17, %s2281_s17   ;;  %s1676_s16 = sphi %s1762_s16, %s2280_s16   ;;  %s1672_s15 = sphi %s1760_s15, %s2279_s15   ;;  %s1668_s14 = sphi %s1758_s14, %s2278_s14   ;;  %s1664_s13 = sphi %s1756_s13, %s2277_s13  }
  0x15   : > { %p1026_p0 = scmp.ge.s32.totalorder %s1684_s18, 1  ;;  %p2226_p1 = scmp.eq.s32.totalorder %s1787_s19, 0 }
  0x16   : > { %p302_p2 = scmp.lt.s32.totalorder %s1684_s18, 3  ;;  %s1686_s21 = smov [#allocation7]  }
  0x17   : > { %s314_s22 = sshll.u32 %s1686_s21, 4  ;;  %s1687_s24 = smov [#allocation8]   ;;  %s1796_s22 = int_to_ptr.vmem [resolvable:$true] %s314_s22 }
  0x18   : > { %p1792_p3 = pnand %p1026_p0, %p302_p2  ;;  %s328_s25 = sshll.u32 %s1687_s24, 4  ;;  %s1807_s25 = int_to_ptr.vmem [resolvable:$true] %s328_s25 }
  0x19   : > { %s1688_s26 = smov [#allocation11]   ;;  %s2243_s2 = sld [smem:[#allocation32_spill]] }
  0x1a   : > { %s2240_s20 = scalar_select %p1792_p3, 1, 0 }
  0x1b   : > { %p1164_p4 = pneg %p1792_p3  ;;  %s1809_s27 = sshll.u32 %s1688_s26, 4  ;;  %s351_s27 = int_to_ptr.vmem [resolvable:$true] %s1809_s27 }
  0x1c   : > { %2241 = sst [smem:[#allocation29_spill]] %s2240_s20 }
  0x1d   : > { %p1803_p6 = pnand %p1164_p4, %p2226_p1 }
  0x1f   : > { %s1294_s30 = scalar_lea.hbm %s2243_s2, 256  ;;  %p1819_p8 = pneg %p1803_p6 }
  0x20   : > { %p1295_p7 = scmp.ne.s32.totalorder %s2243_s2, %s1294_s30  ;;  %p1301_p11 = scmp.lt.u32.totalorder %s1294_s30, %s2243_s2 }
  0x22   : > { %p1297_p9 = pnand %p1819_p8, %p1295_p7 }
  0x24   : > { %p1298_p10 = pneg %p1297_p9 }
  0x26   : > { %p1303_p12 = pnand %p1301_p11, %p1298_p10 }
  0x28   : > { %1306 = shalt.err (!%p1303_p12)
}
  0x29   : > { %s1307_s28 = scalar_lea.vmem %s1796_s22, 256  ;;  %p1315_p4 = scmp.lt.s32.totalorder %s1796_s22, %s1796_s22 }
  0x2a   : > { %p1308_p13 = scmp.ne.s32.totalorder %s1796_s22, %s1307_s28  ;;  %p1316_p5 = scmp.lt.s32.totalorder %s1307_s28, %s1307_s28 }
  0x2c   : > { %p1310_p0 = pnand %p1308_p13, %p1819_p8  ;;  %p1317_p7 = por %p1316_p5, %p1315_p4 }
  0x2e   : > { %p1311_p2 = pneg %p1310_p0 }
  0x30   : > { %p1318_p9 = pnand %p1317_p7, %p1311_p2 }
  0x32   : > { %1321 = shalt.err (!%p1318_p9)
}
  0x33   : > { %s2228_s29 = smov 64   ;;  %s1690_s30 = smov 4  }
  0x34   : > { %1167 = dma.hbm_to_vmem [thread:$0]  (!%p1803_p6), %s2243_s2, 256, %s1796_s22, [#allocation6], %s2228_s29, %s2228_s29, %s1690_s30  }
  0x35   : > { %s2245_s3 = sld [smem:[#allocation33_spill]] }
  0x3b   : > { %s1322_s28 = scalar_lea.hbm %s2245_s3, 16 }
  0x3c   : > { %p1323_p5 = scmp.ne.s32.totalorder %s2245_s3, %s1322_s28  ;;  %p1329_p12 = scmp.lt.u32.totalorder %s1322_s28, %s2245_s3 }
  0x3e   : > { %p1325_p10 = pnand %p1323_p5, %p1819_p8 }
  0x40   : > { %p1326_p11 = pneg %p1325_p10 }
  0x42   : > { %p1331_p13 = pnand %p1329_p12, %p1326_p11 }
  0x44   : > { %1334 = shalt.err (!%p1331_p13)
}
  0x45   : > { %s1335_s22 = scalar_lea.vmem %s1807_s25, 16  ;;  %s1342_s10 = scalar_lea.vmem %s1807_s25, 32 }
  0x46   : > { %p1336_p0 = scmp.ne.s32.totalorder %s1807_s25, %s1335_s22  ;;  %p1343_p7 = scmp.lt.s32.totalorder %s1807_s25, %s1807_s25 }
  0x47   : > { %p1344_p9 = scmp.lt.s32.totalorder %s1342_s10, %s1335_s22 }
  0x48   : > { %p1338_p2 = pnand %p1336_p0, %p1819_p8 }
  0x49   : > { %p1345_p5 = por %p1344_p9, %p1343_p7 }
  0x4a   : > { %p1339_p4 = pneg %p1338_p2 }
  0x4c   : > { %p1346_p10 = pnand %p1345_p5, %p1339_p4 }
  0x4e   : > { %1349 = shalt.err (!%p1346_p10)
}
  0x4f   : > { %1170 = dma.hbm_to_vmem [thread:$0]  (!%p1803_p6), %s2245_s3, 16, %s1807_s25, [#allocation9]  }
  0x50   : > { %s2246_s5 = sld [smem:[#allocation35_spill]] }
  0x56   : > { %s1350_s12 = scalar_lea.hbm %s2246_s5, 16 }
  0x57   : > { %p1351_p11 = scmp.ne.s32.totalorder %s2246_s5, %s1350_s12  ;;  %p1357_p0 = scmp.lt.u32.totalorder %s1350_s12, %s2246_s5 }
  0x59   : > { %p1353_p12 = pnand %p1351_p11, %p1819_p8 }
  0x5b   : > { %p1354_p13 = pneg %p1353_p12 }
  0x5d   : > { %p1359_p2 = pnand %p1357_p0, %p1354_p13 }
  0x5f   : > { %1362 = shalt.err (!%p1359_p2)
}
  0x60   : > { %s1363_s10 = scalar_lea.vmem %s351_s27, 16  ;;  %s1370_s25 = scalar_lea.vmem %s351_s27, 32 }
  0x61   : > { %p1364_p4 = scmp.ne.s32.totalorder %s351_s27, %s1363_s10  ;;  %p1371_p5 = scmp.lt.s32.totalorder %s351_s27, %s351_s27 }
  0x62   : > { %p1372_p10 = scmp.lt.s32.totalorder %s1370_s25, %s1363_s10 }
  0x63   : > { %p1366_p7 = pnand %p1364_p4, %p1819_p8 }
  0x64   : > { %p1373_p1 = por %p1372_p10, %p1371_p5 }
  0x65   : > { %p1367_p9 = pneg %p1366_p7 }
  0x67   : > { %p1374_p3 = pnand %p1373_p1, %p1367_p9 }
  0x69   : > { %1377 = shalt.err (!%p1374_p3)
}
  0x6a   : > { %1176 = dma.hbm_to_vmem [thread:$0]  (!%p1803_p6), %s2246_s5, 16, %s351_s27, [#allocation12]  }
  0x6b   : > { %s1691_s20 = smov [#allocation14]   ;;  %s1692_s12 = smov [#allocation10]  }
  0x6c   : > { %s374_s11 = sshll.u32 %s1691_s20, 4  ;;  %s339_s24 = sshll.u32 %s1692_s12, 4  ;;  %s375_s11 = int_to_ptr.vmem [resolvable:$true] %s374_s11  ;;  %s340_s24 = int_to_ptr.vmem [resolvable:$true] %s339_s24 }
  0x6d   : > { %s1378_s22 = scalar_lea.hbm %s2219_s7, 16 }
  0x6e   : > { %p1379_p1 = scmp.ne.s32.totalorder %s2219_s7, %s1378_s22  ;;  %p1385_p12 = scmp.lt.u32.totalorder %s1378_s22, %s2219_s7 }
  0x70   : > { %p1381_p3 = pnand %p1379_p1, %p1819_p8 }
  0x72   : > { %p1382_p11 = pneg %p1381_p3 }
  0x74   : > { %p1387_p13 = pnand %p1385_p12, %p1382_p11 }
  0x76   : > { %1390 = shalt.err (!%p1387_p13)
}
  0x77   : > { %s1391_s27 = scalar_lea.vmem %s375_s11, 16  ;;  %s1398_s16 = scalar_lea.vmem %s375_s11, 32 }
  0x78   : > { %p1392_p0 = scmp.ne.s32.totalorder %s375_s11, %s1391_s27  ;;  %p1399_p7 = scmp.lt.s32.totalorder %s375_s11, %s375_s11 }
  0x79   : > { %p1400_p9 = scmp.lt.s32.totalorder %s1398_s16, %s1391_s27 }
  0x7a   : > { %p1394_p2 = pnand %p1392_p0, %p1819_p8 }
  0x7b   : > { %p1401_p5 = por %p1400_p9, %p1399_p7 }
  0x7c   : > { %p1395_p4 = pneg %p1394_p2 }
  0x7e   : > { %p1402_p10 = pnand %p1401_p5, %p1395_p4 }
  0x80   : > { %1405 = shalt.err (!%p1402_p10)
}
  0x81   : > { %1182 = dma.hbm_to_vmem [thread:$0]  (!%p1803_p6), %s2219_s7, 16, %s375_s11, [#allocation15]  }
  0x82   : > { %s2247_s4 = sld [smem:[#allocation34_spill]] }
  0x88   : > { %s1406_s28 = scalar_lea.hbm %s2247_s4, 16 }
  0x89   : > { %p1407_p1 = scmp.ne.s32.totalorder %s2247_s4, %s1406_s28  ;;  %p1413_p12 = scmp.lt.u32.totalorder %s1406_s28, %s2247_s4 }
  0x8b   : > { %p1409_p3 = pnand %p1407_p1, %p1819_p8 }
  0x8d   : > { %p1410_p11 = pneg %p1409_p3 }
  0x8f   : > { %p1415_p13 = pnand %p1413_p12, %p1410_p11 }
  0x91   : > { %1418 = shalt.err (!%p1415_p13)
}
  0x92   : > { %s1419_s27 = scalar_lea.vmem %s340_s24, 16  ;;  %s1426_s11 = scalar_lea.vmem %s340_s24, 32 }
  0x93   : > { %p1420_p0 = scmp.ne.s32.totalorder %s340_s24, %s1419_s27  ;;  %p1427_p7 = scmp.lt.s32.totalorder %s340_s24, %s340_s24 }
  0x94   : > { %p1428_p9 = scmp.lt.s32.totalorder %s1426_s11, %s1419_s27 }
  0x95   : > { %p1422_p2 = pnand %p1420_p0, %p1819_p8 }
  0x96   : > { %p1429_p5 = por %p1428_p9, %p1427_p7 }
  0x97   : > { %p1423_p4 = pneg %p1422_p2 }
  0x99   : > { %p1430_p10 = pnand %p1429_p5, %p1423_p4 }
  0x9b   : > { %1433 = shalt.err (!%p1430_p10)
}
  0x9c   : > { %1173 = dma.hbm_to_vmem [thread:$0]  (!%p1803_p6), %s2247_s4, 16, %s340_s24, [#allocation9]  }
  0x9d   : > { %s1693_s12 = smov [#allocation13]   ;;  %s1694_s26 = smov [#allocation16]  }
  0x9e   : > { %s360_s29 = sshll.u32 %s1693_s12, 4  ;;  %s384_s28 = sshll.u32 %s1694_s26, 4  ;;  %s361_s29 = int_to_ptr.vmem [resolvable:$true] %s360_s29  ;;  %s385_s28 = int_to_ptr.vmem [resolvable:$true] %s384_s28 }
  0x9f   : > { %s1434_s25 = scalar_lea.hbm %s2218_s6, 256 }
  0xa0   : > { %p1435_p1 = scmp.ne.s32.totalorder %s2218_s6, %s1434_s25  ;;  %p1441_p12 = scmp.lt.u32.totalorder %s1434_s25, %s2218_s6 }
  0xa2   : > { %p1437_p3 = pnand %p1435_p1, %p1819_p8 }
  0xa4   : > { %p1438_p11 = pneg %p1437_p3 }
  0xa6   : > { %p1443_p13 = pnand %p1441_p12, %p1438_p11 }
  0xa8   : > { %1446 = shalt.err (!%p1443_p13)
}
  0xa9   : > { %s1447_s24 = scalar_lea.vmem %s361_s29, 256  ;;  %p1455_p7 = scmp.lt.s32.totalorder %s361_s29, %s361_s29 }
  0xaa   : > { %p1448_p0 = scmp.ne.s32.totalorder %s361_s29, %s1447_s24  ;;  %p1456_p9 = scmp.lt.s32.totalorder %s1447_s24, %s1447_s24 }
  0xac   : > { %p1450_p2 = pnand %p1448_p0, %p1819_p8  ;;  %p1457_p5 = por %p1456_p9, %p1455_p7 }
  0xae   : > { %p1451_p4 = pneg %p1450_p2 }
  0xb0   : > { %p1458_p10 = pnand %p1457_p5, %p1451_p4 }
  0xb2   : > { %1461 = shalt.err (!%p1458_p10)
}
  0xb3   : > { %s2248_s20 = smov 64   ;;  %s1462_s25 = scalar_lea.hbm %s2220_s8, 1024 }
  0xb4   : > { %1179 = dma.hbm_to_vmem [thread:$0]  (!%p1803_p6), %s2218_s6, 256, %s361_s29, [#allocation12], %s2248_s20, %s2248_s20, %s1690_s30  }
  0xb5   : > { %p1463_p1 = scmp.ne.s32.totalorder %s2220_s8, %s1462_s25  ;;  %p1469_p12 = scmp.lt.u32.totalorder %s1462_s25, %s2220_s8 }
  0xb7   : > { %p1465_p3 = pnand %p1463_p1, %p1819_p8 }
  0xb9   : > { %p1466_p11 = pneg %p1465_p3 }
  0xbb   : > { %p1471_p13 = pnand %p1469_p12, %p1466_p11 }
  0xbd   : > { %1474 = shalt.err (!%p1471_p13)
}
  0xbe   : > { %s1475_s24 = scalar_lea.vmem %s385_s28, 1024  ;;  %p1483_p7 = scmp.lt.s32.totalorder %s385_s28, %s385_s28 }
  0xbf   : > { %p1476_p0 = scmp.ne.s32.totalorder %s385_s28, %s1475_s24  ;;  %p1484_p9 = scmp.lt.s32.totalorder %s1475_s24, %s1475_s24 }
  0xc1   : > { %p1478_p2 = pnand %p1476_p0, %p1819_p8  ;;  %p1485_p5 = por %p1484_p9, %p1483_p7 }
  0xc3   : > { %p1479_p4 = pneg %p1478_p2 }
  0xc5   : > { %p1486_p10 = pnand %p1485_p5, %p1479_p4 }
  0xc7   : > { %1489 = shalt.err (!%p1486_p10)
}
  0xc8   : > { %1185 = dma.hbm_to_vmem [thread:$0]  (!%p1803_p6), %s2220_s8, 1024, %s385_s28, [#allocation15], %s2248_s20, %s2248_s20, %s1690_s30  }
  0xc9   : > { %s1695_s26 = smov [#allocation17]   ;;  %s1490_s1 = scalar_lea.hbm %s2221_s9, 16 }
  0xca   : > { %s398_s22 = sshll.u32 %s1695_s26, 4  ;;  %p1491_p1 = scmp.ne.s32.totalorder %s2221_s9, %s1490_s1  ;;  %s399_s22 = int_to_ptr.vmem [resolvable:$true] %s398_s22 }
  0xcb   : > { %p1497_p12 = scmp.lt.u32.totalorder %s1490_s1, %s2221_s9 }
  0xcc   : > { %p1493_p3 = pnand %p1491_p1, %p1819_p8 }
  0xce   : > { %p1494_p11 = pneg %p1493_p3 }
  0xd0   : > { %p1499_p13 = pnand %p1497_p12, %p1494_p11 }
  0xd2   : > { %1502 = shalt.err (!%p1499_p13)
}
  0xd3   : > { %s1503_s30 = scalar_lea.vmem %s399_s22, 16  ;;  %s1510_s28 = scalar_lea.vmem %s399_s22, 32 }
  0xd4   : > { %p1504_p0 = scmp.ne.s32.totalorder %s399_s22, %s1503_s30  ;;  %p1511_p7 = scmp.lt.s32.totalorder %s399_s22, %s399_s22 }
  0xd5   : > { %p1512_p9 = scmp.lt.s32.totalorder %s1510_s28, %s1503_s30 }
  0xd6   : > { %p1506_p2 = pnand %p1504_p0, %p1819_p8 }
  0xd7   : > { %p1513_p5 = por %p1512_p9, %p1511_p7 }
  0xd8   : > { %p1507_p4 = pneg %p1506_p2 }
  0xda   : > { %p1514_p10 = pnand %p1513_p5, %p1507_p4 }
  0xdc   : > { %1517 = shalt.err (!%p1514_p10)
}
  0xdd   : > { %1188 = dma.hbm_to_vmem [thread:$0]  (!%p1803_p6), %s2221_s9, 16, %s399_s22, [#allocation18]  }
  0xde   : > { %s1025_s21 = sadd.s32 4294967294, %s1684_s18   ;;  %s45_s12 = sadd.s32 1, %s1680_s17 }
  0xdf   : > { %p47_p8 = scmp.ge.s32.totalorder %s45_s12, 2  ;;  %s54_s23 = sadd.s32 1, %s1672_s15 }
  0xe0   : > { %p61_p1 = scmp.ne.s32.totalorder %s1672_s15, %s1668_s14  ;;  %p62_p3 = scmp.eq.s32.totalorder %s1684_s18, 0 }
  0xe1   : > { %s2283_s12 = smov (%p47_p8, %s45_s12), 0  ;;  %p67_p12 = scmp.ne.s32.totalorder %s1668_s14, %s1664_s13 }
  0xe2   : > { %p1990_p11 = por %p62_p3, %p61_p1  ;;  %s49_s22 = ssub.s32 %s1680_s17, %s2283_s12 }
  0xe3   : > { %p289_p6 = scmp.eq.s32.totalorder %s1787_s19, 1  ;;  %p52_p13 = scmp.eq.s32.totalorder %s49_s22, 0 }
  0xe4   : > { %p2250_p0 = scmp.eq.s32.totalorder %s1787_s19, 0  ;;  %p295_p7 = scmp.eq.s32.totalorder %s1025_s21, 1 }
  0xe5   : > { %p2005_p4 = por %p289_p6, %p61_p1  ;;  %p1208_p5 = scmp.lt.s32.totalorder %s1684_s18, 2 }
  0xe6   : > { %p2001_p2 = por %p2250_p0, %p67_p12  ;;  %p2012_p9 = por %p295_p7, %p67_p12 }
  0xe7   : > { %s2252_s25 = scalar_select %p2005_p4, 1, 0 }
  0xe8   : > { %s2251_s10 = scalar_select %p2001_p2, 1, 0 }
  0xe9   : > { %s2010_s1 = scalar_select %p52_p13, %s1672_s15, %s54_s23  }
  0xea   : > { %s2253_s27 = scalar_select %p2012_p9, 1, 0 }
  0xeb   : > { %s2018_s11 = sand.u32 1, %s1672_s15   ;;  %s1037_s16 = sshll.u32 %s1680_s17, 7 }
  0xec   : > { %s1036_s24 = sshll.u32 %s2018_s11, 3  ;;  %s2254_s0 = sld [smem:[#allocation30_spill]] }
  0xed   : > { %s413_s29 = scalar_lea.vmem [#allocation2], %s1036_s24  ;;  %p2029_p10 = pnand %p1208_p5, %p1990_p11 }
  0xee   : > { %s421_s21 = sshll.u32 %s413_s29, 4  ;;  %s410_s2 = scalar_lea.sflag [#allocation3], %s2018_s11  ;;  %s2033_s21 = int_to_ptr.vmem [resolvable:$true] %s421_s21 }
  0xef   : > { %p1520_p1 = pneg %p2029_p10 }
  0xf2   : > { %s2025_s20 = scalar_lea.hbm %s2254_s0, %s1037_s16  ;;  %s1523_s24 = scalar_lea.hbm %s2254_s0, 256 }
  0xf3   : > { %s1518_s30 = scalar_lea.hbm %s2025_s20, 128  ;;  %p1524_p11 = scmp.lt.u32.totalorder %s2025_s20, %s2254_s0 }
  0xf4   : > { %p1519_p8 = scmp.ne.s32.totalorder %s2025_s20, %s1518_s30  ;;  %p1525_p6 = scmp.lt.u32.totalorder %s1523_s24, %s1518_s30 }
  0xf5   : > { %p1527_p0 = scmp.lt.u32.totalorder %s1518_s30, %s2025_s20 }
  0xf6   : > { %p1521_p3 = pnand %p1520_p1, %p1519_p8  ;;  %p1526_p13 = por %p1525_p6, %p1524_p11 }
  0xf8   : > { %p1522_p12 = pneg %p1521_p3  ;;  %p1528_p7 = por %p1527_p0, %p1526_p13 }
  0xfa   : > { %p1529_p5 = pnand %p1528_p7, %p1522_p12 }
  0xfc   : > { %1532 = shalt.err (!%p1529_p5)
}
  0xfd   : > { %s1533_s22 = scalar_lea.vmem %s2033_s21, 128  ;;  %s1696_s16 = smov [#allocation2]  }
  0xfe   : > { %p1534_p8 = scmp.ne.s32.totalorder %s2033_s21, %s1533_s22  ;;  %s1538_s26 = sshll.u32 %s1696_s16, 4  ;;  %s1539_s26 = int_to_ptr.vmem [resolvable:$false] %s1538_s26 }
  0xff   : > { %s1540_s28 = scalar_lea.vmem %s1539_s26, 256  ;;  %p1541_p4 = scmp.lt.s32.totalorder %s2033_s21, %s1539_s26 }
 0x100   : > { %p1536_p3 = pnand %p1534_p8, %p1520_p1  ;;  %p1542_p11 = scmp.lt.s32.totalorder %s1540_s28, %s1533_s22 }
 0x102   : > { %p1537_p9 = pneg %p1536_p3  ;;  %p1543_p6 = por %p1542_p11, %p1541_p4 }
 0x104   : > { %p1544_p13 = pnand %p1543_p6, %p1537_p9 }
 0x106   : > { %1547 = shalt.err (!%p1544_p13)
}
 0x107   : > { %1192 = dma.hbm_to_vmem [thread:$0]  (!%p2029_p10), %s2025_s20, 128, %s2033_s21, %s410_s2  }
 0x108   : > { %s1038_s30 = sshll.u32 %s2018_s11, 2  ;;  %s1039_s24 = sshll.u32 %s1680_s17, 6 }
 0x109   : > { %s2256_s0 = sld [smem:[#allocation31_spill]]  ;;  %s432_s22 = scalar_lea.vmem [#allocation5], %s1038_s30 }
 0x10a   : > { %s440_s26 = sshll.u32 %s432_s22, 4  ;;  %s2257_s28 = sand.u32 1, %s1684_s18   ;;  %s441_s26 = int_to_ptr.vmem [resolvable:$true] %s440_s26 }
 0x10b   : > { %s429_s4 = scalar_lea.sflag [#allocation6], %s2257_s28 }
 0x10f   : > { %s2067_s3 = scalar_lea.hbm %s2256_s0, %s1039_s24  ;;  %s1553_s20 = scalar_lea.hbm %s2256_s0, 128 }
 0x110   : > { %s1548_s5 = scalar_lea.hbm %s2067_s3, 64  ;;  %p1554_p0 = scmp.lt.u32.totalorder %s2067_s3, %s2256_s0 }
 0x111   : > { %p1549_p4 = scmp.ne.s32.totalorder %s2067_s3, %s1548_s5  ;;  %p1555_p7 = scmp.lt.u32.totalorder %s1553_s20, %s1548_s5 }
 0x112   : > { %p1557_p8 = scmp.lt.u32.totalorder %s1548_s5, %s2067_s3 }
 0x113   : > { %p1551_p9 = pnand %p1549_p4, %p1520_p1  ;;  %p1556_p5 = por %p1555_p7, %p1554_p0 }
 0x115   : > { %p1552_p12 = pneg %p1551_p9  ;;  %p1558_p3 = por %p1557_p8, %p1556_p5 }
 0x117   : > { %p1559_p11 = pnand %p1558_p3, %p1552_p12 }
 0x119   : > { %1562 = shalt.err (!%p1559_p11)
}
 0x11a   : > { %s1563_s30 = scalar_lea.vmem %s441_s26, 64  ;;  %s1697_s29 = smov [#allocation5]  }
 0x11b   : > { %p1564_p6 = scmp.ne.s32.totalorder %s441_s26, %s1563_s30  ;;  %s1568_s16 = sshll.u32 %s1697_s29, 4  ;;  %s1569_s16 = int_to_ptr.vmem [resolvable:$false] %s1568_s16 }
 0x11c   : > { %s1570_s22 = scalar_lea.vmem %s1569_s16, 128  ;;  %p1571_p9 = scmp.lt.s32.totalorder %s441_s26, %s1569_s16 }
 0x11d   : > { %p1566_p13 = pnand %p1564_p6, %p1520_p1  ;;  %p1572_p2 = scmp.lt.s32.totalorder %s1570_s22, %s1563_s30 }
 0x11f   : > { %p1567_p4 = pneg %p1566_p13  ;;  %p1573_p0 = por %p1572_p2, %p1571_p9 }
 0x121   : > { %p1574_p7 = pnand %p1573_p0, %p1567_p4 }
 0x123   : > { %1577 = shalt.err (!%p1574_p7)
}
 0x124   : > { %1195 = dma.hbm_to_vmem [thread:$0]  (!%p2029_p10), %s2067_s3, 64, %s441_s26, %s429_s4  }
 0x125   : > { %s2258_s5 = sld [smem:[#allocation29_spill]] }
 0x12b   : > { %p2259_p12 = scmp.ne.s32.totalorder %s2258_s5, 0 }
 0x12c   : > { %s2093_s28 = sand.u32 (!%p2259_p12), 1, %s1668_s14   ;;  %p2260_p2 = scmp.ne.s32.totalorder (!%p2259_p12), %s2251_s10, 0 }
 0x12d   : > { %449 = sbr.rel (%p2259_p12) target bundleno = 1340 (0x53c), region = 60  ;;  %s1041_s2 = sshll.u32 (!%p2259_p12), %s2093_s28, 3 }
 0x12e   : > { %s452_s11 = scalar_lea.sflag (!%p2259_p12), [#allocation3], %s2093_s28  ;;  %s2099_s20 = scalar_lea.vmem (!%p2259_p12), [#allocation2], %s1041_s2 }
 0x134   : > { %1631 = dma.done.wait (%p2260_p2), %s452_s11, 128  }
 0x135   : > { %1633 = vsyncadd (%p2260_p2), %s452_s11, 4294967168  ;;  %s460_s3 = sand.u32 1, %s1787_s19   ;;  %s1042_s4 = sshll.u32 %s2093_s28, 2 }
 0x136   : > { %s461_s23 = scalar_lea.sflag [#allocation6], %s460_s3  ;;  %s464_s26 = scalar_lea.vmem [#allocation5], %s1042_s4 }
 0x137   : > { %1635 = dma.done.wait (%p2260_p2), %s461_s23, 64  }
 0x138   : > { %1637 = vsyncadd (%p2260_p2), %s461_s23, 4294967232  ;;  %p2261_p10 = scmp.eq.s32.totalorder %s1787_s19, 0 }
 0x13a   : > { %1639 = dma.done.wait (%p2261_p10), [#allocation6], 256   ;;  %p2262_p1 = pmov %p2261_p10 }
 0x13c   : > { %1641 = vsyncadd (%p2262_p1), [#allocation6], 4294967040  ;;  %p2263_p5 = pmov %p2262_p1 }
 0x13d   : > { %p2264_p8 = pmov %p2262_p1 }
 0x13e   : > { %1643 = dma.done.wait (%p2263_p5), [#allocation9], 32  }
 0x13f   : > { %1645 = vsyncadd (%p2264_p8), [#allocation9], 4294967264  ;;  %p2265_p3 = pmov %p2262_p1 }
 0x140   : > { %p2266_p11 = pmov %p2262_p1 }
 0x141   : > { %1647 = dma.done.wait (%p2265_p3), [#allocation12], 272  }
 0x142   : > { %1649 = vsyncadd (%p2266_p11), [#allocation12], 4294967024  ;;  %p2267_p6 = pmov %p2262_p1 }
 0x143   : > { %p2268_p13 = pmov %p2262_p1 }
 0x144   : > { %1651 = dma.done.wait (%p2267_p6), [#allocation15], 1040  }
 0x145   : > { %1653 = vsyncadd (%p2268_p13), [#allocation15], 4294966256  ;;  %p2269_p4 = pmov %p2262_p1 }
 0x146   : > { %p2270_p9 = pmov %p2262_p1 }
 0x147   : > { %1655 = dma.done.wait (%p2269_p4), [#allocation18], 16  }
 0x148   : > { %1657 = vsyncadd (%p2270_p9), [#allocation18], 4294967280  ;;  %v1698_v0 = vmov 0.0   ;;  %vm1699_vm0 = vmmov 0   ;;  %v1278_v1 = vld [vmem:[#allocation7] sm:$0xff]   ;;  %v1279_v2 = vld [vmem:[#allocation7 + $0x8] sm:$0xff]  }
 0x149   : > { %1090 = vmatprep.subr.bf16.mxu1 %v1698_v0  ;;  %1094 = vmatprep.mubr.msk.bf16.mxu1 %vm1699_vm0, %v1698_v0  ;;  %vm564_vm1 = vcmask 261120   ;;  %v540_v3 = vld [vmem:[%s464_s26] sm:$0xf]  ;;  %v1052_v4 = vld [vmem:[#allocation8] ss:$0 sm:$0xff]  ;;  %v1282_v20 = vld [vmem:[#allocation16] sm:$0xff]  }
 0x14a   : > { %1106 = vmatprep.subr.bf16.mxu0 %v1698_v0  ;;  %1122 = vmatprep.mubr.msk.bf16.mxu0 %vm1699_vm0, %v1698_v0  ;;  %v539_v5 = vld [vmem:[%s2099_s20] sm:$0xff]  ;;  %v1281_v19 = vld [vmem:[#allocation13 + $0x8] sm:$0xff]   ;;  %v1058_v38 = vld [vmem:[#allocation14] ss:$0 sm:$0xff]  ;;  %s2271_s19 = sld [smem:[#allocation28_spill]]  ;;  %s537_s21 = scalar_lea.vmem [#allocation19], %s1041_s2 }
 0x14b   : > { %1091 = vmatpush3.bf16.msra.mxu1 %v1278_v1  ;;  %v1280_v18 = vld [vmem:[#allocation13] sm:$0xff]   ;;  %1107 = vmatpush3.bf16.msra.mxu0 %v1282_v20  ;;  %v1056_v25 = vld [vmem:[#allocation10] ss:$0 sm:$0xff]  ;;  %v1057_v27 = vld [vmem:[#allocation11] ss:$0 sm:$0xff]  ;;  %s844_s24 = sshll.u32 %s537_s21, 4  ;;  %s2164_s24 = int_to_ptr.vmem [resolvable:$true] %s844_s24 }
 0x14c   : > { %1092 = vmatprep.subr.bf16.mxu1 %v1698_v0  ;;  %1108 = vmatprep.subr.bf16.mxu0 %v1698_v0  ;;  %v1283_v31 = vld [vmem:[#allocation16 + $0x8] sm:$0xff]   ;;  %v1284_v32 = vld [vmem:[#allocation16 + $0x10] sm:$0xff]   ;;  %v1285_v33 = vld [vmem:[#allocation16 + $0x18] sm:$0xff]   ;;  %s2272_s16 = sld [smem:[#allocation36_spill]]  ;;  %s830_s2 = scalar_lea.sflag [#allocation4], %s2093_s28 }
 0x14d   : > { %v1286_v34 = vld [vmem:[#allocation16 + $0x20] sm:$0xff]   ;;  %v1287_v35 = vld [vmem:[#allocation16 + $0x28] sm:$0xff]   ;;  %v1288_v36 = vld [vmem:[#allocation16 + $0x30] sm:$0xff]   ;;  %s1578_s11 = scalar_lea.vmem %s2164_s24, 128  ;;  %p2274_p7 = scmp.ne.s32.totalorder %s2252_s25, 0 }
 0x14e   : > { %v1289_v37 = vld [vmem:[#allocation16 + $0x38] sm:$0xff]   ;;  %v1062_v54 = vld [vmem:[#allocation17] ss:$0 sm:$0xff]  ;;  %p1579_p0 = scmp.ne.s32.totalorder %s2164_s24, %s1578_s11  ;;  %s1700_s20 = smov [#allocation19]  }
 0x14f   : > { %1093 = vmatpush3.bf16.msra.mxu1 %v1279_v2  ;;  %1109 = vmatpush3.bf16.msra.mxu0 %v1283_v31  ;;  %s1582_s3 = sshll.u32 %s1700_s20, 4  ;;  %s1583_s3 = int_to_ptr.vmem [resolvable:$false] %s1582_s3 }
 0x150   : > { %1098 = vmatprep.subr.bf16.mxu1 %v1698_v0  ;;  %1110 = vmatprep.subr.bf16.mxu0 %v1698_v0  ;;  %s1072_s10 = sshll.u32 %s2271_s19, 7  ;;  %p1580_p12 = pnand %p1579_p0, %p2274_p7 }
 0x151   : > { %s1584_s4 = scalar_lea.vmem %s1583_s3, 256  ;;  %p1585_p10 = scmp.lt.s32.totalorder %s2164_s24, %s1583_s3 }
 0x152   : > { %1095 = vmatmul.mubr.msk.bf16.vlgmr.msra.gmra.mrb[0].mxu1 %vm564_vm1, %v540_v3  ;;  %s2273_s22 = smov %s2272_s16  ;;  %s2162_s5 = scalar_lea.hbm %s2272_s16, %s1072_s10 }
 0x153   : > { %1102 = vmatprep.mubr.msk.bf16.mxu1 %vm1699_vm0, %v1698_v0  ;;  %1099 = vmatpush3.bf16.msra.mxu1 %v1280_v18  ;;  %p1581_p2 = pneg %p1580_p12  ;;  %p1586_p1 = scmp.lt.s32.totalorder %s1584_s4, %s1578_s11 }
 0x154   : > { %1100 = vmatprep.subr.bf16.mxu1 %v1698_v0  ;;  %1111 = vmatpush3.bf16.msra.mxu0 %v1284_v32 }
 0x155   : > { %1112 = vmatprep.subr.bf16.mxu0 %v1698_v0  ;;  %p1587_p5 = por %p1586_p1, %p1585_p10 }
 0x157   : > { %1101 = vmatpush3.bf16.msra.mxu1 %v1281_v19  ;;  %p1588_p8 = pnand %p1587_p5, %p1581_p2 }
 0x158   : > { %1113 = vmatpush3.bf16.msra.mxu0 %v1285_v33 }
 0x159   : > { %1114 = vmatprep.subr.bf16.mxu0 %v1698_v0 }
 0x15c   : > { %1115 = vmatpush3.bf16.msra.mxu0 %v1286_v34 }
 0x15d   : > { %1116 = vmatprep.subr.bf16.mxu0 %v1698_v0 }
 0x160   : > { %1117 = vmatpush3.bf16.msra.mxu0 %v1287_v35 }
 0x161   : > { %1118 = vmatprep.subr.bf16.mxu0 %v1698_v0 }
 0x164   : > { %1119 = vmatpush3.bf16.msra.mxu0 %v1288_v36 }
 0x165   : > { %1120 = vmatprep.subr.bf16.mxu0 %v1698_v0 }
 0x168   : > { %1121 = vmatpush3.bf16.msra.mxu0 %v1289_v37 }
 0x225   : > { %v602_v6 = vpop.f32.mrb[0].mxu1 }
 0x226   : > { %v603_v7 = vadd.f32 %v1052_v4, %v602_v6  ;;  %v1096_v8 = vpop.f32.mrb[1].mxu1 }
 0x227   : > { %v605_v9 = vpop.f32.mrb[2].mxu1 }
 0x228   : > { %v2140_v10 = vadd.f32 %v603_v7, %v539_v5  ;;  %v1097_v11 = vpop.f32.mrb[3].mxu1 }
 0x22a   : > { %v611_v12 = vsel %vm564_vm1, %v2140_v10, 0.0 }
 0x22b   : > { %612 = vadd.xlane.f32.xlu0 %v611_v12 }
 0x2b8   : > { %v613_v13 = vpop.xlane.xlu0 %612 }
 0x2b9   : > { %v615_v14 = vmul.f32 0.03125, %v613_v13 }
 0x2bb   : > { %v616_v15 = vsub.f32 %v2140_v10, %v615_v14 }
 0x2bd   : > { %v617_v16 = vmul.f32 %v616_v15, %v616_v15 }
 0x2bf   : > { %v618_v17 = vsel %vm564_vm1, %v617_v16, 0.0 }
 0x2c0   : > { %619 = vadd.xlane.f32.xlu0 %v618_v17 }
 0x34d   : > { %v620_v21 = vpop.xlane.xlu0 %619 }
 0x34e   : > { %v621_v22 = vmul.f32 0.03125, %v620_v21 }
 0x350   : > { %v622_v23 = vadd.f32 1e-05, %v621_v22 }
 0x352   : > { %1290 = vrsqrt.f32 %v622_v23 }
 0x35c   : > { %v1291_v24 = vpop.eup %1290 }
 0x35d   : > { %v624_v26 = vmul.f32 %v1291_v24, %v616_v15 }
 0x35f   : > { %v631_v28 = vmul.f32 %v1056_v25, %v624_v26 }
 0x361   : > { %v638_v29 = vadd.f32 %v1057_v27, %v631_v28 }
 0x363   : > { %v639_v30 = vpack.c.bf16 %v638_v29, %v638_v29 }
 0x365   : > { %1103 = vmatmul.mubr.msk.bf16.vlgmr.msra.gmra.mrb[4].mxu1 %vm564_vm1, %v639_v30 }
 0x438   : > { %v700_v39 = vpop.f32.mrb[4].mxu1 }
 0x439   : > { %v701_v40 = vadd.f32 %v1058_v38, %v700_v39  ;;  %v1104_v41 = vpop.f32.mrb[5].mxu1 }
 0x43a   : > { %v703_v42 = vpop.f32.mrb[6].mxu1 }
 0x43b   : > { %v707_v43 = vmul.f32 0.044715, %v701_v40  ;;  %v1105_v44 = vpop.f32.mrb[7].mxu1  ;;  %v706_v50 = vmul.f32 0.5, %v701_v40 }
 0x43d   : > { %v708_v45 = vmul.f32 %v707_v43, %v701_v40 }
 0x43f   : > { %v709_v46 = vmul.f32 %v708_v45, %v701_v40 }
 0x441   : > { %v710_v47 = vadd.f32 %v709_v46, %v701_v40 }
 0x443   : > { %v711_v48 = vmul.f32 0.7978846, %v710_v47 }
 0x445   : > { %1292 = vtanh.f32 %v711_v48 }
 0x44f   : > { %v1293_v49 = vpop.eup %1292 }
 0x450   : > { %v713_v51 = vadd.f32 1.0, %v1293_v49 }
 0x452   : > { %v714_v52 = vmul.f32 %v713_v51, %v706_v50 }
 0x454   : > { %v715_v53 = vpack.c.bf16 %v714_v52, %v714_v52 }
 0x456   : > { %1123 = vmatmul.mubr.bf16.vlgmr.msra.gmra.mrb[0].mxu0 %v715_v53 }
 0x529   : > { %v821_v55 = vpop.f32.mrb[0].mxu0 }
 0x52a   : > { %v822_v56 = vadd.f32 %v1062_v54, %v821_v55  ;;  %v1124_v57 = vpop.f32.mrb[1].mxu0 }
 0x52b   : > { %v824_v58 = vpop.f32.mrb[2].mxu0 }
 0x52c   : > { %v827_v59 = vadd.f32 %v822_v56, %v2140_v10  ;;  %v1125_v60 = vpop.f32.mrb[3].mxu0 }
 0x52e   : > { %828 = vst.msk [vmem:[%s537_s21] sm:$0xff] %vm564_vm1, %v827_v59 }
 0x52f   : > { %1591 = shalt.err (!%p1588_p8)
}
 0x530   : > { %s1592_s28 = scalar_lea.hbm %s2162_s5, 128  ;;  %s1596_s19 = scalar_lea.hbm %s2273_s22, 256 }
 0x531   : > { %p1593_p3 = scmp.ne.s32.totalorder %s2162_s5, %s1592_s28  ;;  %p1597_p13 = scmp.lt.u32.totalorder %s2162_s5, %s2273_s22 }
 0x532   : > { %p1598_p4 = scmp.lt.u32.totalorder %s1596_s19, %s1592_s28  ;;  %p1600_p0 = scmp.lt.u32.totalorder %s1592_s28, %s2162_s5 }
 0x533   : > { %p1594_p11 = pnand %p1593_p3, %p2274_p7 }
 0x534   : > { %p1599_p9 = por %p1598_p4, %p1597_p13 }
 0x535   : > { %p1595_p6 = pneg %p1594_p11 }
 0x536   : > { %p1601_p12 = por %p1600_p0, %p1599_p9 }
 0x538   : > { %p1602_p2 = pnand %p1601_p12, %p1595_p6 }
 0x53a   : > { %1605 = shalt.err (!%p1602_p2)
}
 0x53b   : > { %1162 = dma.vmem_to_hbm [thread:$0]  (%p2274_p7), %s2164_s24, 128, %s2162_s5, %s830_s2  }
 0x53c PF: > { %s856_s30 = sand.u32 1, %s1664_s13   ;;  %p2275_p10 = scmp.ne.s32.totalorder %s2253_s27, 0 }
 0x53d   : > { %p2276_p1 = scmp.ge.s32.totalorder %s1684_s18, 2  ;;  %s857_s29 = scalar_lea.sflag [#allocation4], %s856_s30 }
 0x53f   : > { %p1197_p5 = pnand %p2276_p1, %p2275_p10 }
 0x541   : > { %1659 = dma.done.wait (!%p1197_p5), %s857_s29, 128  }
 0x542   : > { %1661 = vsyncadd (!%p1197_p5), %s857_s29, 4294967168  ;;  %s33_s18 = sadd.s32 1, %s1684_s18   ;;  %s2277_s13 = smov %s1668_s14 }
 0x543   : > { %p30_p8 = scmp.ge.s32.totalorder %s33_s18, 4   ;;  %s2278_s14 = smov %s1672_s15 }
 0x544   : > { %s2279_s15 = smov %s2010_s1  ;;  %s2280_s16 = smov %s1680_s17 }
 0x545   : > { %s2281_s17 = smov %s2283_s12  ;;  %32 = sbr.rel (!%p30_p8) target bundleno = 20 (0x14), region = 150 }
 0x54c   :  { %862 = vsyncpa [#allocation3], 1 }
 0x54d   :  { %864 = vsyncpa [#allocation3 + $0x1], 1 }
 0x54e   :  { %865 = vsyncpa [#allocation6], 1 }
 0x54f   :  { %867 = vsyncpa [#allocation6 + $0x1], 1 }
 0x550   :  { %868 = vsyncpa [#allocation9], 1 }
 0x551   :  { %869 = vsyncpa [#allocation12], 1 }
 0x552   :  { %870 = vsyncpa [#allocation15], 1 }
 0x553   :  { %871 = vsyncpa [#allocation18], 1 }
 0x554   :  { %872 = vsyncpa [#allocation4], 1 }
 0x555   :  { %874 = vsyncpa [#allocation4 + $0x1], 1 }

// kernel: gpt_forward.8
= control target key start
LH: loop header
LB: loop body
LE: loop exit
PB: predicated region body
PF: predicated region fallthrough
CT: control target
= control target key end

     0   :  { %s2448_s0 = inlined_call_operand.hbm [shape: bf16[2,4,8,8], index: 0, kind: input, shape index: {}]   ;;  %s2449_s1 = inlined_call_operand.hbm [shape: bf16[2,4,8,8], index: 1, kind: input, shape index: {}]   ;;  %s2450_s2 = inlined_call_operand.hbm [shape: bf16[2,4,8,8], index: 2, kind: input, shape index: {}]   ;;  %s2451_s3 = inlined_call_operand.hbm [shape: bf16[2,8,32], index: 3, kind: output, shape index: {}]  }
   0x1   :  { %2461 = sst [smem:[#allocation18_spill]] %s2449_s1 }
   0x2   :  { %8 = vsyncpa [#allocation6], 0 }
   0x3   :  { %10 = vsyncpa [#allocation6 + $0x1], 0 }
   0x4   :  { %11 = vsyncpa [#allocation9], 0 }
   0x5   :  { %13 = vsyncpa [#allocation9 + $0x1], 0 }
   0x6   :  { %14 = vsyncpa [#allocation7], 0 }
   0x7   :  { %16 = vsyncpa [#allocation7 + $0x1], 0  ;;  %s2040_s12 = smov 0   ;;  %s2042_s13 = smov 0  }
   0x8   :  { %s2044_s14 = smov 0   ;;  %s2046_s15 = smov 0  }
   0x9   :  { %s2048_s16 = smov 0   ;;  %s2050_s17 = smov 0  }
   0xa LB: > { %2462 = sst [smem:[#allocation15_spill]] %s2001_s16  ;;  %s2071_s18 = sadd.s32 4294967295, %s2005_s17   ;;  %s2005_s17 = sphi %s2050_s17, %s22_s17   ;;  %s2001_s16 = sphi %s2048_s16, %s2485_s16   ;;  %s1997_s15 = sphi %s2046_s15, %s2484_s15   ;;  %s1993_s14 = sphi %s2044_s14, %s2488_s14   ;;  %s1989_s13 = sphi %s2042_s13, %s2487_s13   ;;  %s1985_s12 = sphi %s2040_s12, %s2486_s12  }
   0xb   : > { %s1612_s19 = sadd.s32 4294967294, %s2005_s17   ;;  %s41_s20 = sadd.s32 1, %s2001_s16 }
   0xc   : > { %s50_s21 = sadd.s32 1, %s1993_s14  ;;  %p43_p0 = scmp.ge.s32.totalorder %s41_s20, 2 }
   0xd   : > { %p57_p1 = scmp.ne.s32.totalorder %s1993_s14, %s1989_s13  ;;  %p58_p2 = scmp.eq.s32.totalorder %s2005_s17, 0 }
   0xe   : > { %p63_p3 = scmp.ne.s32.totalorder %s1989_s13, %s1985_s12  ;;  %s2490_s20 = smov (%p43_p0, %s41_s20), 0 }
   0xf   : > { %2463 = sst [smem:[#allocation16_spill]] %s2490_s20  ;;  %p2083_p4 = por %p58_p2, %p57_p1 }
  0x10   : > { %p64_p5 = scmp.eq.s32.totalorder %s2071_s18, 0  ;;  %s45_s23 = ssub.s32 %s2001_s16, %s2490_s20 }
  0x11   : > { %p153_p6 = scmp.eq.s32.totalorder %s2071_s18, 1  ;;  %p48_p7 = scmp.eq.s32.totalorder %s45_s23, 0 }
  0x12   : > { %p2091_p8 = por %p64_p5, %p63_p3  ;;  %p159_p10 = scmp.eq.s32.totalorder %s1612_s19, 1 }
  0x13   : > { %p2095_p9 = por %p153_p6, %p57_p1  ;;  %p1744_p13 = scmp.lt.s32.totalorder %s2005_s17, 2 }
  0x14   : > { %s2465_s24 = scalar_select %p2091_p8, 1, 0 }
  0x15   : > { %s2466_s25 = scalar_select %p2095_p9, 1, 0 }
  0x16   : > { %s2100_s26 = scalar_select %p48_p7, %s1993_s14, %s50_s21  }
  0x17   : > { %p2102_p11 = por %p159_p10, %p63_p3  ;;  %s2454_s28 = sand.u32 1, %s1993_s14  }
  0x18   : > { %2467 = sst [smem:[#allocation17_spill]] %s2100_s26  ;;  %s2111_s29 = sshll.u32 %s2454_s28, 4 }
  0x19   : > { %s2468_s27 = scalar_select %p2102_p11, 1, 0 }
  0x1a   : > { %s2114_s30 = sshll.u32 %s2001_s16, 8  ;;  %p2118_p0 = pnand %p1744_p13, %p2083_p4 }
  0x1b   : > { %s201_s5 = sand.u32 1, %s2005_s17   ;;  %s2470_s1 = sld [smem:[#allocation18_spill]] }
  0x1c   : > { %s205_s9 = scalar_lea.vmem [#allocation8], %s2111_s29  ;;  %s2134_s11 = scalar_lea.sflag [#allocation9], %s201_s5 }
  0x1d   : > { %s215_s10 = sshll.u32 %s205_s9, 4  ;;  %p2140_p4 = pneg %p2118_p0  ;;  %s2131_s10 = int_to_ptr.vmem [resolvable:$true] %s215_s10 }
  0x21   : > { %s2127_s8 = scalar_lea.hbm %s2470_s1, %s2114_s30  ;;  %s1834_s6 = scalar_lea.hbm %s2470_s1, 512 }
  0x22   : > { %s1829_s19 = scalar_lea.hbm %s2127_s8, 256  ;;  %p1835_p7 = scmp.lt.u32.totalorder %s2127_s8, %s2470_s1 }
  0x23   : > { %p1830_p3 = scmp.ne.s32.totalorder %s2127_s8, %s1829_s19  ;;  %p1836_p10 = scmp.lt.u32.totalorder %s1834_s6, %s1829_s19 }
  0x24   : > { %p1838_p12 = scmp.lt.u32.totalorder %s1829_s19, %s2127_s8 }
  0x25   : > { %p1832_p5 = pnand %p2140_p4, %p1830_p3  ;;  %p1837_p13 = por %p1836_p10, %p1835_p7 }
  0x27   : > { %p1833_p6 = pneg %p1832_p5  ;;  %p1839_p1 = por %p1838_p12, %p1837_p13 }
  0x29   : > { %p1840_p2 = pnand %p1839_p1, %p1833_p6 }
  0x2b   : > { %1843 = shalt.err (!%p1840_p2)
}
  0x2c   : > { %s1844_s5 = scalar_lea.vmem %s2131_s10, 256  ;;  %s2007_s22 = smov [#allocation8]  }
  0x2d   : > { %p1845_p3 = scmp.ne.s32.totalorder %s2131_s10, %s1844_s5  ;;  %s1849_s23 = sshll.u32 %s2007_s22, 4  ;;  %s1850_s23 = int_to_ptr.vmem [resolvable:$false] %s1849_s23 }
  0x2e   : > { %s1851_s7 = scalar_lea.vmem %s1850_s23, 512  ;;  %p1852_p9 = scmp.lt.s32.totalorder %s2131_s10, %s1850_s23 }
  0x2f   : > { %p1847_p5 = pnand %p1845_p3, %p2140_p4  ;;  %p1853_p8 = scmp.lt.s32.totalorder %s1851_s7, %s1844_s5 }
  0x31   : > { %p1848_p11 = pneg %p1847_p5  ;;  %p1854_p7 = por %p1853_p8, %p1852_p9 }
  0x33   : > { %p1855_p10 = pnand %p1854_p7, %p1848_p11 }
  0x35   : > { %1858 = shalt.err (!%p1855_p10)
}
  0x36   : > { %s2455_s19 = smov 64   ;;  %s2457_s6 = smov 4  }
  0x37   : > { %1736 = dma.hbm_to_vmem [thread:$0]  (!%p2118_p0), %s2127_s8, 256, %s2131_s10, %s2134_s11, %s2455_s19, %s2455_s19, %s2457_s6  }
  0x38   : > { %p2472_p8 = scmp.lt.s32.totalorder %s2005_s17, 3  ;;  %p2473_p9 = scmp.ge.s32.totalorder %s2005_s17, 1 }
  0x39   : > { %s2179_s23 = scalar_lea.hbm %s2448_s0, %s2114_s30  ;;  %s183_s7 = scalar_lea.vmem [#allocation5], %s2111_s29 }
  0x3a   : > { %p2171_p11 = pnand %p2473_p9, %p2472_p8  ;;  %s191_s28 = sshll.u32 %s183_s7, 4  ;;  %s2182_s28 = int_to_ptr.vmem [resolvable:$true] %s191_s28 }
  0x3b   : > { %s2188_s19 = scalar_lea.hbm %s2450_s2, %s2114_s30  ;;  %s2475_s6 = sand.u32 1, %s1993_s14  }
  0x3c   : > { %s2474_s9 = scalar_select %p2171_p11, 1, 0 }
  0x3d   : > { %s2192_s1 = scalar_lea.sflag [#allocation6], %s2475_s6  ;;  %s1859_s20 = scalar_lea.hbm %s2179_s23, 256 }
  0x3e   : > { %p1860_p12 = scmp.ne.s32.totalorder %s2179_s23, %s1859_s20  ;;  %s1864_s16 = scalar_lea.hbm %s2448_s0, 512 }
  0x3f   : > { %p1865_p6 = scmp.lt.u32.totalorder %s2179_s23, %s2448_s0  ;;  %p1866_p13 = scmp.lt.u32.totalorder %s1864_s16, %s1859_s20 }
  0x40   : > { %p1862_p1 = pnand %p1860_p12, %p2140_p4  ;;  %p1868_p5 = scmp.lt.u32.totalorder %s1859_s20, %s2179_s23 }
  0x41   : > { %p1867_p3 = por %p1866_p13, %p1865_p6 }
  0x42   : > { %p1863_p2 = pneg %p1862_p1 }
  0x43   : > { %p1869_p7 = por %p1868_p5, %p1867_p3 }
  0x45   : > { %p1870_p10 = pnand %p1869_p7, %p1863_p2 }
  0x47   : > { %1873 = shalt.err (!%p1870_p10)
}
  0x48   : > { %s1874_s30 = scalar_lea.vmem %s2182_s28, 256  ;;  %s2010_s6 = smov [#allocation5]  }
  0x49   : > { %p1875_p8 = scmp.ne.s32.totalorder %s2182_s28, %s1874_s30  ;;  %s1879_s8 = sshll.u32 %s2010_s6, 4  ;;  %s1880_s8 = int_to_ptr.vmem [resolvable:$false] %s1879_s8 }
  0x4a   : > { %s1881_s26 = scalar_lea.vmem %s1880_s8, 512  ;;  %p1882_p1 = scmp.lt.s32.totalorder %s2182_s28, %s1880_s8 }
  0x4b   : > { %p1877_p9 = pnand %p1875_p8, %p2140_p4  ;;  %p1883_p11 = scmp.lt.s32.totalorder %s1881_s26, %s1874_s30 }
  0x4d   : > { %p1878_p12 = pneg %p1877_p9  ;;  %p1884_p6 = por %p1883_p11, %p1882_p1 }
  0x4f   : > { %p1885_p13 = pnand %p1884_p6, %p1878_p12 }
  0x51   : > { %1888 = shalt.err (!%p1885_p13)
}
  0x52   : > { %s2476_s16 = smov 4   ;;  %s2477_s20 = smov 64  }
  0x53   : > { %1733 = dma.hbm_to_vmem [thread:$0]  (!%p2118_p0), %s2179_s23, 256, %s2182_s28, %s2192_s1, %s2477_s20, %s2477_s20, %s2476_s16  }
  0x54   : > { %s229_s10 = scalar_lea.vmem [#allocation10], %s2111_s29  ;;  %s1889_s22 = scalar_lea.hbm %s2188_s19, 256 }
  0x55   : > { %s239_s5 = sshll.u32 %s229_s10, 4  ;;  %p1890_p11 = scmp.ne.s32.totalorder %s2188_s19, %s1889_s22  ;;  %s2220_s5 = int_to_ptr.vmem [resolvable:$true] %s239_s5 }
  0x56   : > { %s1894_s6 = scalar_lea.hbm %s2450_s2, 512  ;;  %p1895_p5 = scmp.lt.u32.totalorder %s2188_s19, %s2450_s2 }
  0x57   : > { %p1892_p2 = pnand %p1890_p11, %p2140_p4  ;;  %p1896_p7 = scmp.lt.u32.totalorder %s1894_s6, %s1889_s22 }
  0x58   : > { %p1898_p8 = scmp.lt.u32.totalorder %s1889_s22, %s2188_s19 }
  0x59   : > { %p1893_p3 = pneg %p1892_p2  ;;  %p1897_p10 = por %p1896_p7, %p1895_p5 }
  0x5b   : > { %p1899_p9 = por %p1898_p8, %p1897_p10 }
  0x5d   : > { %p1900_p12 = pnand %p1899_p9, %p1893_p3 }
  0x5f   : > { %1903 = shalt.err (!%p1900_p12)
}
  0x60   : > { %s1904_s1 = scalar_lea.vmem %s2220_s5, 256  ;;  %s2011_s28 = smov [#allocation10]  }
  0x61   : > { %p1905_p1 = scmp.ne.s32.totalorder %s2220_s5, %s1904_s1  ;;  %s1909_s29 = sshll.u32 %s2011_s28, 4  ;;  %s1910_s29 = int_to_ptr.vmem [resolvable:$false] %s1909_s29 }
  0x62   : > { %s1911_s23 = scalar_lea.vmem %s1910_s29, 512  ;;  %p1912_p11 = scmp.lt.s32.totalorder %s2220_s5, %s1910_s29 }
  0x63   : > { %p1907_p6 = pnand %p1905_p1, %p2140_p4  ;;  %p1913_p2 = scmp.lt.s32.totalorder %s1911_s23, %s1904_s1 }
  0x65   : > { %p1908_p13 = pneg %p1907_p6  ;;  %p1914_p5 = por %p1913_p2, %p1912_p11 }
  0x67   : > { %p1915_p7 = pnand %p1914_p5, %p1908_p13 }
  0x69   : > { %1918 = shalt.err (!%p1915_p7)
}
  0x6a   : > { %1739 = dma.hbm_to_vmem [thread:$0]  (!%p2118_p0), %s2188_s19, 256, %s2220_s5, %s2134_s11, %s2477_s20, %s2477_s20, %s2476_s16  }
  0x6b   : > { %p2478_p4 = scmp.ne.s32.totalorder %s2474_s9, 0 }
  0x6c   : > { %s2250_s21 = sand.u32 (!%p2478_p4), 1, %s1989_s13   ;;  %p2479_p3 = scmp.ne.s32.totalorder (!%p2478_p4), %s2465_s24, 0 }
  0x6d   : > { %251 = sbr.rel (%p2478_p4) target bundleno = 1070 (0x42e), region = 32  ;;  %s2253_s10 = sshll.u32 (!%p2478_p4), %s2250_s21, 4 }
  0x6e   : > { %s254_s4 = scalar_lea.sflag (!%p2478_p4), [#allocation6], %s2250_s21  ;;  %s2257_s22 = scalar_lea.vmem (!%p2478_p4), [#allocation5], %s2253_s10 }
  0x74   : > { %1972 = dma.done.wait (%p2479_p3), %s254_s4, 256  }
  0x75   : > { %1974 = vsyncadd (%p2479_p3), %s254_s4, 4294967040  ;;  %s262_s11 = sand.u32 1, %s2071_s18   ;;  %s266_s9 = scalar_lea.vmem [#allocation8], %s2253_s10 }
  0x76   : > { %s263_s19 = scalar_lea.sflag [#allocation9], %s262_s11 }
  0x77   : > { %1976 = dma.done.wait (%p2479_p3), %s263_s19, 512  }
  0x78   : > { %1978 = vsyncadd (%p2479_p3), %s263_s19, 4294966784  ;;  %vm326_vm0 = vcmask 64512   ;;  %v2012_v0 = vmov 0.0   ;;  %vm2013_vm1 = vmmov 0   ;;  %v866_v1 = vld [vmem:[%s266_s9] sm:$0xf]  ;;  %v1063_v14 = vlaneseq }
  0x79   : > { %1674 = vmatprep.subr.bf16.mxu0 %v2012_v0  ;;  %327 = vst.msk [vmem:[#allocation4] sm:$0xff] %vm326_vm0, %v2012_v0  ;;  %328 = vst.msk [vmem:[#allocation4 + $0x8] sm:$0xff] %vm326_vm0, %v2012_v0  ;;  %1680 = vmatprep.subr.bf16.mxu1 %v2012_v0  ;;  %v867_v2 = vld [vmem:[%s266_s9 + $0x4] sm:$0xf]  ;;  %v879_v3 = vsel %vm326_vm0, %v866_v1, 0  ;;  %vm317_vm2 = vcmask 7168  }
  0x7a   : > { %329 = vst.msk [vmem:[#allocation4 + $0x10] sm:$0xff] %vm326_vm0, %v2012_v0  ;;  %330 = vst.msk [vmem:[#allocation4 + $0x18] sm:$0xff] %vm326_vm0, %v2012_v0  ;;  %1676 = vmatprep.mubr.msk.bf16.mxu0 %vm2013_vm1, %v2012_v0  ;;  %1682 = vmatprep.mubr.msk.bf16.mxu1 %vm2013_vm1, %v2012_v0  ;;  %v925_v4 = vsel %vm326_vm0, %v867_v2, 0  ;;  %v868_v5 = vld [vmem:[%s266_s9 + $0x8] sm:$0xf]  ;;  %v2014_v13 = vmov -inf  }
  0x7b   : > { %1675 = vmatpush3.bf16.xpose.msra.mxu0 %v879_v3  ;;  %1681 = vmatpush3.bf16.xpose.msra.mxu1 %v925_v4  ;;  %v869_v6 = vld [vmem:[%s266_s9 + $0xc] sm:$0xf]  ;;  %v862_v7 = vld [vmem:[%s2257_s22] sm:$0xf]  ;;  %v863_v8 = vld [vmem:[%s2257_s22 + $0x4] sm:$0xf] }
  0x7c   : > { %1686 = vmatprep.subr.bf16.mxu0 %v2012_v0  ;;  %1692 = vmatprep.subr.bf16.mxu1 %v2012_v0  ;;  %v971_v9 = vsel %vm326_vm0, %v868_v5, 0  ;;  %v1017_v10 = vsel %vm326_vm0, %v869_v6, 0  ;;  %v864_v11 = vld [vmem:[%s2257_s22 + $0x8] sm:$0xf]  ;;  %v865_v12 = vld [vmem:[%s2257_s22 + $0xc] sm:$0xf] }
  0x7d   : > { %318 = vst.msk [vmem:[#allocation2] sm:$0xff] %vm317_vm2, %v2014_v13  ;;  %319 = vst.msk [vmem:[#allocation2 + $0x8] sm:$0xff] %vm317_vm2, %v2014_v13  ;;  %v1064_v15 = vshrl.u32 %v1063_v14, 7  ;;  %v1066_v16 = vand.u32 127, %v1063_v14  ;;  %v2015_v45 = vmov 0   ;;  %s275_s18 = scalar_lea.vmem [#allocation10], %s2253_s10 }
  0x7e   : > { %320 = vst.msk [vmem:[#allocation2 + $0x10] sm:$0xff] %vm317_vm2, %v2014_v13  ;;  %321 = vst.msk [vmem:[#allocation2 + $0x18] sm:$0xff] %vm317_vm2, %v2014_v13  ;;  %1803 = vset.pattern.permute.xlu0 %v2015_v45  ;;  %1804 = vset.pattern.permute.xlu1 %v2015_v45  ;;  %v870_v62 = vld [vmem:[%s275_s18] sm:$0xf]  ;;  %vm1202_vm4 = vcmask 1043456   ;;  %s2016_s24 = smov 8  }
  0x7f   : > { %322 = vst.msk [vmem:[#allocation3] sm:$0xff] %vm317_vm2, %v2012_v0  ;;  %323 = vst.msk [vmem:[#allocation3 + $0x8] sm:$0xff] %vm317_vm2, %v2012_v0  ;;  %vm1067_vm3 = vcmp.ge.s32.totalorder %v1064_v15, %v1066_v16  ;;  %v1204_v63 = vsel %vm1202_vm4, %v870_v62, 0  ;;  %v871_v1 = vld [vmem:[%s275_s18 + $0x4] sm:$0xf]  ;;  %s2017_s16 = smov 16  }
  0x80   : > { %324 = vst.msk [vmem:[#allocation3 + $0x10] sm:$0xff] %vm317_vm2, %v2012_v0  ;;  %325 = vst.msk [vmem:[#allocation3 + $0x18] sm:$0xff] %vm317_vm2, %v2012_v0  ;;  %v1250_v2 = vsel %vm1202_vm4, %v871_v1, 0  ;;  %v872_v3 = vld [vmem:[%s275_s18 + $0x8] sm:$0xf]  ;;  %s2018_s20 = smov 24  }
  0x81   : > { %v1296_v4 = vsel %vm1202_vm4, %v872_v3, 0  ;;  %v873_v5 = vld [vmem:[%s275_s18 + $0xc] sm:$0xf]  ;;  %s1628_s5 = sshll.u32 %s2250_s21, 2  ;;  %vm1436_vm5 = vcmask 60416   ;;  %vm1445_vm6 = vcmask 126016  }
  0x82   : > { %1677 = vmatmul.mubr.msk.bf16.vlgmr.msra.gmra.mrb[0].mxu0 %vm326_vm0, %v862_v7  ;;  %1683 = vmatmul.mubr.msk.bf16.vlgmr.msra.gmra.mrb[0].mxu1 %vm326_vm0, %v863_v8  ;;  %v1342_v6 = vsel %vm1202_vm4, %v873_v5, 0  ;;  %v1168_v62 = vld [vmem:[#allocation4 + $0x8] sm:$0xff]  ;;  %s307_s7 = scalar_lea.vmem [#allocation11], %s1628_s5  ;;  %vm1454_vm7 = vcmask 191616   ;;  %s1649_s30 = sshll.u32 %s1997_s15, 6  ;;  %vm1463_vm8 = vcmask 257216  }
  0x83   : > { %1687 = vmatpush3.bf16.xpose.msra.mxu0 %v971_v9  ;;  %1693 = vmatpush3.bf16.xpose.msra.mxu1 %v1017_v10  ;;  %s1480_s6 = sshll.u32 %s307_s7, 4  ;;  %s2399_s1 = scalar_lea.hbm %s2451_s3, %s1649_s30  ;;  %s2401_s6 = int_to_ptr.vmem [resolvable:$true] %s1480_s6 }
  0x84   : > { %1688 = vmatprep.mubr.msk.bf16.mxu0 %vm2013_vm1, %v2012_v0  ;;  %1694 = vmatprep.mubr.msk.bf16.mxu1 %vm2013_vm1, %v2012_v0  ;;  %v2333_v46 = vld [vmem:[#allocation2] sm:$0xff]  ;;  %v2338_v49 = vld [vmem:[#allocation2 + $0x8] sm:$0xff]  ;;  %s1466_s28 = scalar_lea.sflag [#allocation7], %s2250_s21  ;;  %s1919_s29 = scalar_lea.vmem %s2401_s6, 64 }
  0x85   : > { %1698 = vmatprep.subr.bf16.mxu0 %v2012_v0  ;;  %1704 = vmatprep.subr.bf16.mxu1 %v2012_v0  ;;  %v2348_v53 = vld [vmem:[#allocation2 + $0x10] sm:$0xff]  ;;  %v2356_v57 = vld [vmem:[#allocation2 + $0x18] sm:$0xff]  ;;  %p1920_p0 = scmp.ne.s32.totalorder %s2401_s6, %s1919_s29  ;;  %p2480_p10 = scmp.ne.s32.totalorder %s2466_s25, 0 }
  0x86   : > { %s2019_s15 = smov [#allocation11]  }
  0x87   : > { %p1921_p8 = pnand %p1920_p0, %p2480_p10  ;;  %s1923_s23 = sshll.u32 %s2019_s15, 4  ;;  %s1924_s23 = int_to_ptr.vmem [resolvable:$false] %s1923_s23 }
  0x88   : > { %s1925_s10 = scalar_lea.vmem %s1924_s23, 128  ;;  %p1926_p12 = scmp.lt.s32.totalorder %s2401_s6, %s1924_s23 }
  0x89   : > { %p1922_p9 = pneg %p1921_p8  ;;  %p1927_p1 = scmp.lt.s32.totalorder %s1925_s10, %s1919_s29 }
  0x8a   : > { %1689 = vmatmul.mubr.msk.bf16.vlgmr.msra.gmra.mrb[4].mxu0 %vm326_vm0, %v864_v11  ;;  %1695 = vmatmul.mubr.msk.bf16.vlgmr.msra.gmra.mrb[4].mxu1 %vm326_vm0, %v865_v12 }
  0x8b   : > { %1700 = vmatprep.mubr.msk.bf16.mxu0 %vm2013_vm1, %v2012_v0  ;;  %1706 = vmatprep.mubr.msk.bf16.mxu1 %vm2013_vm1, %v2012_v0  ;;  %p1928_p6 = por %p1927_p1, %p1926_p12 }
  0x8c   : > { %1699 = vmatpush3.bf16.msra.mxu0 %v1204_v63  ;;  %1705 = vmatpush3.bf16.msra.mxu1 %v1250_v2 }
  0x8d   : > { %1710 = vmatprep.subr.bf16.mxu0 %v2012_v0  ;;  %1716 = vmatprep.subr.bf16.mxu1 %v2012_v0  ;;  %p1929_p13 = pnand %p1928_p6, %p1922_p9 }
 0x155   : > { %v915_v17 = vpop.f32.mrb[0].mxu0  ;;  %v961_v18 = vpop.f32.mrb[0].mxu1 }
 0x156   : > { %v1059_v19 = vmul.f32 0.35355338, %v915_v17  ;;  %v1678_v20 = vpop.f32.mrb[1].mxu0  ;;  %v1060_v21 = vmul.f32 0.35355338, %v961_v18  ;;  %v1684_v22 = vpop.f32.mrb[1].mxu1 }
 0x157   : > { %v918_v23 = vpop.f32.mrb[2].mxu0  ;;  %v964_v24 = vpop.f32.mrb[2].mxu1 }
 0x158   : > { %v1679_v25 = vpop.f32.mrb[3].mxu0  ;;  %v1685_v26 = vpop.f32.mrb[3].mxu1  ;;  %v2320_v27 = vsel %vm1067_vm3, %v1059_v19, -1e+30  ;;  %v2323_v28 = vsel %vm1067_vm3, %v1060_v21, -1e+30 }
 0x159   : > { %v1078_v29 = vsel %vm326_vm0, %v2320_v27, -inf  ;;  %v1081_v30 = vsel %vm326_vm0, %v2323_v28, -inf }
 0x15a   : > { %1079 = vmax.xlane.f32.xlu0 %v1078_v29 }
 0x15d   : > { %v1007_v31 = vpop.f32.mrb[4].mxu0  ;;  %v1053_v32 = vpop.f32.mrb[4].mxu1 }
 0x15e   : > { %v1061_v33 = vmul.f32 0.35355338, %v1007_v31  ;;  %1082 = vmax.xlane.f32.xlu0 %v1081_v30  ;;  %v1690_v34 = vpop.f32.mrb[5].mxu0  ;;  %v1062_v35 = vmul.f32 0.35355338, %v1053_v32  ;;  %v1696_v36 = vpop.f32.mrb[5].mxu1 }
 0x15f   : > { %v1010_v37 = vpop.f32.mrb[6].mxu0  ;;  %v1056_v38 = vpop.f32.mrb[6].mxu1 }
 0x160   : > { %v1691_v39 = vpop.f32.mrb[7].mxu0  ;;  %v1697_v40 = vpop.f32.mrb[7].mxu1  ;;  %v1072_v41 = vsel %vm1067_vm3, %v1061_v33, -1e+30  ;;  %v1073_v42 = vsel %vm1067_vm3, %v1062_v35, -1e+30 }
 0x161   : > { %v1084_v43 = vsel %vm326_vm0, %v1072_v41, -inf  ;;  %v1087_v44 = vsel %vm326_vm0, %v1073_v42, -inf  ;;  %v1139_v37 = vld [vmem:[#allocation3 + $0x8] sm:$0xff]  ;;  %v1140_v40 = vld [vmem:[#allocation3 + $0x10] sm:$0xff] }
 0x162   : > { %1085 = vmax.xlane.f32.xlu1 %v1084_v43 }
 0x166   : > { %1088 = vmax.xlane.f32.xlu1 %v1087_v44  ;;  %v1141_v44 = vld [vmem:[#allocation3 + $0x18] sm:$0xff] }
 0x1e7   : > { %v1080_v47 = vpop.xlane.xlu0 %1079 }
 0x1e8   : > { %v2336_v48 = vmax.f32 %v2333_v46, %v1080_v47 }
 0x1ea   : > { %v1094_v50 = vsub.f32 %v2333_v46, %v2336_v48  ;;  %1392 = vst.msk [vmem:[#allocation2] sm:$0xff] %vm317_vm2, %v2336_v48  ;;  %1108 = vperm.xlu0 %1803, %v2336_v48  }
 0x1eb   : > { %v1083_v51 = vpop.xlane.xlu0 %1082 }
 0x1ec   : > { %v2346_v52 = vmax.f32 %v2338_v49, %v1083_v51  ;;  %v1098_v36 = vmul.f32 1.442695, %v1094_v50 }
 0x1ee   : > { %v1095_v54 = vsub.f32 %v2338_v49, %v2346_v52  ;;  %1393 = vst.msk [vmem:[#allocation2 + $0x8] sm:$0xff] %vm317_vm2, %v2346_v52  ;;  %1113 = vperm.xlu1 %1804, %v2346_v52   ;;  %v1138_v52 = vld [vmem:[#allocation3] sm:$0xff] }
 0x1ef   : > { %v1086_v55 = vpop.xlane.xlu1 %1085 }
 0x1f0   : > { %v1092_v56 = vmax.f32 %v2348_v53, %v1086_v55 }
 0x1f2   : > { %v1096_v58 = vsub.f32 %v2348_v53, %v1092_v56  ;;  %1394 = vst.msk [vmem:[#allocation2 + $0x10] sm:$0xff] %vm317_vm2, %v1092_v56  ;;  %1118 = vperm.xlu1 %1804, %v1092_v56  }
 0x1f3   : > { %v1089_v59 = vpop.xlane.xlu1 %1088 }
 0x1f4   : > { %v1093_v60 = vmax.f32 %v2356_v57, %v1089_v59  ;;  %v1102_v30 = vmul.f32 1.442695, %v1096_v58 }
 0x1f6   : > { %v1097_v61 = vsub.f32 %v2356_v57, %v1093_v60  ;;  %1395 = vst.msk [vmem:[#allocation2 + $0x18] sm:$0xff] %vm317_vm2, %v1093_v60  ;;  %1123 = vperm.xlu1 %1804, %v1093_v60  }
 0x1f8   : > { %v1104_v32 = vmul.f32 1.442695, %v1097_v61 }
 0x269   : > { %v1109_v7 = vpop.permute.xlu0 %1108 }
 0x26a   : > { %v1126_v8 = vsub.f32 %v2320_v27, %v1109_v7 }
 0x26c   : > { %v1130_v9 = vmul.f32 1.442695, %v1126_v8 }
 0x26d   : > { %v1114_v10 = vpop.permute.xlu1 %1113 }
 0x26e   : > { %1805 = vpow2.f32 %v1130_v9  ;;  %v1127_v11 = vsub.f32 %v2323_v28, %v1114_v10 }
 0x270   : > { %v1132_v12 = vmul.f32 1.442695, %v1127_v11 }
 0x271   : > { %v1119_v13 = vpop.permute.xlu1 %1118 }
 0x272   : > { %1807 = vpow2.f32 %v1132_v12  ;;  %v1128_v14 = vsub.f32 %v1072_v41, %v1119_v13 }
 0x274   : > { %v1134_v15 = vmul.f32 1.442695, %v1128_v14  ;;  %v1170_v14 = vld [vmem:[#allocation4 + $0x18] sm:$0xff] }
 0x275   : > { %v1124_v16 = vpop.permute.xlu1 %1123 }
 0x276   : > { %1809 = vpow2.f32 %v1134_v15  ;;  %v1129_v17 = vsub.f32 %v1073_v42, %v1124_v16 }
 0x278   : > { %v1806_v18 = vpop.eup %1805  ;;  %v1136_v19 = vmul.f32 1.442695, %v1129_v17 }
 0x279   : > { %v1195_v20 = vpack.c.bf16 %v1806_v18, %v1806_v18  ;;  %v1146_v31 = vsel %vm326_vm0, %v1806_v18, 0.0 }
 0x27a   : > { %1811 = vpow2.f32 %v1136_v19 }
 0x27b   : > { %1701 = vmatmul.mubr.msk.bf16.vlgmr.msra.gmra.mrb[8].mxu0 %vm326_vm0, %v1195_v20  ;;  %1813 = vpow2.f32 %v1102_v30 }
 0x27c   : > { %v1808_v21 = vpop.eup %1807  ;;  %1711 = vmatpush3.bf16.msra.mxu0 %v1296_v4  ;;  %1712 = vmatprep.mubr.msk.bf16.mxu0 %vm2013_vm1, %v2012_v0 }
 0x27d   : > { %v1149_v22 = vsel %vm326_vm0, %v1808_v21, 0.0  ;;  %v1196_v23 = vpack.c.bf16 %v1808_v21, %v1808_v21 }
 0x27e   : > { %1150 = vadd.xlane.f32.xlu1 %v1149_v22 }
 0x27f   : > { %1707 = vmatmul.mubr.msk.bf16.vlgmr.msra.gmra.mrb[8].mxu1 %vm326_vm0, %v1196_v23 }
 0x280   : > { %v1810_v24 = vpop.eup %1809  ;;  %1717 = vmatpush3.bf16.msra.mxu1 %v1342_v6  ;;  %1718 = vmatprep.mubr.msk.bf16.mxu1 %vm2013_vm1, %v2012_v0  ;;  %v1100_v0 = vmul.f32 1.442695, %v1095_v54  ;;  %v1169_v6 = vld [vmem:[#allocation4 + $0x10] sm:$0xff] }
 0x281   : > { %v1152_v25 = vsel %vm326_vm0, %v1810_v24, 0.0  ;;  %v1197_v26 = vpack.c.bf16 %v1810_v24, %v1810_v24 }
 0x282   : > { %1153 = vadd.xlane.f32.xlu0 %v1152_v25  ;;  %1815 = vpow2.f32 %v1100_v0 }
 0x283   : > { %1713 = vmatmul.mubr.msk.bf16.vlgmr.msra.gmra.mrb[12].mxu0 %vm326_vm0, %v1197_v26  ;;  %1817 = vpow2.f32 %v1104_v32 }
 0x284   : > { %v1812_v27 = vpop.eup %1811  ;;  %1819 = vpow2.f32 %v1098_v36 }
 0x285   : > { %v1155_v28 = vsel %vm326_vm0, %v1812_v27, 0.0  ;;  %v1198_v29 = vpack.c.bf16 %v1812_v27, %v1812_v27  ;;  %v1814_v33 = vpop.eup %1813 }
 0x286   : > { %1156 = vadd.xlane.f32.xlu1 %v1155_v28  ;;  %v1144_v42 = vmul.f32 %v1814_v33, %v1140_v40 }
 0x287   : > { %1719 = vmatmul.mubr.msk.bf16.vlgmr.msra.gmra.mrb[12].mxu1 %vm326_vm0, %v1198_v29 }
 0x28a   : > { %1147 = vadd.xlane.f32.xlu1 %v1146_v31 }
 0x28c   : > { %v1816_v34 = vpop.eup %1815 }
 0x28d   : > { %v1818_v35 = vpop.eup %1817  ;;  %v1143_v38 = vmul.f32 %v1816_v34, %v1139_v37 }
 0x28e   : > { %v1145_v47 = vmul.f32 %v1818_v35, %v1141_v44  ;;  %v1820_v49 = vpop.eup %1819 }
 0x28f   : > { %v1142_v50 = vmul.f32 %v1820_v49, %v1138_v52 }
 0x298   : > { %1183 = vperm.xlu0 %1803, %v1814_v33   ;;  %v1167_v33 = vld [vmem:[#allocation4] sm:$0xff] }
 0x29b   : > { %1178 = vperm.xlu1 %1804, %v1816_v34  }
 0x29f   : > { %1188 = vperm.xlu1 %1804, %v1818_v35  }
 0x30b   : > { %v1151_v39 = vpop.xlane.xlu1 %1150 }
 0x30c   : > { %v1159_v41 = vadd.f32 %v1151_v39, %v1143_v38 }
 0x30e   : > { %1164 = vst.msk [vmem:[#allocation3 + $0x8] sm:$0xff] %vm317_vm2, %v1159_v41 }
 0x30f   : > { %v1154_v43 = vpop.xlane.xlu0 %1153 }
 0x310   : > { %v1160_v45 = vadd.f32 %v1154_v43, %v1144_v42 }
 0x312   : > { %1165 = vst.msk [vmem:[#allocation3 + $0x10] sm:$0xff] %vm317_vm2, %v1160_v45 }
 0x313   : > { %v1157_v51 = vpop.xlane.xlu1 %1156 }
 0x314   : > { %v1161_v46 = vadd.f32 %v1157_v51, %v1145_v47 }
 0x315   : > { %v1400_v48 = vld [vmem:[#allocation3 + $0x8] sm:$0xff] }
 0x316   : > { %1166 = vst.msk [vmem:[#allocation3 + $0x18] sm:$0xff] %vm317_vm2, %v1161_v46  ;;  %1821 = vrcp.f32 %v1400_v48 }
 0x317   : > { %v1148_v53 = vpop.xlane.xlu1 %1147  ;;  %v1184_v7 = vpop.permute.xlu0 %1183 }
 0x318   : > { %v1158_v54 = vadd.f32 %v1148_v53, %v1142_v50  ;;  %v1193_v12 = vmul.f32 %v1184_v7, %v1169_v6 }
 0x319   : > { %v1401_v55 = vld [vmem:[#allocation3 + $0x10] sm:$0xff] }
 0x31a   : > { %1163 = vst.msk [vmem:[#allocation3] sm:$0xff] %vm317_vm2, %v1158_v54  ;;  %1823 = vrcp.f32 %v1401_v55 }
 0x31b   : > { %v1179_v63 = vpop.permute.xlu1 %1178 }
 0x31c   : > { %v1192_v4 = vmul.f32 %v1179_v63, %v1168_v62 }
 0x31d   : > { %v1402_v56 = vld [vmem:[#allocation3 + $0x18] sm:$0xff] }
 0x31e   : > { %1825 = vrcp.f32 %v1402_v56 }
 0x31f   : > { %v1189_v15 = vpop.permute.xlu1 %1188 }
 0x320   : > { %v1822_v57 = vpop.eup %1821  ;;  %v1194_v20 = vmul.f32 %v1189_v15, %v1170_v14 }
 0x321   : > { %1418 = vperm.xlu1 %1804, %v1822_v57   ;;  %v1399_v58 = vld [vmem:[#allocation3] sm:$0xff] }
 0x322   : > { %1827 = vrcp.f32 %v1399_v58 }
 0x324   : > { %v1824_v59 = vpop.eup %1823 }
 0x325   : > { %1423 = vperm.xlu1 %1804, %v1824_v59  }
 0x328   : > { %v1826_v60 = vpop.eup %1825 }
 0x329   : > { %1428 = vperm.xlu0 %1803, %v1826_v60   ;;  %1173 = vperm.xlu1 %1804, %v1820_v49  }
 0x32c   : > { %v1828_v61 = vpop.eup %1827 }
 0x32d   : > { %1413 = vperm.xlu0 %1803, %v1828_v61  }
 0x34e   : > { %v1240_v1 = vpop.f32.mrb[8].mxu0 }
 0x34f   : > { %v1702_v2 = vpop.f32.mrb[9].mxu0 }
 0x350   : > { %v1243_v3 = vpop.f32.mrb[10].mxu0 }
 0x351   : > { %v1703_v5 = vpop.f32.mrb[11].mxu0 }
 0x352   : > { %v1286_v8 = vpop.f32.mrb[8].mxu1 }
 0x353   : > { %v1385_v9 = vadd.f32 %v1286_v8, %v1192_v4  ;;  %v1708_v10 = vpop.f32.mrb[9].mxu1 }
 0x354   : > { %v1289_v11 = vpop.f32.mrb[10].mxu1 }
 0x355   : > { %1389 = vst.msk [vmem:[#allocation4 + $0x8] sm:$0xff] %vm326_vm0, %v1385_v9  ;;  %v1709_v13 = vpop.f32.mrb[11].mxu1 }
 0x356   : > { %v1332_v16 = vpop.f32.mrb[12].mxu0 }
 0x357   : > { %v1386_v17 = vadd.f32 %v1332_v16, %v1193_v12  ;;  %v1714_v18 = vpop.f32.mrb[13].mxu0 }
 0x358   : > { %v1335_v19 = vpop.f32.mrb[14].mxu0 }
 0x359   : > { %1390 = vst.msk [vmem:[#allocation4 + $0x10] sm:$0xff] %vm326_vm0, %v1386_v17  ;;  %v1715_v21 = vpop.f32.mrb[15].mxu0 }
 0x35a   : > { %v1378_v22 = vpop.f32.mrb[12].mxu1 }
 0x35b   : > { %v1387_v23 = vadd.f32 %v1378_v22, %v1194_v20  ;;  %v1720_v24 = vpop.f32.mrb[13].mxu1 }
 0x35c   : > { %v1381_v25 = vpop.f32.mrb[14].mxu1  ;;  %v1408_v27 = vld [vmem:[#allocation4 + $0x8] sm:$0xff] }
 0x35d   : > { %1391 = vst.msk [vmem:[#allocation4 + $0x18] sm:$0xff] %vm326_vm0, %v1387_v23  ;;  %v1721_v26 = vpop.f32.mrb[15].mxu1 }
 0x360   : > { %v1409_v0 = vld [vmem:[#allocation4 + $0x10] sm:$0xff] }
 0x364   : > { %v1410_v35 = vld [vmem:[#allocation4 + $0x18] sm:$0xff] }
 0x3a0   : > { %v1419_v28 = vpop.permute.xlu1 %1418 }
 0x3a1   : > { %v1432_v29 = vmul.f32 %v1419_v28, %v1408_v27 }
 0x3a3   : > { %v1655_v30 = vpack.c.bf16 %v1432_v29, %v1432_v29 }
 0x3a4   : > { %v1424_v31 = vpop.permute.xlu1 %1423 }
 0x3a5   : > { %v1433_v32 = vmul.f32 %v1424_v31, %v1409_v0  ;;  %1442 = vrot.lane.b32.xlu1 %v1655_v30, %s2016_s24 }
 0x3a7   : > { %v1656_v34 = vpack.c.bf16 %v1433_v32, %v1433_v32 }
 0x3a8   : > { %v1429_v36 = vpop.permute.xlu0 %1428  ;;  %v1174_v37 = vpop.permute.xlu1 %1173 }
 0x3a9   : > { %v1434_v38 = vmul.f32 %v1429_v36, %v1410_v35  ;;  %v1191_v39 = vmul.f32 %v1174_v37, %v1167_v33  ;;  %1451 = vrot.lane.b32.xlu0 %v1656_v34, %s2017_s16 }
 0x3ab   : > { %v1657_v40 = vpack.c.bf16 %v1434_v38, %v1434_v38  ;;  %v1384_v41 = vadd.f32 %v1240_v1, %v1191_v39 }
 0x3ac   : > { %v1414_v43 = vpop.permute.xlu0 %1413 }
 0x3ad   : > { %1388 = vst.msk [vmem:[#allocation4] sm:$0xff] %vm326_vm0, %v1384_v41  ;;  %1460 = vrot.lane.b32.xlu1 %v1657_v40, %s2018_s20 }
 0x3b4   : > { %v1407_v42 = vld [vmem:[#allocation4] sm:$0xff] }
 0x3b5   : > { %v1431_v44 = vmul.f32 %v1414_v43, %v1407_v42 }
 0x3b7   : > { %v1435_v45 = vpack.c.bf16 %v1431_v44, %v1431_v44 }
 0x3b9   : > { %1437 = vst.msk [vmem:[%s307_s7] sm:$0xf] %vm1436_vm5, %v1435_v45 }
 0x417   : > { %v1443_v47 = vpop.permute.xlu1 %1442 }
 0x418   : > { %1446 = vst.msk [vmem:[%s307_s7] sm:$0xf] %vm1445_vm6, %v1443_v47 }
 0x41b   : > { %v1452_v49 = vpop.permute.xlu0 %1451 }
 0x41c   : > { %1455 = vst.msk [vmem:[%s307_s7] sm:$0xf] %vm1454_vm7, %v1452_v49 }
 0x41f   : > { %v1461_v51 = vpop.permute.xlu1 %1460 }
 0x420   : > { %1464 = vst.msk [vmem:[%s307_s7] sm:$0xf] %vm1463_vm8, %v1461_v51 }
 0x421   : > { %1932 = shalt.err (!%p1929_p13)
}
 0x422   : > { %s1933_s21 = scalar_lea.hbm %s2399_s1, 64  ;;  %s1937_s11 = scalar_lea.hbm %s2451_s3, 128 }
 0x423   : > { %p1934_p11 = scmp.ne.s32.totalorder %s2399_s1, %s1933_s21  ;;  %p1938_p7 = scmp.lt.u32.totalorder %s2399_s1, %s2451_s3 }
 0x424   : > { %p1939_p4 = scmp.lt.u32.totalorder %s1937_s11, %s1933_s21  ;;  %p1941_p0 = scmp.lt.u32.totalorder %s1933_s21, %s2399_s1 }
 0x425   : > { %p1935_p2 = pnand %p1934_p11, %p2480_p10 }
 0x426   : > { %p1940_p3 = por %p1939_p4, %p1938_p7 }
 0x427   : > { %p1936_p5 = pneg %p1935_p2 }
 0x428   : > { %p1942_p8 = por %p1941_p0, %p1940_p3 }
 0x42a   : > { %p1943_p9 = pnand %p1942_p8, %p1936_p5 }
 0x42c   : > { %1946 = shalt.err (!%p1943_p9)
}
 0x42d   : > { %1728 = dma.vmem_to_hbm [thread:$0]  (%p2480_p10), %s2401_s6, 64, %s2399_s1, %s1466_s28  }
 0x42e PF: > { %s1492_s18 = sand.u32 1, %s1985_s12   ;;  %p2481_p12 = scmp.ne.s32.totalorder %s2468_s27, 0 }
 0x42f   : > { %p2482_p1 = scmp.ge.s32.totalorder %s2005_s17, 2  ;;  %s1493_s24 = scalar_lea.sflag [#allocation7], %s1492_s18 }
 0x431   : > { %p1741_p6 = pnand %p2482_p1, %p2481_p12 }
 0x433   : > { %1980 = dma.done.wait (!%p1741_p6), %s1493_s24, 64  }
 0x434   : > { %1982 = vsyncadd (!%p1741_p6), %s1493_s24, 4294967232  ;;  %s22_s17 = sadd.s32 1, %s2005_s17   ;;  %s2483_s25 = sld [smem:[#allocation17_spill]] }
 0x435   : > { %p19_p13 = scmp.ge.s32.totalorder %s22_s17, 4   ;;  %s2484_s15 = sld [smem:[#allocation15_spill]] }
 0x436   : > { %s2485_s16 = sld [smem:[#allocation16_spill]]  ;;  %s2486_s12 = smov %s1989_s13 }
 0x437   : > { %s2487_s13 = smov %s1993_s14  ;;  %21 = sbr.rel (!%p19_p13) target bundleno = 10 (0xa), region = 117 }
 0x43a   : > { %s2488_s14 = smov %s2483_s25 }
 0x43e   :  { %1498 = vsyncpa [#allocation6], 1 }
 0x43f   :  { %1500 = vsyncpa [#allocation6 + $0x1], 1 }
 0x440   :  { %1501 = vsyncpa [#allocation9], 1 }
 0x441   :  { %1503 = vsyncpa [#allocation9 + $0x1], 1 }
 0x442   :  { %1504 = vsyncpa [#allocation7], 1 }
 0x443   :  { %1506 = vsyncpa [#allocation7 + $0x1], 1 }

</bundles_post_ra>
